<compile_context>
chip_gen: v5e
topology: v5e:2x2
jax: 0.10.0
libtpu: 0.0.40
codegen_flags: <defaults>
</compile_context>

<pallas_src>
import functools

import jax
import jax.numpy as jnp
from jax.experimental import pallas as pl
from jax.experimental.pallas import tpu as pltpu


_ACC_TILE_BYTES = 128 * 1024   # keep the f32 register accumulator <= ~32 vregs
_M_TARGET = 512                # target GEMM M (rows) per tile
_EPS = 1e-5
_NEG_SLOPE = 0.2


def _round_up(x, m):
    return (x + m - 1) // m * m


# ----------------------------------------------------------------------------
# Pallas kernel: implicit-im2col conv (+ bias) (+ InstanceNorm) (+ LeakyReLU)
# ----------------------------------------------------------------------------
def _conv_block_kernel(x_ref, w_ref, b_ref, mask_ref, o_ref, *scratch,
                       kp, we, oc, tiles, use_norm, use_lrelu, inv_count):
    """One sample per grid step, 'wide' flattened-spatial layout.

    x_ref   : (1, Mi, Ce)      bf16 padded input, Mi = He*We (+ tail pad)
    w_ref   : (kp*kp, Ce, OC)  bf16 per-tap weight matrices (resident)
    b_ref   : (1, OC)          f32 bias (ignored on InstanceNorm layers)
    mask_ref: (OH*We, 1)       f32 1/0 valid-column mask (used only for stats)
    o_ref   : (1, OH*We, OC)   wide output; columns >= OW of each row are
                               garbage and sliced off by the caller
    scratch : ((OH*We, OC) f32 pre-norm buffer,) only for use_norm layers
    """

    def conv_tile(r0, rows):
        # Sum of kp*kp taps, each a single (rows*We, Ce) @ (Ce, OC) GEMM; the
        # tap shift (ih, iw) is folded into the (static) load offset so no
        # shifted reload / reshape is needed.
        m = rows * we
        acc = jnp.zeros((m, oc), jnp.float32)
        for ih in range(kp):
            base = (r0 + ih) * we
            for iw in range(kp):
                xs = x_ref[0, base + iw: base + iw + m, :]
                acc = acc + jnp.dot(xs, w_ref[ih * kp + iw],
                                    preferred_element_type=jnp.float32)
        return acc

    if use_norm:
        y_ref = scratch[0]
        s = jnp.zeros((1, oc), jnp.float32)
        ss = jnp.zeros((1, oc), jnp.float32)
        # Pass 1: conv -> f32 scratch; accumulate masked per-channel stats.
        # (bias is skipped: it is exactly cancelled by the mean subtraction)
        for r0, rows in tiles:
            m = rows * we
            acc = conv_tile(r0, rows)
            msk = mask_ref[r0 * we: r0 * we + m, :]          # (m, 1) in {0,1}
            v = acc * msk
            s = s + jnp.sum(v, axis=0, keepdims=True)
            ss = ss + jnp.sum(v * acc, axis=0, keepdims=True)  # = sum(m*acc^2)
            y_ref[r0 * we: r0 * we + m, :] = acc
        mean = s * inv_count
        var = jnp.maximum(ss * inv_count - mean * mean, 0.0)
        inv_std = jax.lax.rsqrt(var + _EPS)                   # EUP slot
        # Pass 2: normalize + activation, one row-tile at a time.
        for r0, rows in tiles:
            m = rows * we
            y = (y_ref[r0 * we: r0 * we + m, :] - mean) * inv_std
            if use_lrelu:
                y = jnp.where(y > 0, y, _NEG_SLOPE * y)
            o_ref[0, r0 * we: r0 * we + m, :] = y.astype(o_ref.dtype)
    else:
        bias = b_ref[...]                                     # (1, OC) f32
        for r0, rows in tiles:
            m = rows * we
            y = conv_tile(r0, rows) + bias
            if use_lrelu:
                y = jnp.where(y > 0, y, _NEG_SLOPE * y)
            o_ref[0, r0 * we: r0 * we + m, :] = y.astype(o_ref.dtype)


# ----------------------------------------------------------------------------
# JAX glue: padding, space-to-depth (stride-2 -> stride-1), weight re-layout
# ----------------------------------------------------------------------------
def _space_to_depth(x):
    """(N, H, W, C) -> (N, H//2, W//2, 4C) with channel order (p, q, c)."""
    n, h, w, c = x.shape
    x = x.reshape(n, h // 2, 2, w // 2, 2, c)
    x = x.transpose(0, 1, 3, 2, 4, 5)
    return x.reshape(n, h // 2, w // 2, 4 * c)


def _weights_for_taps(w_oihw, stride):
    """OIHW (O, C, 4, 4) -> (kp*kp, Ce, O) matching the kernel tap ordering."""
    o, c, _, _ = w_oihw.shape
    w_hwio = jnp.transpose(w_oihw, (2, 3, 1, 0))     # (4, 4, C, O) = [i, j, c, o]
    if stride == 2:
        # i = 2*ih + p, j = 2*iw + q -> tap (ih, iw), reduction index (p, q, c)
        w_r = w_hwio.reshape(2, 2, 2, 2, c, o)       # (ih, p, iw, q, C, O)
        w_r = w_r.transpose(0, 2, 1, 3, 4, 5)        # (ih, iw, p, q, C, O)
        return w_r.reshape(4, 4 * c, o), 2
    return w_hwio.reshape(16, c, o), 4


@functools.lru_cache(maxsize=1)
def _vmem_capacity_bytes():
    try:
        cap = getattr(pltpu.get_tpu_info(), "vmem_capacity_bytes", None)
        if cap:
            return int(cap)
    except Exception:
        pass
    return 64 << 20   # conservative fallback (v7x per-TensorCore VMEM)


def _row_tiles(oh, we, oc):
    """Static row-tile schedule: M ~ _M_TARGET, f32 acc <= _ACC_TILE_BYTES."""
    budget_rows = max(1, _ACC_TILE_BYTES // (4 * max(oc, 1) * we))
    target_rows = max(1, _M_TARGET // we)
    rt = max(1, min(oh, budget_rows, target_rows))
    return tuple((r0, min(rt, oh - r0)) for r0 in range(0, oh, rt))


def conv_block(x_nhwc, w_oihw, bias, *, stride, use_norm, use_lrelu, out_dtype):
    """x_nhwc: (N, H, W, C) -> (N, OH, OW, OC); fused conv/norm/act on TPU."""
    n, h, w_dim, c = x_nhwc.shape
    oc = w_oihw.shape[0]

    xp = jnp.pad(x_nhwc, ((0, 0), (1, 1), (1, 1), (0, 0)))
    if stride == 2:
        assert (h + 2) % 2 == 0 and (w_dim + 2) % 2 == 0, \
            "stride-2 block requires even padded H/W"
        x_eff = _space_to_depth(xp)                  # 4x4/s2 conv -> 2x2/s1 conv
    else:
        x_eff = xp
    w_eff, kp = _weights_for_taps(w_oihw, stride)

    he, we, ce = x_eff.shape[1:]
    oh, ow = he - kp + 1, we - kp + 1

    # Flatten spatial ("wide" layout); pad the tail so the widest tap slice of
    # the last row-tile stays in bounds.
    m_in = he * we
    m_in_pad = _round_up(m_in + kp - 1, 8)
    x_flat = x_eff.reshape(n, m_in, ce)
    x_flat = jnp.pad(x_flat, ((0, 0), (0, m_in_pad - m_in), (0, 0)))
    x_flat = x_flat.astype(jnp.bfloat16)
    w_eff = w_eff.astype(jnp.bfloat16)
    b_eff = bias.reshape(1, oc).astype(jnp.float32)

    m_out = oh * we
    tiles = _row_tiles(oh, we, oc)

    # 1/0 valid-column mask for InstanceNorm stats over the wide layout.
    col_mask = (jnp.arange(m_out) % we < ow).astype(jnp.float32).reshape(m_out, 1)

    kernel = functools.partial(
        _conv_block_kernel, kp=kp, we=we, oc=oc, tiles=tiles,
        use_norm=use_norm, use_lrelu=use_lrelu, inv_count=1.0 / (oh * ow))

    # VMEM budget: double-buffered blocks + resident weights + f32 scratch,
    # capped at 75% of physical VMEM (v7x has only 64 MiB per TensorCore).
    out_itemsize = jnp.dtype(out_dtype).itemsize
    x_bytes = m_in_pad * ce * 2
    w_bytes = kp * kp * ce * oc * 2
    o_bytes = m_out * oc * out_itemsize
    y_bytes = m_out * oc * 4 if use_norm else 0
    est = 2 * (x_bytes + o_bytes + w_bytes + m_out * 4 + oc * 4) + y_bytes + (4 << 20)
    vmem_cap = int(0.75 * _vmem_capacity_bytes())
    vmem_bytes = int(min(max(est, 16 << 20), vmem_cap))

    flops = 2 * n * kp * kp * m_out * ce * oc
    bytes_accessed = n * (x_bytes + o_bytes) + w_bytes + 4 * (oc + m_out)
    transcendentals = n * oc if use_norm else 0

    scratch_shapes = [pltpu.VMEM((m_out, oc), jnp.float32)] if use_norm else []

    out_wide = pl.pallas_call(
        kernel,
        out_shape=jax.ShapeDtypeStruct((n, m_out, oc), out_dtype),
        grid=(n,),
        in_specs=[
            pl.BlockSpec((1, m_in_pad, ce), lambda i: (i, 0, 0)),
            pl.BlockSpec((kp * kp, ce, oc), lambda i: (0, 0, 0)),
            pl.BlockSpec((1, oc), lambda i: (0, 0)),
            pl.BlockSpec((m_out, 1), lambda i: (0, 0)),
        ],
        out_specs=pl.BlockSpec((1, m_out, oc), lambda i: (i, 0, 0)),
        scratch_shapes=scratch_shapes,
        compiler_params=pltpu.CompilerParams(
            dimension_semantics=("parallel",),
            vmem_limit_bytes=vmem_bytes),
        cost_estimate=pl.CostEstimate(flops=int(flops),
                                      transcendentals=int(transcendentals),
                                      bytes_accessed=int(bytes_accessed)),
    )(x_flat, w_eff, b_eff, col_mask)

    # Drop the wrap-around ("garbage") columns of the wide layout.
    return out_wide.reshape(n, oh, we, oc)[:, :, :ow, :]


# ----------------------------------------------------------------------------
# Discriminator forward (matches PyTorch module semantics)
# ----------------------------------------------------------------------------
# (stride, instance_norm, leaky_relu) per ConvBlock; all use kernel=4, pad=1.
_BLOCK_CFGS = (
    (2, False, True),
    (2, True, True),
    (2, True, True),
    (1, True, True),
    (1, False, False),
)


def discriminator_forward(x_nchw, params):
    """x: (N, C_in, H, W) NCHW float32; params: list of (weight OIHW, bias)."""
    x = jnp.transpose(x_nchw, (0, 2, 3, 1))          # NCHW -> NHWC, once
    n_blocks = len(params)
    for idx, ((w, b), (stride, use_norm, use_lrelu)) in enumerate(
            zip(params, _BLOCK_CFGS)):
        last = idx == n_blocks - 1
        x = conv_block(x, w, b, stride=stride, use_norm=use_norm,
                       use_lrelu=use_lrelu,
                       out_dtype=jnp.float32 if last else jnp.bfloat16)
    # Final layer has C_out == 1, so this transpose is layout-free.
    return jnp.transpose(x, (0, 3, 1, 2))            # NHWC -> NCHW


# ----------------------------------------------------------------------------
# Pure-JAX f32 reference (for correctness check only)
# ----------------------------------------------------------------------------
def _reference_forward(x, params):
    for (w, b), (stride, use_norm, use_lrelu) in zip(params, _BLOCK_CFGS):
        y = jax.lax.conv_general_dilated(
            x, w, window_strides=(stride, stride), padding=[(1, 1), (1, 1)],
            dimension_numbers=("NCHW", "OIHW", "NCHW"),
            precision=jax.lax.Precision.HIGHEST)
        y = y + b[None, :, None, None]
        if use_norm:
            mean = jnp.mean(y, axis=(2, 3), keepdims=True)
            var = jnp.mean((y - mean) ** 2, axis=(2, 3), keepdims=True)
            y = (y - mean) * jax.lax.rsqrt(var + 1e-5)
        if use_lrelu:
            y = jnp.where(y > 0, y, 0.2 * y)
        x = y
    return x


# ----------------------------------------------------------------------------
# Deterministic parameter init (normal_weight_init semantics: N(0, 0.02))
# ----------------------------------------------------------------------------
def init_params(key, input_dim, num_filter, output_dim):
    channels = [
        (input_dim, num_filter),
        (num_filter, num_filter * 2),
        (num_filter * 2, num_filter * 4),
        (num_filter * 4, num_filter * 8),
        (num_filter * 8, output_dim),
    ]
    params = []
    for (c_in, c_out) in channels:
        key, kw, kb = jax.random.split(key, 3)
        w = 0.02 * jax.random.normal(kw, (c_out, c_in, 4, 4), dtype=jnp.float32)
        b = 0.02 * jax.random.normal(kb, (c_out,), dtype=jnp.float32)
        params.append((w, b))
    return params


if __name__ == "__main__":
    key = jax.random.PRNGKey(0)
    k_x1, k_x2, k_p = jax.random.split(key, 3)

    input_dim, num_filter, output_dim = 3, 8, 1
    params = init_params(k_p, input_dim, num_filter, output_dim)

    fwd = jax.jit(discriminator_forward)

    # Case 1: module-scale small input (single row-tile per layer).
    x1 = jax.random.normal(k_x1, (2, input_dim, 32, 32), dtype=jnp.float32)
    out1 = jax.block_until_ready(fwd(x1, params))
    ref1 = jax.block_until_ready(_reference_forward(x1, params))
    assert out1.shape == ref1.shape, (out1.shape, ref1.shape)
    err1 = float(jnp.max(jnp.abs(out1 - ref1)))
    # Tolerance covers bf16 activation/weight streams through 5 conv+IN layers
    # vs. an f32 HIGHEST-precision reference.
    assert jnp.allclose(out1, ref1, atol=5e-2, rtol=5e-2), err1

    # Case 2: larger spatial size so early layers exercise the multi-row-tile
    # path (including cross-tile InstanceNorm statistics).
    x2 = jax.random.normal(k_x2, (1, input_dim, 96, 96), dtype=jnp.float32)
    out2 = jax.block_until_ready(fwd(x2, params))
    ref2 = jax.block_until_ready(_reference_forward(x2, params))
    assert out2.shape == ref2.shape, (out2.shape, ref2.shape)
    err2 = float(jnp.max(jnp.abs(out2 - ref2)))
    assert jnp.allclose(out2, ref2, atol=5e-2, rtol=5e-2), err2

    print("KERNEL_OK")
</pallas_src>

<mosaic_0001>
module attributes {stable_mosaic.version = 11 : i64} {
  func.func @_conv_block_kernel(%arg0: i32, %arg1: memref<1x296x12xbf16, #tpu.memory_space<vmem>>, %arg2: memref<4x12x8xbf16, #tpu.memory_space<vmem>>, %arg3: memref<1x8xf32, #tpu.memory_space<vmem>>, %arg4: memref<272x1xf32, #tpu.memory_space<vmem>>, %arg5: memref<1x272x8xbf16, #tpu.memory_space<vmem>>) attributes {dimension_semantics = [#tpu.dimension_semantics<parallel>], iteration_bounds = array<i64: 2>, scalar_prefetch = 0 : i64, scratch_operands = 0 : i64, tpu.core_type = #tpu.core_type<tc>, window_params = [{transform_indices = @transform_0, window_bounds = array<i64: 1, 296, 12>}, {pipeline_mode = #tpu.pipeline_mode<synchronous>, transform_indices = @transform_1, window_bounds = array<i64: 4, 12, 8>}, {pipeline_mode = #tpu.pipeline_mode<synchronous>, transform_indices = @transform_2, window_bounds = array<i64: 1, 8>}, {pipeline_mode = #tpu.pipeline_mode<synchronous>, transform_indices = @transform_3, window_bounds = array<i64: 272, 1>}, {transform_indices = @transform_4, window_bounds = array<i64: 1, 272, 8>}]} {
    %c0 = arith.constant 0 : index
    %c0_0 = arith.constant 0 : index
    %0 = vector.load %arg3[%c0, %c0_0] : memref<1x8xf32, #tpu.memory_space<vmem>>, vector<1x8xf32>
    %cst = arith.constant 0.000000e+00 : f32
    %1 = vector.broadcast %cst : f32 to vector<272x8xf32>
    %c0_1 = arith.constant 0 : index
    %c0_2 = arith.constant 0 : index
    %c0_3 = arith.constant 0 : index
    %2 = vector.load %arg1[%c0_1, %c0_2, %c0_3] : memref<1x296x12xbf16, #tpu.memory_space<vmem>>, vector<1x272x12xbf16>
    %3 = vector.shape_cast %2 : vector<1x272x12xbf16> to vector<272x12xbf16>
    %c0_4 = arith.constant 0 : index
    %c0_5 = arith.constant 0 : index
    %c0_6 = arith.constant 0 : index
    %4 = vector.load %arg2[%c0_4, %c0_5, %c0_6] : memref<4x12x8xbf16, #tpu.memory_space<vmem>>, vector<1x12x8xbf16>
    %5 = vector.shape_cast %4 : vector<1x12x8xbf16> to vector<12x8xbf16>
    %cst_7 = arith.constant dense<0.000000e+00> : vector<272x8xf32>
    %6 = tpu.matmul %3, %5, %cst_7 {dimension_numbers = #tpu.dot_dimension_numbers<[1], [0], [0], [1], [0, 0, 1, 1], [], []>} : vector<272x12xbf16>, vector<12x8xbf16>, vector<272x8xf32> -> vector<272x8xf32>
    %7 = arith.addf %1, %6 : vector<272x8xf32>
    %c0_8 = arith.constant 0 : index
    %c1 = arith.constant 1 : index
    %c0_9 = arith.constant 0 : index
    %8 = vector.load %arg1[%c0_8, %c1, %c0_9] : memref<1x296x12xbf16, #tpu.memory_space<vmem>>, vector<1x272x12xbf16>
    %9 = vector.shape_cast %8 : vector<1x272x12xbf16> to vector<272x12xbf16>
    %c1_10 = arith.constant 1 : index
    %c0_11 = arith.constant 0 : index
    %c0_12 = arith.constant 0 : index
    %10 = vector.load %arg2[%c1_10, %c0_11, %c0_12] : memref<4x12x8xbf16, #tpu.memory_space<vmem>>, vector<1x12x8xbf16>
    %11 = vector.shape_cast %10 : vector<1x12x8xbf16> to vector<12x8xbf16>
    %cst_13 = arith.constant dense<0.000000e+00> : vector<272x8xf32>
    %12 = tpu.matmul %9, %11, %cst_13 {dimension_numbers = #tpu.dot_dimension_numbers<[1], [0], [0], [1], [0, 0, 1, 1], [], []>} : vector<272x12xbf16>, vector<12x8xbf16>, vector<272x8xf32> -> vector<272x8xf32>
    %13 = arith.addf %7, %12 : vector<272x8xf32>
    %c0_14 = arith.constant 0 : index
    %c17 = arith.constant 17 : index
    %c0_15 = arith.constant 0 : index
    %14 = vector.load %arg1[%c0_14, %c17, %c0_15] : memref<1x296x12xbf16, #tpu.memory_space<vmem>>, vector<1x272x12xbf16>
    %15 = vector.shape_cast %14 : vector<1x272x12xbf16> to vector<272x12xbf16>
    %c2 = arith.constant 2 : index
    %c0_16 = arith.constant 0 : index
    %c0_17 = arith.constant 0 : index
    %16 = vector.load %arg2[%c2, %c0_16, %c0_17] : memref<4x12x8xbf16, #tpu.memory_space<vmem>>, vector<1x12x8xbf16>
    %17 = vector.shape_cast %16 : vector<1x12x8xbf16> to vector<12x8xbf16>
    %cst_18 = arith.constant dense<0.000000e+00> : vector<272x8xf32>
    %18 = tpu.matmul %15, %17, %cst_18 {dimension_numbers = #tpu.dot_dimension_numbers<[1], [0], [0], [1], [0, 0, 1, 1], [], []>} : vector<272x12xbf16>, vector<12x8xbf16>, vector<272x8xf32> -> vector<272x8xf32>
    %19 = arith.addf %13, %18 : vector<272x8xf32>
    %c0_19 = arith.constant 0 : index
    %c18 = arith.constant 18 : index
    %c0_20 = arith.constant 0 : index
    %20 = vector.load %arg1[%c0_19, %c18, %c0_20] : memref<1x296x12xbf16, #tpu.memory_space<vmem>>, vector<1x272x12xbf16>
    %21 = vector.shape_cast %20 : vector<1x272x12xbf16> to vector<272x12xbf16>
    %c3 = arith.constant 3 : index
    %c0_21 = arith.constant 0 : index
    %c0_22 = arith.constant 0 : index
    %22 = vector.load %arg2[%c3, %c0_21, %c0_22] : memref<4x12x8xbf16, #tpu.memory_space<vmem>>, vector<1x12x8xbf16>
    %23 = vector.shape_cast %22 : vector<1x12x8xbf16> to vector<12x8xbf16>
    %cst_23 = arith.constant dense<0.000000e+00> : vector<272x8xf32>
    %24 = tpu.matmul %21, %23, %cst_23 {dimension_numbers = #tpu.dot_dimension_numbers<[1], [0], [0], [1], [0, 0, 1, 1], [], []>} : vector<272x12xbf16>, vector<12x8xbf16>, vector<272x8xf32> -> vector<272x8xf32>
    %25 = arith.addf %19, %24 : vector<272x8xf32>
    %26 = vector.broadcast %0 : vector<1x8xf32> to vector<272x8xf32>
    %27 = arith.addf %25, %26 : vector<272x8xf32>
    %cst_24 = arith.constant 0.000000e+00 : f32
    %28 = vector.broadcast %cst_24 : f32 to vector<272x8xf32>
    %29 = arith.cmpf ogt, %27, %28 : vector<272x8xf32>
    %cst_25 = arith.constant 2.000000e-01 : f32
    %30 = vector.broadcast %cst_25 : f32 to vector<272x8xf32>
    %31 = arith.mulf %30, %27 : vector<272x8xf32>
    %32 = arith.select %29, %27, %31 : vector<272x8xi1>, vector<272x8xf32>
    %33 = arith.truncf %32 : vector<272x8xf32> to vector<272x8xbf16>
    %c0_26 = arith.constant 0 : index
    %c0_27 = arith.constant 0 : index
    %c0_28 = arith.constant 0 : index
    %34 = vector.load %arg5[%c0_26, %c0_27, %c0_28] : memref<1x272x8xbf16, #tpu.memory_space<vmem>>, vector<1x272x8xbf16>
    %35 = vector.shape_cast %34 : vector<1x272x8xbf16> to vector<272x8xbf16>
    %36 = vector.shape_cast %33 : vector<272x8xbf16> to vector<1x272x8xbf16>
    tpu.vector_store %arg5[%c0_26, %c0_27, %c0_28], %36 {strides = array<i32>} : memref<1x272x8xbf16, #tpu.memory_space<vmem>>, vector<1x272x8xbf16>,
    return
  }
  func.func @transform_0(%arg0: i32) -> (i32, i32, i32) {
    %c0_i32 = arith.constant 0 : i32
    %c0_i32_0 = arith.constant 0 : i32
    %c0_i32_1 = arith.constant 0 : i32
    return %arg0, %c0_i32, %c0_i32_0 : i32, i32, i32
  }
  func.func @transform_1(%arg0: i32) -> (i32, i32, i32) {
    %c0_i32 = arith.constant 0 : i32
    %c0_i32_0 = arith.constant 0 : i32
    %c0_i32_1 = arith.constant 0 : i32
    %c0_i32_2 = arith.constant 0 : i32
    return %c0_i32, %c0_i32_0, %c0_i32_1 : i32, i32, i32
  }
  func.func @transform_2(%arg0: i32) -> (i32, i32) {
    %c0_i32 = arith.constant 0 : i32
    %c0_i32_0 = arith.constant 0 : i32
    %c0_i32_1 = arith.constant 0 : i32
    return %c0_i32, %c0_i32_0 : i32, i32
  }
  func.func @transform_3(%arg0: i32) -> (i32, i32) {
    %c0_i32 = arith.constant 0 : i32
    %c0_i32_0 = arith.constant 0 : i32
    %c0_i32_1 = arith.constant 0 : i32
    return %c0_i32, %c0_i32_0 : i32, i32
  }
  func.func @transform_4(%arg0: i32) -> (i32, i32, i32) {
    %c0_i32 = arith.constant 0 : i32
    %c0_i32_0 = arith.constant 0 : i32
    %c0_i32_1 = arith.constant 0 : i32
    return %arg0, %c0_i32, %c0_i32_0 : i32, i32, i32
  }
}

module attributes {stable_mosaic.version = 11 : i64} {
  func.func @_conv_block_kernel(%arg0: i32, %arg1: memref<1x88x32xbf16, #tpu.memory_space<vmem>>, %arg2: memref<4x32x16xbf16, #tpu.memory_space<vmem>>, %arg3: memref<1x16xf32, #tpu.memory_space<vmem>>, %arg4: memref<72x1xf32, #tpu.memory_space<vmem>>, %arg5: memref<1x72x16xbf16, #tpu.memory_space<vmem>>, %arg6: memref<72x16xf32, #tpu.memory_space<vmem>>) attributes {dimension_semantics = [#tpu.dimension_semantics<parallel>], iteration_bounds = array<i64: 2>, scalar_prefetch = 0 : i64, scratch_operands = 1 : i64, tpu.core_type = #tpu.core_type<tc>, window_params = [{transform_indices = @transform_0, window_bounds = array<i64: 1, 88, 32>}, {pipeline_mode = #tpu.pipeline_mode<synchronous>, transform_indices = @transform_1, window_bounds = array<i64: 4, 32, 16>}, {pipeline_mode = #tpu.pipeline_mode<synchronous>, transform_indices = @transform_2, window_bounds = array<i64: 1, 16>}, {pipeline_mode = #tpu.pipeline_mode<synchronous>, transform_indices = @transform_3, window_bounds = array<i64: 72, 1>}, {transform_indices = @transform_4, window_bounds = array<i64: 1, 72, 16>}]} {
    %cst = arith.constant 0.000000e+00 : f32
    %0 = vector.broadcast %cst : f32 to vector<1x16xf32>
    %cst_0 = arith.constant 0.000000e+00 : f32
    %1 = vector.broadcast %cst_0 : f32 to vector<1x16xf32>
    %cst_1 = arith.constant 0.000000e+00 : f32
    %2 = vector.broadcast %cst_1 : f32 to vector<72x16xf32>
    %c0 = arith.constant 0 : index
    %c0_2 = arith.constant 0 : index
    %c0_3 = arith.constant 0 : index
    %3 = vector.load %arg1[%c0, %c0_2, %c0_3] : memref<1x88x32xbf16, #tpu.memory_space<vmem>>, vector<1x72x32xbf16>
    %4 = vector.shape_cast %3 : vector<1x72x32xbf16> to vector<72x32xbf16>
    %c0_4 = arith.constant 0 : index
    %c0_5 = arith.constant 0 : index
    %c0_6 = arith.constant 0 : index
    %5 = vector.load %arg2[%c0_4, %c0_5, %c0_6] : memref<4x32x16xbf16, #tpu.memory_space<vmem>>, vector<1x32x16xbf16>
    %6 = vector.shape_cast %5 : vector<1x32x16xbf16> to vector<32x16xbf16>
    %cst_7 = arith.constant dense<0.000000e+00> : vector<72x16xf32>
    %7 = tpu.matmul %4, %6, %cst_7 {dimension_numbers = #tpu.dot_dimension_numbers<[1], [0], [0], [1], [0, 0, 1, 1], [], []>} : vector<72x32xbf16>, vector<32x16xbf16>, vector<72x16xf32> -> vector<72x16xf32>
    %8 = arith.addf %2, %7 : vector<72x16xf32>
    %c0_8 = arith.constant 0 : index
    %c1 = arith.constant 1 : index
    %c0_9 = arith.constant 0 : index
    %9 = vector.load %arg1[%c0_8, %c1, %c0_9] : memref<1x88x32xbf16, #tpu.memory_space<vmem>>, vector<1x72x32xbf16>
    %10 = vector.shape_cast %9 : vector<1x72x32xbf16> to vector<72x32xbf16>
    %c1_10 = arith.constant 1 : index
    %c0_11 = arith.constant 0 : index
    %c0_12 = arith.constant 0 : index
    %11 = vector.load %arg2[%c1_10, %c0_11, %c0_12] : memref<4x32x16xbf16, #tpu.memory_space<vmem>>, vector<1x32x16xbf16>
    %12 = vector.shape_cast %11 : vector<1x32x16xbf16> to vector<32x16xbf16>
    %cst_13 = arith.constant dense<0.000000e+00> : vector<72x16xf32>
    %13 = tpu.matmul %10, %12, %cst_13 {dimension_numbers = #tpu.dot_dimension_numbers<[1], [0], [0], [1], [0, 0, 1, 1], [], []>} : vector<72x32xbf16>, vector<32x16xbf16>, vector<72x16xf32> -> vector<72x16xf32>
    %14 = arith.addf %8, %13 : vector<72x16xf32>
    %c0_14 = arith.constant 0 : index
    %c9 = arith.constant 9 : index
    %c0_15 = arith.constant 0 : index
    %15 = vector.load %arg1[%c0_14, %c9, %c0_15] : memref<1x88x32xbf16, #tpu.memory_space<vmem>>, vector<1x72x32xbf16>
    %16 = vector.shape_cast %15 : vector<1x72x32xbf16> to vector<72x32xbf16>
    %c2 = arith.constant 2 : index
    %c0_16 = arith.constant 0 : index
    %c0_17 = arith.constant 0 : index
    %17 = vector.load %arg2[%c2, %c0_16, %c0_17] : memref<4x32x16xbf16, #tpu.memory_space<vmem>>, vector<1x32x16xbf16>
    %18 = vector.shape_cast %17 : vector<1x32x16xbf16> to vector<32x16xbf16>
    %cst_18 = arith.constant dense<0.000000e+00> : vector<72x16xf32>
    %19 = tpu.matmul %16, %18, %cst_18 {dimension_numbers = #tpu.dot_dimension_numbers<[1], [0], [0], [1], [0, 0, 1, 1], [], []>} : vector<72x32xbf16>, vector<32x16xbf16>, vector<72x16xf32> -> vector<72x16xf32>
    %20 = arith.addf %14, %19 : vector<72x16xf32>
    %c0_19 = arith.constant 0 : index
    %c10 = arith.constant 10 : index
    %c0_20 = arith.constant 0 : index
    %21 = vector.load %arg1[%c0_19, %c10, %c0_20] : memref<1x88x32xbf16, #tpu.memory_space<vmem>>, vector<1x72x32xbf16>
    %22 = vector.shape_cast %21 : vector<1x72x32xbf16> to vector<72x32xbf16>
    %c3 = arith.constant 3 : index
    %c0_21 = arith.constant 0 : index
    %c0_22 = arith.constant 0 : index
    %23 = vector.load %arg2[%c3, %c0_21, %c0_22] : memref<4x32x16xbf16, #tpu.memory_space<vmem>>, vector<1x32x16xbf16>
    %24 = vector.shape_cast %23 : vector<1x32x16xbf16> to vector<32x16xbf16>
    %cst_23 = arith.constant dense<0.000000e+00> : vector<72x16xf32>
    %25 = tpu.matmul %22, %24, %cst_23 {dimension_numbers = #tpu.dot_dimension_numbers<[1], [0], [0], [1], [0, 0, 1, 1], [], []>} : vector<72x32xbf16>, vector<32x16xbf16>, vector<72x16xf32> -> vector<72x16xf32>
    %26 = arith.addf %20, %25 : vector<72x16xf32>
    %c0_24 = arith.constant 0 : index
    %c0_25 = arith.constant 0 : index
    %27 = vector.load %arg4[%c0_24, %c0_25] : memref<72x1xf32, #tpu.memory_space<vmem>>, vector<72x1xf32>
    %28 = vector.broadcast %27 : vector<72x1xf32> to vector<72x16xf32>
    %29 = arith.mulf %26, %28 : vector<72x16xf32>
    %cst_26 = arith.constant dense<0.000000e+00> : vector<16xf32>
    %30 = vector.multi_reduction <add>, %29, %cst_26 [0] : vector<72x16xf32> to vector<16xf32>
    %31 = vector.shape_cast %30 : vector<16xf32> to vector<1x16xf32>
    %32 = arith.addf %0, %31 : vector<1x16xf32>
    %33 = arith.mulf %29, %26 : vector<72x16xf32>
    %cst_27 = arith.constant dense<0.000000e+00> : vector<16xf32>
    %34 = vector.multi_reduction <add>, %33, %cst_27 [0] : vector<72x16xf32> to vector<16xf32>
    %35 = vector.shape_cast %34 : vector<16xf32> to vector<1x16xf32>
    %36 = arith.addf %1, %35 : vector<1x16xf32>
    %c0_28 = arith.constant 0 : index
    %c0_29 = arith.constant 0 : index
    %37 = vector.load %arg6[%c0_28, %c0_29] : memref<72x16xf32, #tpu.memory_space<vmem>>, vector<72x16xf32>
    tpu.vector_store %arg6[%c0_28, %c0_29], %26 {strides = array<i32>} : memref<72x16xf32, #tpu.memory_space<vmem>>, vector<72x16xf32>,
    %cst_30 = arith.constant 1.562500e-02 : f32
    %38 = vector.broadcast %cst_30 : f32 to vector<1x16xf32>
    %39 = arith.mulf %32, %38 : vector<1x16xf32>
    %cst_31 = arith.constant 1.562500e-02 : f32
    %40 = vector.broadcast %cst_31 : f32 to vector<1x16xf32>
    %41 = arith.mulf %36, %40 : vector<1x16xf32>
    %42 = arith.mulf %39, %39 : vector<1x16xf32>
    %43 = arith.subf %41, %42 : vector<1x16xf32>
    %cst_32 = arith.constant 0.000000e+00 : f32
    %44 = vector.broadcast %cst_32 : f32 to vector<1x16xf32>
    %45 = arith.maximumf %43, %44 : vector<1x16xf32>
    %cst_33 = arith.constant 9.99999974E-6 : f32
    %46 = vector.broadcast %cst_33 : f32 to vector<1x16xf32>
    %47 = arith.addf %45, %46 : vector<1x16xf32>
    %48 = math.rsqrt %47 : vector<1x16xf32>
    %c0_34 = arith.constant 0 : index
    %c0_35 = arith.constant 0 : index
    %49 = vector.load %arg6[%c0_34, %c0_35] : memref<72x16xf32, #tpu.memory_space<vmem>>, vector<72x16xf32>
    %50 = vector.broadcast %39 : vector<1x16xf32> to vector<72x16xf32>
    %51 = arith.subf %49, %50 : vector<72x16xf32>
    %52 = vector.broadcast %48 : vector<1x16xf32> to vector<72x16xf32>
    %53 = arith.mulf %51, %52 : vector<72x16xf32>
    %cst_36 = arith.constant 0.000000e+00 : f32
    %54 = vector.broadcast %cst_36 : f32 to vector<72x16xf32>
    %55 = arith.cmpf ogt, %53, %54 : vector<72x16xf32>
    %cst_37 = arith.constant 2.000000e-01 : f32
    %56 = vector.broadcast %cst_37 : f32 to vector<72x16xf32>
    %57 = arith.mulf %56, %53 : vector<72x16xf32>
    %58 = arith.select %55, %53, %57 : vector<72x16xi1>, vector<72x16xf32>
    %59 = arith.truncf %58 : vector<72x16xf32> to vector<72x16xbf16>
    %c0_38 = arith.constant 0 : index
    %c0_39 = arith.constant 0 : index
    %c0_40 = arith.constant 0 : index
    %60 = vector.load %arg5[%c0_38, %c0_39, %c0_40] : memref<1x72x16xbf16, #tpu.memory_space<vmem>>, vector<1x72x16xbf16>
    %61 = vector.shape_cast %60 : vector<1x72x16xbf16> to vector<72x16xbf16>
    %62 = vector.shape_cast %59 : vector<72x16xbf16> to vector<1x72x16xbf16>
    tpu.vector_store %arg5[%c0_38, %c0_39, %c0_40], %62 {strides = array<i32>} : memref<1x72x16xbf16, #tpu.memory_space<vmem>>, vector<1x72x16xbf16>,
    return
  }
  func.func @transform_0(%arg0: i32) -> (i32, i32, i32) {
    %c0_i32 = arith.constant 0 : i32
    %c0_i32_0 = arith.constant 0 : i32
    %c0_i32_1 = arith.constant 0 : i32
    return %arg0, %c0_i32, %c0_i32_0 : i32, i32, i32
  }
  func.func @transform_1(%arg0: i32) -> (i32, i32, i32) {
    %c0_i32 = arith.constant 0 : i32
    %c0_i32_0 = arith.constant 0 : i32
    %c0_i32_1 = arith.constant 0 : i32
    %c0_i32_2 = arith.constant 0 : i32
    return %c0_i32, %c0_i32_0, %c0_i32_1 : i32, i32, i32
  }
  func.func @transform_2(%arg0: i32) -> (i32, i32) {
    %c0_i32 = arith.constant 0 : i32
    %c0_i32_0 = arith.constant 0 : i32
    %c0_i32_1 = arith.constant 0 : i32
    return %c0_i32, %c0_i32_0 : i32, i32
  }
  func.func @transform_3(%arg0: i32) -> (i32, i32) {
    %c0_i32 = arith.constant 0 : i32
    %c0_i32_0 = arith.constant 0 : i32
    %c0_i32_1 = arith.constant 0 : i32
    return %c0_i32, %c0_i32_0 : i32, i32
  }
  func.func @transform_4(%arg0: i32) -> (i32, i32, i32) {
    %c0_i32 = arith.constant 0 : i32
    %c0_i32_0 = arith.constant 0 : i32
    %c0_i32_1 = arith.constant 0 : i32
    return %arg0, %c0_i32, %c0_i32_0 : i32, i32, i32
  }
}

module attributes {stable_mosaic.version = 11 : i64} {
  func.func @_conv_block_kernel(%arg0: i32, %arg1: memref<1x32x64xbf16, #tpu.memory_space<vmem>>, %arg2: memref<4x64x32xbf16, #tpu.memory_space<vmem>>, %arg3: memref<1x32xf32, #tpu.memory_space<vmem>>, %arg4: memref<20x1xf32, #tpu.memory_space<vmem>>, %arg5: memref<1x20x32xbf16, #tpu.memory_space<vmem>>, %arg6: memref<20x32xf32, #tpu.memory_space<vmem>>) attributes {dimension_semantics = [#tpu.dimension_semantics<parallel>], iteration_bounds = array<i64: 2>, scalar_prefetch = 0 : i64, scratch_operands = 1 : i64, tpu.core_type = #tpu.core_type<tc>, window_params = [{transform_indices = @transform_0, window_bounds = array<i64: 1, 32, 64>}, {pipeline_mode = #tpu.pipeline_mode<synchronous>, transform_indices = @transform_1, window_bounds = array<i64: 4, 64, 32>}, {pipeline_mode = #tpu.pipeline_mode<synchronous>, transform_indices = @transform_2, window_bounds = array<i64: 1, 32>}, {pipeline_mode = #tpu.pipeline_mode<synchronous>, transform_indices = @transform_3, window_bounds = array<i64: 20, 1>}, {transform_indices = @transform_4, window_bounds = array<i64: 1, 20, 32>}]} {
    %cst = arith.constant 0.000000e+00 : f32
    %0 = vector.broadcast %cst : f32 to vector<1x32xf32>
    %cst_0 = arith.constant 0.000000e+00 : f32
    %1 = vector.broadcast %cst_0 : f32 to vector<1x32xf32>
    %cst_1 = arith.constant 0.000000e+00 : f32
    %2 = vector.broadcast %cst_1 : f32 to vector<20x32xf32>
    %c0 = arith.constant 0 : index
    %c0_2 = arith.constant 0 : index
    %c0_3 = arith.constant 0 : index
    %3 = vector.load %arg1[%c0, %c0_2, %c0_3] : memref<1x32x64xbf16, #tpu.memory_space<vmem>>, vector<1x20x64xbf16>
    %4 = vector.shape_cast %3 : vector<1x20x64xbf16> to vector<20x64xbf16>
    %c0_4 = arith.constant 0 : index
    %c0_5 = arith.constant 0 : index
    %c0_6 = arith.constant 0 : index
    %5 = vector.load %arg2[%c0_4, %c0_5, %c0_6] : memref<4x64x32xbf16, #tpu.memory_space<vmem>>, vector<1x64x32xbf16>
    %6 = vector.shape_cast %5 : vector<1x64x32xbf16> to vector<64x32xbf16>
    %cst_7 = arith.constant dense<0.000000e+00> : vector<20x32xf32>
    %7 = tpu.matmul %4, %6, %cst_7 {dimension_numbers = #tpu.dot_dimension_numbers<[1], [0], [0], [1], [0, 0, 1, 1], [], []>} : vector<20x64xbf16>, vector<64x32xbf16>, vector<20x32xf32> -> vector<20x32xf32>
    %8 = arith.addf %2, %7 : vector<20x32xf32>
    %c0_8 = arith.constant 0 : index
    %c1 = arith.constant 1 : index
    %c0_9 = arith.constant 0 : index
    %9 = vector.load %arg1[%c0_8, %c1, %c0_9] : memref<1x32x64xbf16, #tpu.memory_space<vmem>>, vector<1x20x64xbf16>
    %10 = vector.shape_cast %9 : vector<1x20x64xbf16> to vector<20x64xbf16>
    %c1_10 = arith.constant 1 : index
    %c0_11 = arith.constant 0 : index
    %c0_12 = arith.constant 0 : index
    %11 = vector.load %arg2[%c1_10, %c0_11, %c0_12] : memref<4x64x32xbf16, #tpu.memory_space<vmem>>, vector<1x64x32xbf16>
    %12 = vector.shape_cast %11 : vector<1x64x32xbf16> to vector<64x32xbf16>
    %cst_13 = arith.constant dense<0.000000e+00> : vector<20x32xf32>
    %13 = tpu.matmul %10, %12, %cst_13 {dimension_numbers = #tpu.dot_dimension_numbers<[1], [0], [0], [1], [0, 0, 1, 1], [], []>} : vector<20x64xbf16>, vector<64x32xbf16>, vector<20x32xf32> -> vector<20x32xf32>
    %14 = arith.addf %8, %13 : vector<20x32xf32>
    %c0_14 = arith.constant 0 : index
    %c5 = arith.constant 5 : index
    %c0_15 = arith.constant 0 : index
    %15 = vector.load %arg1[%c0_14, %c5, %c0_15] : memref<1x32x64xbf16, #tpu.memory_space<vmem>>, vector<1x20x64xbf16>
    %16 = vector.shape_cast %15 : vector<1x20x64xbf16> to vector<20x64xbf16>
    %c2 = arith.constant 2 : index
    %c0_16 = arith.constant 0 : index
    %c0_17 = arith.constant 0 : index
    %17 = vector.load %arg2[%c2, %c0_16, %c0_17] : memref<4x64x32xbf16, #tpu.memory_space<vmem>>, vector<1x64x32xbf16>
    %18 = vector.shape_cast %17 : vector<1x64x32xbf16> to vector<64x32xbf16>
    %cst_18 = arith.constant dense<0.000000e+00> : vector<20x32xf32>
    %19 = tpu.matmul %16, %18, %cst_18 {dimension_numbers = #tpu.dot_dimension_numbers<[1], [0], [0], [1], [0, 0, 1, 1], [], []>} : vector<20x64xbf16>, vector<64x32xbf16>, vector<20x32xf32> -> vector<20x32xf32>
    %20 = arith.addf %14, %19 : vector<20x32xf32>
    %c0_19 = arith.constant 0 : index
    %c6 = arith.constant 6 : index
    %c0_20 = arith.constant 0 : index
    %21 = vector.load %arg1[%c0_19, %c6, %c0_20] : memref<1x32x64xbf16, #tpu.memory_space<vmem>>, vector<1x20x64xbf16>
    %22 = vector.shape_cast %21 : vector<1x20x64xbf16> to vector<20x64xbf16>
    %c3 = arith.constant 3 : index
    %c0_21 = arith.constant 0 : index
    %c0_22 = arith.constant 0 : index
    %23 = vector.load %arg2[%c3, %c0_21, %c0_22] : memref<4x64x32xbf16, #tpu.memory_space<vmem>>, vector<1x64x32xbf16>
    %24 = vector.shape_cast %23 : vector<1x64x32xbf16> to vector<64x32xbf16>
    %cst_23 = arith.constant dense<0.000000e+00> : vector<20x32xf32>
    %25 = tpu.matmul %22, %24, %cst_23 {dimension_numbers = #tpu.dot_dimension_numbers<[1], [0], [0], [1], [0, 0, 1, 1], [], []>} : vector<20x64xbf16>, vector<64x32xbf16>, vector<20x32xf32> -> vector<20x32xf32>
    %26 = arith.addf %20, %25 : vector<20x32xf32>
    %c0_24 = arith.constant 0 : index
    %c0_25 = arith.constant 0 : index
    %27 = vector.load %arg4[%c0_24, %c0_25] : memref<20x1xf32, #tpu.memory_space<vmem>>, vector<20x1xf32>
    %28 = vector.broadcast %27 : vector<20x1xf32> to vector<20x32xf32>
    %29 = arith.mulf %26, %28 : vector<20x32xf32>
    %cst_26 = arith.constant dense<0.000000e+00> : vector<32xf32>
    %30 = vector.multi_reduction <add>, %29, %cst_26 [0] : vector<20x32xf32> to vector<32xf32>
    %31 = vector.shape_cast %30 : vector<32xf32> to vector<1x32xf32>
    %32 = arith.addf %0, %31 : vector<1x32xf32>
    %33 = arith.mulf %29, %26 : vector<20x32xf32>
    %cst_27 = arith.constant dense<0.000000e+00> : vector<32xf32>
    %34 = vector.multi_reduction <add>, %33, %cst_27 [0] : vector<20x32xf32> to vector<32xf32>
    %35 = vector.shape_cast %34 : vector<32xf32> to vector<1x32xf32>
    %36 = arith.addf %1, %35 : vector<1x32xf32>
    %c0_28 = arith.constant 0 : index
    %c0_29 = arith.constant 0 : index
    %37 = vector.load %arg6[%c0_28, %c0_29] : memref<20x32xf32, #tpu.memory_space<vmem>>, vector<20x32xf32>
    tpu.vector_store %arg6[%c0_28, %c0_29], %26 {strides = array<i32>} : memref<20x32xf32, #tpu.memory_space<vmem>>, vector<20x32xf32>,
    %cst_30 = arith.constant 6.250000e-02 : f32
    %38 = vector.broadcast %cst_30 : f32 to vector<1x32xf32>
    %39 = arith.mulf %32, %38 : vector<1x32xf32>
    %cst_31 = arith.constant 6.250000e-02 : f32
    %40 = vector.broadcast %cst_31 : f32 to vector<1x32xf32>
    %41 = arith.mulf %36, %40 : vector<1x32xf32>
    %42 = arith.mulf %39, %39 : vector<1x32xf32>
    %43 = arith.subf %41, %42 : vector<1x32xf32>
    %cst_32 = arith.constant 0.000000e+00 : f32
    %44 = vector.broadcast %cst_32 : f32 to vector<1x32xf32>
    %45 = arith.maximumf %43, %44 : vector<1x32xf32>
    %cst_33 = arith.constant 9.99999974E-6 : f32
    %46 = vector.broadcast %cst_33 : f32 to vector<1x32xf32>
    %47 = arith.addf %45, %46 : vector<1x32xf32>
    %48 = math.rsqrt %47 : vector<1x32xf32>
    %c0_34 = arith.constant 0 : index
    %c0_35 = arith.constant 0 : index
    %49 = vector.load %arg6[%c0_34, %c0_35] : memref<20x32xf32, #tpu.memory_space<vmem>>, vector<20x32xf32>
    %50 = vector.broadcast %39 : vector<1x32xf32> to vector<20x32xf32>
    %51 = arith.subf %49, %50 : vector<20x32xf32>
    %52 = vector.broadcast %48 : vector<1x32xf32> to vector<20x32xf32>
    %53 = arith.mulf %51, %52 : vector<20x32xf32>
    %cst_36 = arith.constant 0.000000e+00 : f32
    %54 = vector.broadcast %cst_36 : f32 to vector<20x32xf32>
    %55 = arith.cmpf ogt, %53, %54 : vector<20x32xf32>
    %cst_37 = arith.constant 2.000000e-01 : f32
    %56 = vector.broadcast %cst_37 : f32 to vector<20x32xf32>
    %57 = arith.mulf %56, %53 : vector<20x32xf32>
    %58 = arith.select %55, %53, %57 : vector<20x32xi1>, vector<20x32xf32>
    %59 = arith.truncf %58 : vector<20x32xf32> to vector<20x32xbf16>
    %c0_38 = arith.constant 0 : index
    %c0_39 = arith.constant 0 : index
    %c0_40 = arith.constant 0 : index
    %60 = vector.load %arg5[%c0_38, %c0_39, %c0_40] : memref<1x20x32xbf16, #tpu.memory_space<vmem>>, vector<1x20x32xbf16>
    %61 = vector.shape_cast %60 : vector<1x20x32xbf16> to vector<20x32xbf16>
    %62 = vector.shape_cast %59 : vector<20x32xbf16> to vector<1x20x32xbf16>
    tpu.vector_store %arg5[%c0_38, %c0_39, %c0_40], %62 {strides = array<i32>} : memref<1x20x32xbf16, #tpu.memory_space<vmem>>, vector<1x20x32xbf16>,
    return
  }
  func.func @transform_0(%arg0: i32) -> (i32, i32, i32) {
    %c0_i32 = arith.constant 0 : i32
    %c0_i32_0 = arith.constant 0 : i32
    %c0_i32_1 = arith.constant 0 : i32
    return %arg0, %c0_i32, %c0_i32_0 : i32, i32, i32
  }
  func.func @transform_1(%arg0: i32) -> (i32, i32, i32) {
    %c0_i32 = arith.constant 0 : i32
    %c0_i32_0 = arith.constant 0 : i32
    %c0_i32_1 = arith.constant 0 : i32
    %c0_i32_2 = arith.constant 0 : i32
    return %c0_i32, %c0_i32_0, %c0_i32_1 : i32, i32, i32
  }
  func.func @transform_2(%arg0: i32) -> (i32, i32) {
    %c0_i32 = arith.constant 0 : i32
    %c0_i32_0 = arith.constant 0 : i32
    %c0_i32_1 = arith.constant 0 : i32
    return %c0_i32, %c0_i32_0 : i32, i32
  }
  func.func @transform_3(%arg0: i32) -> (i32, i32) {
    %c0_i32 = arith.constant 0 : i32
    %c0_i32_0 = arith.constant 0 : i32
    %c0_i32_1 = arith.constant 0 : i32
    return %c0_i32, %c0_i32_0 : i32, i32
  }
  func.func @transform_4(%arg0: i32) -> (i32, i32, i32) {
    %c0_i32 = arith.constant 0 : i32
    %c0_i32_0 = arith.constant 0 : i32
    %c0_i32_1 = arith.constant 0 : i32
    return %arg0, %c0_i32, %c0_i32_0 : i32, i32, i32
  }
}

module attributes {stable_mosaic.version = 11 : i64} {
  func.func @_conv_block_kernel(%arg0: i32, %arg1: memref<1x40x32xbf16, #tpu.memory_space<vmem>>, %arg2: memref<16x32x64xbf16, #tpu.memory_space<vmem>>, %arg3: memref<1x64xf32, #tpu.memory_space<vmem>>, %arg4: memref<18x1xf32, #tpu.memory_space<vmem>>, %arg5: memref<1x18x64xbf16, #tpu.memory_space<vmem>>, %arg6: memref<18x64xf32, #tpu.memory_space<vmem>>) attributes {dimension_semantics = [#tpu.dimension_semantics<parallel>], iteration_bounds = array<i64: 2>, scalar_prefetch = 0 : i64, scratch_operands = 1 : i64, tpu.core_type = #tpu.core_type<tc>, window_params = [{transform_indices = @transform_0, window_bounds = array<i64: 1, 40, 32>}, {pipeline_mode = #tpu.pipeline_mode<synchronous>, transform_indices = @transform_1, window_bounds = array<i64: 16, 32, 64>}, {pipeline_mode = #tpu.pipeline_mode<synchronous>, transform_indices = @transform_2, window_bounds = array<i64: 1, 64>}, {pipeline_mode = #tpu.pipeline_mode<synchronous>, transform_indices = @transform_3, window_bounds = array<i64: 18, 1>}, {transform_indices = @transform_4, window_bounds = array<i64: 1, 18, 64>}]} {
    %cst = arith.constant 0.000000e+00 : f32
    %0 = vector.broadcast %cst : f32 to vector<1x64xf32>
    %cst_0 = arith.constant 0.000000e+00 : f32
    %1 = vector.broadcast %cst_0 : f32 to vector<1x64xf32>
    %cst_1 = arith.constant 0.000000e+00 : f32
    %2 = vector.broadcast %cst_1 : f32 to vector<18x64xf32>
    %c0 = arith.constant 0 : index
    %c0_2 = arith.constant 0 : index
    %c0_3 = arith.constant 0 : index
    %3 = vector.load %arg1[%c0, %c0_2, %c0_3] : memref<1x40x32xbf16, #tpu.memory_space<vmem>>, vector<1x18x32xbf16>
    %4 = vector.shape_cast %3 : vector<1x18x32xbf16> to vector<18x32xbf16>
    %c0_4 = arith.constant 0 : index
    %c0_5 = arith.constant 0 : index
    %c0_6 = arith.constant 0 : index
    %5 = vector.load %arg2[%c0_4, %c0_5, %c0_6] : memref<16x32x64xbf16, #tpu.memory_space<vmem>>, vector<1x32x64xbf16>
    %6 = vector.shape_cast %5 : vector<1x32x64xbf16> to vector<32x64xbf16>
    %cst_7 = arith.constant dense<0.000000e+00> : vector<18x64xf32>
    %7 = tpu.matmul %4, %6, %cst_7 {dimension_numbers = #tpu.dot_dimension_numbers<[1], [0], [0], [1], [0, 0, 1, 1], [], []>} : vector<18x32xbf16>, vector<32x64xbf16>, vector<18x64xf32> -> vector<18x64xf32>
    %8 = arith.addf %2, %7 : vector<18x64xf32>
    %c0_8 = arith.constant 0 : index
    %c1 = arith.constant 1 : index
    %c0_9 = arith.constant 0 : index
    %9 = vector.load %arg1[%c0_8, %c1, %c0_9] : memref<1x40x32xbf16, #tpu.memory_space<vmem>>, vector<1x18x32xbf16>
    %10 = vector.shape_cast %9 : vector<1x18x32xbf16> to vector<18x32xbf16>
    %c1_10 = arith.constant 1 : index
    %c0_11 = arith.constant 0 : index
    %c0_12 = arith.constant 0 : index
    %11 = vector.load %arg2[%c1_10, %c0_11, %c0_12] : memref<16x32x64xbf16, #tpu.memory_space<vmem>>, vector<1x32x64xbf16>
    %12 = vector.shape_cast %11 : vector<1x32x64xbf16> to vector<32x64xbf16>
    %cst_13 = arith.constant dense<0.000000e+00> : vector<18x64xf32>
    %13 = tpu.matmul %10, %12, %cst_13 {dimension_numbers = #tpu.dot_dimension_numbers<[1], [0], [0], [1], [0, 0, 1, 1], [], []>} : vector<18x32xbf16>, vector<32x64xbf16>, vector<18x64xf32> -> vector<18x64xf32>
    %14 = arith.addf %8, %13 : vector<18x64xf32>
    %c0_14 = arith.constant 0 : index
    %c2 = arith.constant 2 : index
    %c0_15 = arith.constant 0 : index
    %15 = vector.load %arg1[%c0_14, %c2, %c0_15] : memref<1x40x32xbf16, #tpu.memory_space<vmem>>, vector<1x18x32xbf16>
    %16 = vector.shape_cast %15 : vector<1x18x32xbf16> to vector<18x32xbf16>
    %c2_16 = arith.constant 2 : index
    %c0_17 = arith.constant 0 : index
    %c0_18 = arith.constant 0 : index
    %17 = vector.load %arg2[%c2_16, %c0_17, %c0_18] : memref<16x32x64xbf16, #tpu.memory_space<vmem>>, vector<1x32x64xbf16>
    %18 = vector.shape_cast %17 : vector<1x32x64xbf16> to vector<32x64xbf16>
    %cst_19 = arith.constant dense<0.000000e+00> : vector<18x64xf32>
    %19 = tpu.matmul %16, %18, %cst_19 {dimension_numbers = #tpu.dot_dimension_numbers<[1], [0], [0], [1], [0, 0, 1, 1], [], []>} : vector<18x32xbf16>, vector<32x64xbf16>, vector<18x64xf32> -> vector<18x64xf32>
    %20 = arith.addf %14, %19 : vector<18x64xf32>
    %c0_20 = arith.constant 0 : index
    %c3 = arith.constant 3 : index
    %c0_21 = arith.constant 0 : index
    %21 = vector.load %arg1[%c0_20, %c3, %c0_21] : memref<1x40x32xbf16, #tpu.memory_space<vmem>>, vector<1x18x32xbf16>
    %22 = vector.shape_cast %21 : vector<1x18x32xbf16> to vector<18x32xbf16>
    %c3_22 = arith.constant 3 : index
    %c0_23 = arith.constant 0 : index
    %c0_24 = arith.constant 0 : index
    %23 = vector.load %arg2[%c3_22, %c0_23, %c0_24] : memref<16x32x64xbf16, #tpu.memory_space<vmem>>, vector<1x32x64xbf16>
    %24 = vector.shape_cast %23 : vector<1x32x64xbf16> to vector<32x64xbf16>
    %cst_25 = arith.constant dense<0.000000e+00> : vector<18x64xf32>
    %25 = tpu.matmul %22, %24, %cst_25 {dimension_numbers = #tpu.dot_dimension_numbers<[1], [0], [0], [1], [0, 0, 1, 1], [], []>} : vector<18x32xbf16>, vector<32x64xbf16>, vector<18x64xf32> -> vector<18x64xf32>
    %26 = arith.addf %20, %25 : vector<18x64xf32>
    %c0_26 = arith.constant 0 : index
    %c6 = arith.constant 6 : index
    %c0_27 = arith.constant 0 : index
    %27 = vector.load %arg1[%c0_26, %c6, %c0_27] : memref<1x40x32xbf16, #tpu.memory_space<vmem>>, vector<1x18x32xbf16>
    %28 = vector.shape_cast %27 : vector<1x18x32xbf16> to vector<18x32xbf16>
    %c4 = arith.constant 4 : index
    %c0_28 = arith.constant 0 : index
    %c0_29 = arith.constant 0 : index
    %29 = vector.load %arg2[%c4, %c0_28, %c0_29] : memref<16x32x64xbf16, #tpu.memory_space<vmem>>, vector<1x32x64xbf16>
    %30 = vector.shape_cast %29 : vector<1x32x64xbf16> to vector<32x64xbf16>
    %cst_30 = arith.constant dense<0.000000e+00> : vector<18x64xf32>
    %31 = tpu.matmul %28, %30, %cst_30 {dimension_numbers = #tpu.dot_dimension_numbers<[1], [0], [0], [1], [0, 0, 1, 1], [], []>} : vector<18x32xbf16>, vector<32x64xbf16>, vector<18x64xf32> -> vector<18x64xf32>
    %32 = arith.addf %26, %31 : vector<18x64xf32>
    %c0_31 = arith.constant 0 : index
    %c7 = arith.constant 7 : index
    %c0_32 = arith.constant 0 : index
    %33 = vector.load %arg1[%c0_31, %c7, %c0_32] : memref<1x40x32xbf16, #tpu.memory_space<vmem>>, vector<1x18x32xbf16>
    %34 = vector.shape_cast %33 : vector<1x18x32xbf16> to vector<18x32xbf16>
    %c5 = arith.constant 5 : index
    %c0_33 = arith.constant 0 : index
    %c0_34 = arith.constant 0 : index
    %35 = vector.load %arg2[%c5, %c0_33, %c0_34] : memref<16x32x64xbf16, #tpu.memory_space<vmem>>, vector<1x32x64xbf16>
    %36 = vector.shape_cast %35 : vector<1x32x64xbf16> to vector<32x64xbf16>
    %cst_35 = arith.constant dense<0.000000e+00> : vector<18x64xf32>
    %37 = tpu.matmul %34, %36, %cst_35 {dimension_numbers = #tpu.dot_dimension_numbers<[1], [0], [0], [1], [0, 0, 1, 1], [], []>} : vector<18x32xbf16>, vector<32x64xbf16>, vector<18x64xf32> -> vector<18x64xf32>
    %38 = arith.addf %32, %37 : vector<18x64xf32>
    %c0_36 = arith.constant 0 : index
    %c8 = arith.constant 8 : index
    %c0_37 = arith.constant 0 : index
    %39 = vector.load %arg1[%c0_36, %c8, %c0_37] : memref<1x40x32xbf16, #tpu.memory_space<vmem>>, vector<1x18x32xbf16>
    %40 = vector.shape_cast %39 : vector<1x18x32xbf16> to vector<18x32xbf16>
    %c6_38 = arith.constant 6 : index
    %c0_39 = arith.constant 0 : index
    %c0_40 = arith.constant 0 : index
    %41 = vector.load %arg2[%c6_38, %c0_39, %c0_40] : memref<16x32x64xbf16, #tpu.memory_space<vmem>>, vector<1x32x64xbf16>
    %42 = vector.shape_cast %41 : vector<1x32x64xbf16> to vector<32x64xbf16>
    %cst_41 = arith.constant dense<0.000000e+00> : vector<18x64xf32>
    %43 = tpu.matmul %40, %42, %cst_41 {dimension_numbers = #tpu.dot_dimension_numbers<[1], [0], [0], [1], [0, 0, 1, 1], [], []>} : vector<18x32xbf16>, vector<32x64xbf16>, vector<18x64xf32> -> vector<18x64xf32>
    %44 = arith.addf %38, %43 : vector<18x64xf32>
    %c0_42 = arith.constant 0 : index
    %c9 = arith.constant 9 : index
    %c0_43 = arith.constant 0 : index
    %45 = vector.load %arg1[%c0_42, %c9, %c0_43] : memref<1x40x32xbf16, #tpu.memory_space<vmem>>, vector<1x18x32xbf16>
    %46 = vector.shape_cast %45 : vector<1x18x32xbf16> to vector<18x32xbf16>
    %c7_44 = arith.constant 7 : index
    %c0_45 = arith.constant 0 : index
    %c0_46 = arith.constant 0 : index
    %47 = vector.load %arg2[%c7_44, %c0_45, %c0_46] : memref<16x32x64xbf16, #tpu.memory_space<vmem>>, vector<1x32x64xbf16>
    %48 = vector.shape_cast %47 : vector<1x32x64xbf16> to vector<32x64xbf16>
    %cst_47 = arith.constant dense<0.000000e+00> : vector<18x64xf32>
    %49 = tpu.matmul %46, %48, %cst_47 {dimension_numbers = #tpu.dot_dimension_numbers<[1], [0], [0], [1], [0, 0, 1, 1], [], []>} : vector<18x32xbf16>, vector<32x64xbf16>, vector<18x64xf32> -> vector<18x64xf32>
    %50 = arith.addf %44, %49 : vector<18x64xf32>
    %c0_48 = arith.constant 0 : index
    %c12 = arith.constant 12 : index
    %c0_49 = arith.constant 0 : index
    %51 = vector.load %arg1[%c0_48, %c12, %c0_49] : memref<1x40x32xbf16, #tpu.memory_space<vmem>>, vector<1x18x32xbf16>
    %52 = vector.shape_cast %51 : vector<1x18x32xbf16> to vector<18x32xbf16>
    %c8_50 = arith.constant 8 : index
    %c0_51 = arith.constant 0 : index
    %c0_52 = arith.constant 0 : index
    %53 = vector.load %arg2[%c8_50, %c0_51, %c0_52] : memref<16x32x64xbf16, #tpu.memory_space<vmem>>, vector<1x32x64xbf16>
    %54 = vector.shape_cast %53 : vector<1x32x64xbf16> to vector<32x64xbf16>
    %cst_53 = arith.constant dense<0.000000e+00> : vector<18x64xf32>
    %55 = tpu.matmul %52, %54, %cst_53 {dimension_numbers = #tpu.dot_dimension_numbers<[1], [0], [0], [1], [0, 0, 1, 1], [], []>} : vector<18x32xbf16>, vector<32x64xbf16>, vector<18x64xf32> -> vector<18x64xf32>
    %56 = arith.addf %50, %55 : vector<18x64xf32>
    %c0_54 = arith.constant 0 : index
    %c13 = arith.constant 13 : index
    %c0_55 = arith.constant 0 : index
    %57 = vector.load %arg1[%c0_54, %c13, %c0_55] : memref<1x40x32xbf16, #tpu.memory_space<vmem>>, vector<1x18x32xbf16>
    %58 = vector.shape_cast %57 : vector<1x18x32xbf16> to vector<18x32xbf16>
    %c9_56 = arith.constant 9 : index
    %c0_57 = arith.constant 0 : index
    %c0_58 = arith.constant 0 : index
    %59 = vector.load %arg2[%c9_56, %c0_57, %c0_58] : memref<16x32x64xbf16, #tpu.memory_space<vmem>>, vector<1x32x64xbf16>
    %60 = vector.shape_cast %59 : vector<1x32x64xbf16> to vector<32x64xbf16>
    %cst_59 = arith.constant dense<0.000000e+00> : vector<18x64xf32>
    %61 = tpu.matmul %58, %60, %cst_59 {dimension_numbers = #tpu.dot_dimension_numbers<[1], [0], [0], [1], [0, 0, 1, 1], [], []>} : vector<18x32xbf16>, vector<32x64xbf16>, vector<18x64xf32> -> vector<18x64xf32>
    %62 = arith.addf %56, %61 : vector<18x64xf32>
    %c0_60 = arith.constant 0 : index
    %c14 = arith.constant 14 : index
    %c0_61 = arith.constant 0 : index
    %63 = vector.load %arg1[%c0_60, %c14, %c0_61] : memref<1x40x32xbf16, #tpu.memory_space<vmem>>, vector<1x18x32xbf16>
    %64 = vector.shape_cast %63 : vector<1x18x32xbf16> to vector<18x32xbf16>
    %c10 = arith.constant 10 : index
    %c0_62 = arith.constant 0 : index
    %c0_63 = arith.constant 0 : index
    %65 = vector.load %arg2[%c10, %c0_62, %c0_63] : memref<16x32x64xbf16, #tpu.memory_space<vmem>>, vector<1x32x64xbf16>
    %66 = vector.shape_cast %65 : vector<1x32x64xbf16> to vector<32x64xbf16>
    %cst_64 = arith.constant dense<0.000000e+00> : vector<18x64xf32>
    %67 = tpu.matmul %64, %66, %cst_64 {dimension_numbers = #tpu.dot_dimension_numbers<[1], [0], [0], [1], [0, 0, 1, 1], [], []>} : vector<18x32xbf16>, vector<32x64xbf16>, vector<18x64xf32> -> vector<18x64xf32>
    %68 = arith.addf %62, %67 : vector<18x64xf32>
    %c0_65 = arith.constant 0 : index
    %c15 = arith.constant 15 : index
    %c0_66 = arith.constant 0 : index
    %69 = vector.load %arg1[%c0_65, %c15, %c0_66] : memref<1x40x32xbf16, #tpu.memory_space<vmem>>, vector<1x18x32xbf16>
    %70 = vector.shape_cast %69 : vector<1x18x32xbf16> to vector<18x32xbf16>
    %c11 = arith.constant 11 : index
    %c0_67 = arith.constant 0 : index
    %c0_68 = arith.constant 0 : index
    %71 = vector.load %arg2[%c11, %c0_67, %c0_68] : memref<16x32x64xbf16, #tpu.memory_space<vmem>>, vector<1x32x64xbf16>
    %72 = vector.shape_cast %71 : vector<1x32x64xbf16> to vector<32x64xbf16>
    %cst_69 = arith.constant dense<0.000000e+00> : vector<18x64xf32>
    %73 = tpu.matmul %70, %72, %cst_69 {dimension_numbers = #tpu.dot_dimension_numbers<[1], [0], [0], [1], [0, 0, 1, 1], [], []>} : vector<18x32xbf16>, vector<32x64xbf16>, vector<18x64xf32> -> vector<18x64xf32>
    %74 = arith.addf %68, %73 : vector<18x64xf32>
    %c0_70 = arith.constant 0 : index
    %c18 = arith.constant 18 : index
    %c0_71 = arith.constant 0 : index
    %75 = vector.load %arg1[%c0_70, %c18, %c0_71] : memref<1x40x32xbf16, #tpu.memory_space<vmem>>, vector<1x18x32xbf16>
    %76 = vector.shape_cast %75 : vector<1x18x32xbf16> to vector<18x32xbf16>
    %c12_72 = arith.constant 12 : index
    %c0_73 = arith.constant 0 : index
    %c0_74 = arith.constant 0 : index
    %77 = vector.load %arg2[%c12_72, %c0_73, %c0_74] : memref<16x32x64xbf16, #tpu.memory_space<vmem>>, vector<1x32x64xbf16>
    %78 = vector.shape_cast %77 : vector<1x32x64xbf16> to vector<32x64xbf16>
    %cst_75 = arith.constant dense<0.000000e+00> : vector<18x64xf32>
    %79 = tpu.matmul %76, %78, %cst_75 {dimension_numbers = #tpu.dot_dimension_numbers<[1], [0], [0], [1], [0, 0, 1, 1], [], []>} : vector<18x32xbf16>, vector<32x64xbf16>, vector<18x64xf32> -> vector<18x64xf32>
    %80 = arith.addf %74, %79 : vector<18x64xf32>
    %c0_76 = arith.constant 0 : index
    %c19 = arith.constant 19 : index
    %c0_77 = arith.constant 0 : index
    %81 = vector.load %arg1[%c0_76, %c19, %c0_77] : memref<1x40x32xbf16, #tpu.memory_space<vmem>>, vector<1x18x32xbf16>
    %82 = vector.shape_cast %81 : vector<1x18x32xbf16> to vector<18x32xbf16>
    %c13_78 = arith.constant 13 : index
    %c0_79 = arith.constant 0 : index
    %c0_80 = arith.constant 0 : index
    %83 = vector.load %arg2[%c13_78, %c0_79, %c0_80] : memref<16x32x64xbf16, #tpu.memory_space<vmem>>, vector<1x32x64xbf16>
    %84 = vector.shape_cast %83 : vector<1x32x64xbf16> to vector<32x64xbf16>
    %cst_81 = arith.constant dense<0.000000e+00> : vector<18x64xf32>
    %85 = tpu.matmul %82, %84, %cst_81 {dimension_numbers = #tpu.dot_dimension_numbers<[1], [0], [0], [1], [0, 0, 1, 1], [], []>} : vector<18x32xbf16>, vector<32x64xbf16>, vector<18x64xf32> -> vector<18x64xf32>
    %86 = arith.addf %80, %85 : vector<18x64xf32>
    %c0_82 = arith.constant 0 : index
    %c20 = arith.constant 20 : index
    %c0_83 = arith.constant 0 : index
    %87 = vector.load %arg1[%c0_82, %c20, %c0_83] : memref<1x40x32xbf16, #tpu.memory_space<vmem>>, vector<1x18x32xbf16>
    %88 = vector.shape_cast %87 : vector<1x18x32xbf16> to vector<18x32xbf16>
    %c14_84 = arith.constant 14 : index
    %c0_85 = arith.constant 0 : index
    %c0_86 = arith.constant 0 : index
    %89 = vector.load %arg2[%c14_84, %c0_85, %c0_86] : memref<16x32x64xbf16, #tpu.memory_space<vmem>>, vector<1x32x64xbf16>
    %90 = vector.shape_cast %89 : vector<1x32x64xbf16> to vector<32x64xbf16>
    %cst_87 = arith.constant dense<0.000000e+00> : vector<18x64xf32>
    %91 = tpu.matmul %88, %90, %cst_87 {dimension_numbers = #tpu.dot_dimension_numbers<[1], [0], [0], [1], [0, 0, 1, 1], [], []>} : vector<18x32xbf16>, vector<32x64xbf16>, vector<18x64xf32> -> vector<18x64xf32>
    %92 = arith.addf %86, %91 : vector<18x64xf32>
    %c0_88 = arith.constant 0 : index
    %c21 = arith.constant 21 : index
    %c0_89 = arith.constant 0 : index
    %93 = vector.load %arg1[%c0_88, %c21, %c0_89] : memref<1x40x32xbf16, #tpu.memory_space<vmem>>, vector<1x18x32xbf16>
    %94 = vector.shape_cast %93 : vector<1x18x32xbf16> to vector<18x32xbf16>
    %c15_90 = arith.constant 15 : index
    %c0_91 = arith.constant 0 : index
    %c0_92 = arith.constant 0 : index
    %95 = vector.load %arg2[%c15_90, %c0_91, %c0_92] : memref<16x32x64xbf16, #tpu.memory_space<vmem>>, vector<1x32x64xbf16>
    %96 = vector.shape_cast %95 : vector<1x32x64xbf16> to vector<32x64xbf16>
    %cst_93 = arith.constant dense<0.000000e+00> : vector<18x64xf32>
    %97 = tpu.matmul %94, %96, %cst_93 {dimension_numbers = #tpu.dot_dimension_numbers<[1], [0], [0], [1], [0, 0, 1, 1], [], []>} : vector<18x32xbf16>, vector<32x64xbf16>, vector<18x64xf32> -> vector<18x64xf32>
    %98 = arith.addf %92, %97 : vector<18x64xf32>
    %c0_94 = arith.constant 0 : index
    %c0_95 = arith.constant 0 : index
    %99 = vector.load %arg4[%c0_94, %c0_95] : memref<18x1xf32, #tpu.memory_space<vmem>>, vector<18x1xf32>
    %100 = vector.broadcast %99 : vector<18x1xf32> to vector<18x64xf32>
    %101 = arith.mulf %98, %100 : vector<18x64xf32>
    %cst_96 = arith.constant dense<0.000000e+00> : vector<64xf32>
    %102 = vector.multi_reduction <add>, %101, %cst_96 [0] : vector<18x64xf32> to vector<64xf32>
    %103 = vector.shape_cast %102 : vector<64xf32> to vector<1x64xf32>
    %104 = arith.addf %0, %103 : vector<1x64xf32>
    %105 = arith.mulf %101, %98 : vector<18x64xf32>
    %cst_97 = arith.constant dense<0.000000e+00> : vector<64xf32>
    %106 = vector.multi_reduction <add>, %105, %cst_97 [0] : vector<18x64xf32> to vector<64xf32>
    %107 = vector.shape_cast %106 : vector<64xf32> to vector<1x64xf32>
    %108 = arith.addf %1, %107 : vector<1x64xf32>
    %c0_98 = arith.constant 0 : index
    %c0_99 = arith.constant 0 : index
    %109 = vector.load %arg6[%c0_98, %c0_99] : memref<18x64xf32, #tpu.memory_space<vmem>>, vector<18x64xf32>
    tpu.vector_store %arg6[%c0_98, %c0_99], %98 {strides = array<i32>} : memref<18x64xf32, #tpu.memory_space<vmem>>, vector<18x64xf32>,
    %cst_100 = arith.constant 0.111111112 : f32
    %110 = vector.broadcast %cst_100 : f32 to vector<1x64xf32>
    %111 = arith.mulf %104, %110 : vector<1x64xf32>
    %cst_101 = arith.constant 0.111111112 : f32
    %112 = vector.broadcast %cst_101 : f32 to vector<1x64xf32>
    %113 = arith.mulf %108, %112 : vector<1x64xf32>
    %114 = arith.mulf %111, %111 : vector<1x64xf32>
    %115 = arith.subf %113, %114 : vector<1x64xf32>
    %cst_102 = arith.constant 0.000000e+00 : f32
    %116 = vector.broadcast %cst_102 : f32 to vector<1x64xf32>
    %117 = arith.maximumf %115, %116 : vector<1x64xf32>
    %cst_103 = arith.constant 9.99999974E-6 : f32
    %118 = vector.broadcast %cst_103 : f32 to vector<1x64xf32>
    %119 = arith.addf %117, %118 : vector<1x64xf32>
    %120 = math.rsqrt %119 : vector<1x64xf32>
    %c0_104 = arith.constant 0 : index
    %c0_105 = arith.constant 0 : index
    %121 = vector.load %arg6[%c0_104, %c0_105] : memref<18x64xf32, #tpu.memory_space<vmem>>, vector<18x64xf32>
    %122 = vector.broadcast %111 : vector<1x64xf32> to vector<18x64xf32>
    %123 = arith.subf %121, %122 : vector<18x64xf32>
    %124 = vector.broadcast %120 : vector<1x64xf32> to vector<18x64xf32>
    %125 = arith.mulf %123, %124 : vector<18x64xf32>
    %cst_106 = arith.constant 0.000000e+00 : f32
    %126 = vector.broadcast %cst_106 : f32 to vector<18x64xf32>
    %127 = arith.cmpf ogt, %125, %126 : vector<18x64xf32>
    %cst_107 = arith.constant 2.000000e-01 : f32
    %128 = vector.broadcast %cst_107 : f32 to vector<18x64xf32>
    %129 = arith.mulf %128, %125 : vector<18x64xf32>
    %130 = arith.select %127, %125, %129 : vector<18x64xi1>, vector<18x64xf32>
    %131 = arith.truncf %130 : vector<18x64xf32> to vector<18x64xbf16>
    %c0_108 = arith.constant 0 : index
    %c0_109 = arith.constant 0 : index
    %c0_110 = arith.constant 0 : index
    %132 = vector.load %arg5[%c0_108, %c0_109, %c0_110] : memref<1x18x64xbf16, #tpu.memory_space<vmem>>, vector<1x18x64xbf16>
    %133 = vector.shape_cast %132 : vector<1x18x64xbf16> to vector<18x64xbf16>
    %134 = vector.shape_cast %131 : vector<18x64xbf16> to vector<1x18x64xbf16>
    tpu.vector_store %arg5[%c0_108, %c0_109, %c0_110], %134 {strides = array<i32>} : memref<1x18x64xbf16, #tpu.memory_space<vmem>>, vector<1x18x64xbf16>,
    return
  }
  func.func @transform_0(%arg0: i32) -> (i32, i32, i32) {
    %c0_i32 = arith.constant 0 : i32
    %c0_i32_0 = arith.constant 0 : i32
    %c0_i32_1 = arith.constant 0 : i32
    return %arg0, %c0_i32, %c0_i32_0 : i32, i32, i32
  }
  func.func @transform_1(%arg0: i32) -> (i32, i32, i32) {
    %c0_i32 = arith.constant 0 : i32
    %c0_i32_0 = arith.constant 0 : i32
    %c0_i32_1 = arith.constant 0 : i32
    %c0_i32_2 = arith.constant 0 : i32
    return %c0_i32, %c0_i32_0, %c0_i32_1 : i32, i32, i32
  }
  func.func @transform_2(%arg0: i32) -> (i32, i32) {
    %c0_i32 = arith.constant 0 : i32
    %c0_i32_0 = arith.constant 0 : i32
    %c0_i32_1 = arith.constant 0 : i32
    return %c0_i32, %c0_i32_0 : i32, i32
  }
  func.func @transform_3(%arg0: i32) -> (i32, i32) {
    %c0_i32 = arith.constant 0 : i32
    %c0_i32_0 = arith.constant 0 : i32
    %c0_i32_1 = arith.constant 0 : i32
    return %c0_i32, %c0_i32_0 : i32, i32
  }
  func.func @transform_4(%arg0: i32) -> (i32, i32, i32) {
    %c0_i32 = arith.constant 0 : i32
    %c0_i32_0 = arith.constant 0 : i32
    %c0_i32_1 = arith.constant 0 : i32
    return %arg0, %c0_i32, %c0_i32_0 : i32, i32, i32
  }
}

module attributes {stable_mosaic.version = 11 : i64} {
  func.func @_conv_block_kernel(%arg0: i32, %arg1: memref<1x32x64xbf16, #tpu.memory_space<vmem>>, %arg2: memref<16x64x1xbf16, #tpu.memory_space<vmem>>, %arg3: memref<1x1xf32, #tpu.memory_space<vmem>>, %arg4: memref<10x1xf32, #tpu.memory_space<vmem>>, %arg5: memref<1x10x1xf32, #tpu.memory_space<vmem>>) attributes {dimension_semantics = [#tpu.dimension_semantics<parallel>], iteration_bounds = array<i64: 2>, scalar_prefetch = 0 : i64, scratch_operands = 0 : i64, tpu.core_type = #tpu.core_type<tc>, window_params = [{transform_indices = @transform_0, window_bounds = array<i64: 1, 32, 64>}, {pipeline_mode = #tpu.pipeline_mode<synchronous>, transform_indices = @transform_1, window_bounds = array<i64: 16, 64, 1>}, {pipeline_mode = #tpu.pipeline_mode<synchronous>, transform_indices = @transform_2, window_bounds = array<i64: 1, 1>}, {pipeline_mode = #tpu.pipeline_mode<synchronous>, transform_indices = @transform_3, window_bounds = array<i64: 10, 1>}, {transform_indices = @transform_4, window_bounds = array<i64: 1, 10, 1>}]} {
    %c0 = arith.constant 0 : index
    %c0_0 = arith.constant 0 : index
    %0 = vector.load %arg3[%c0, %c0_0] : memref<1x1xf32, #tpu.memory_space<vmem>>, vector<1x1xf32>
    %cst = arith.constant 0.000000e+00 : f32
    %1 = vector.broadcast %cst : f32 to vector<10x1xf32>
    %c0_1 = arith.constant 0 : index
    %c0_2 = arith.constant 0 : index
    %c0_3 = arith.constant 0 : index
    %2 = vector.load %arg1[%c0_1, %c0_2, %c0_3] : memref<1x32x64xbf16, #tpu.memory_space<vmem>>, vector<1x10x64xbf16>
    %3 = vector.shape_cast %2 : vector<1x10x64xbf16> to vector<10x64xbf16>
    %c0_4 = arith.constant 0 : index
    %c0_5 = arith.constant 0 : index
    %c0_6 = arith.constant 0 : index
    %4 = vector.load %arg2[%c0_4, %c0_5, %c0_6] : memref<16x64x1xbf16, #tpu.memory_space<vmem>>, vector<1x64x1xbf16>
    %5 = vector.shape_cast %4 : vector<1x64x1xbf16> to vector<64x1xbf16>
    %cst_7 = arith.constant dense<0.000000e+00> : vector<10x1xf32>
    %6 = tpu.matmul %3, %5, %cst_7 {dimension_numbers = #tpu.dot_dimension_numbers<[1], [0], [0], [1], [0, 0, 1, 1], [], []>} : vector<10x64xbf16>, vector<64x1xbf16>, vector<10x1xf32> -> vector<10x1xf32>
    %7 = arith.addf %1, %6 : vector<10x1xf32>
    %c0_8 = arith.constant 0 : index
    %c1 = arith.constant 1 : index
    %c0_9 = arith.constant 0 : index
    %8 = vector.load %arg1[%c0_8, %c1, %c0_9] : memref<1x32x64xbf16, #tpu.memory_space<vmem>>, vector<1x10x64xbf16>
    %9 = vector.shape_cast %8 : vector<1x10x64xbf16> to vector<10x64xbf16>
    %c1_10 = arith.constant 1 : index
    %c0_11 = arith.constant 0 : index
    %c0_12 = arith.constant 0 : index
    %10 = vector.load %arg2[%c1_10, %c0_11, %c0_12] : memref<16x64x1xbf16, #tpu.memory_space<vmem>>, vector<1x64x1xbf16>
    %11 = vector.shape_cast %10 : vector<1x64x1xbf16> to vector<64x1xbf16>
    %cst_13 = arith.constant dense<0.000000e+00> : vector<10x1xf32>
    %12 = tpu.matmul %9, %11, %cst_13 {dimension_numbers = #tpu.dot_dimension_numbers<[1], [0], [0], [1], [0, 0, 1, 1], [], []>} : vector<10x64xbf16>, vector<64x1xbf16>, vector<10x1xf32> -> vector<10x1xf32>
    %13 = arith.addf %7, %12 : vector<10x1xf32>
    %c0_14 = arith.constant 0 : index
    %c2 = arith.constant 2 : index
    %c0_15 = arith.constant 0 : index
    %14 = vector.load %arg1[%c0_14, %c2, %c0_15] : memref<1x32x64xbf16, #tpu.memory_space<vmem>>, vector<1x10x64xbf16>
    %15 = vector.shape_cast %14 : vector<1x10x64xbf16> to vector<10x64xbf16>
    %c2_16 = arith.constant 2 : index
    %c0_17 = arith.constant 0 : index
    %c0_18 = arith.constant 0 : index
    %16 = vector.load %arg2[%c2_16, %c0_17, %c0_18] : memref<16x64x1xbf16, #tpu.memory_space<vmem>>, vector<1x64x1xbf16>
    %17 = vector.shape_cast %16 : vector<1x64x1xbf16> to vector<64x1xbf16>
    %cst_19 = arith.constant dense<0.000000e+00> : vector<10x1xf32>
    %18 = tpu.matmul %15, %17, %cst_19 {dimension_numbers = #tpu.dot_dimension_numbers<[1], [0], [0], [1], [0, 0, 1, 1], [], []>} : vector<10x64xbf16>, vector<64x1xbf16>, vector<10x1xf32> -> vector<10x1xf32>
    %19 = arith.addf %13, %18 : vector<10x1xf32>
    %c0_20 = arith.constant 0 : index
    %c3 = arith.constant 3 : index
    %c0_21 = arith.constant 0 : index
    %20 = vector.load %arg1[%c0_20, %c3, %c0_21] : memref<1x32x64xbf16, #tpu.memory_space<vmem>>, vector<1x10x64xbf16>
    %21 = vector.shape_cast %20 : vector<1x10x64xbf16> to vector<10x64xbf16>
    %c3_22 = arith.constant 3 : index
    %c0_23 = arith.constant 0 : index
    %c0_24 = arith.constant 0 : index
    %22 = vector.load %arg2[%c3_22, %c0_23, %c0_24] : memref<16x64x1xbf16, #tpu.memory_space<vmem>>, vector<1x64x1xbf16>
    %23 = vector.shape_cast %22 : vector<1x64x1xbf16> to vector<64x1xbf16>
    %cst_25 = arith.constant dense<0.000000e+00> : vector<10x1xf32>
    %24 = tpu.matmul %21, %23, %cst_25 {dimension_numbers = #tpu.dot_dimension_numbers<[1], [0], [0], [1], [0, 0, 1, 1], [], []>} : vector<10x64xbf16>, vector<64x1xbf16>, vector<10x1xf32> -> vector<10x1xf32>
    %25 = arith.addf %19, %24 : vector<10x1xf32>
    %c0_26 = arith.constant 0 : index
    %c5 = arith.constant 5 : index
    %c0_27 = arith.constant 0 : index
    %26 = vector.load %arg1[%c0_26, %c5, %c0_27] : memref<1x32x64xbf16, #tpu.memory_space<vmem>>, vector<1x10x64xbf16>
    %27 = vector.shape_cast %26 : vector<1x10x64xbf16> to vector<10x64xbf16>
    %c4 = arith.constant 4 : index
    %c0_28 = arith.constant 0 : index
    %c0_29 = arith.constant 0 : index
    %28 = vector.load %arg2[%c4, %c0_28, %c0_29] : memref<16x64x1xbf16, #tpu.memory_space<vmem>>, vector<1x64x1xbf16>
    %29 = vector.shape_cast %28 : vector<1x64x1xbf16> to vector<64x1xbf16>
    %cst_30 = arith.constant dense<0.000000e+00> : vector<10x1xf32>
    %30 = tpu.matmul %27, %29, %cst_30 {dimension_numbers = #tpu.dot_dimension_numbers<[1], [0], [0], [1], [0, 0, 1, 1], [], []>} : vector<10x64xbf16>, vector<64x1xbf16>, vector<10x1xf32> -> vector<10x1xf32>
    %31 = arith.addf %25, %30 : vector<10x1xf32>
    %c0_31 = arith.constant 0 : index
    %c6 = arith.constant 6 : index
    %c0_32 = arith.constant 0 : index
    %32 = vector.load %arg1[%c0_31, %c6, %c0_32] : memref<1x32x64xbf16, #tpu.memory_space<vmem>>, vector<1x10x64xbf16>
    %33 = vector.shape_cast %32 : vector<1x10x64xbf16> to vector<10x64xbf16>
    %c5_33 = arith.constant 5 : index
    %c0_34 = arith.constant 0 : index
    %c0_35 = arith.constant 0 : index
    %34 = vector.load %arg2[%c5_33, %c0_34, %c0_35] : memref<16x64x1xbf16, #tpu.memory_space<vmem>>, vector<1x64x1xbf16>
    %35 = vector.shape_cast %34 : vector<1x64x1xbf16> to vector<64x1xbf16>
    %cst_36 = arith.constant dense<0.000000e+00> : vector<10x1xf32>
    %36 = tpu.matmul %33, %35, %cst_36 {dimension_numbers = #tpu.dot_dimension_numbers<[1], [0], [0], [1], [0, 0, 1, 1], [], []>} : vector<10x64xbf16>, vector<64x1xbf16>, vector<10x1xf32> -> vector<10x1xf32>
    %37 = arith.addf %31, %36 : vector<10x1xf32>
    %c0_37 = arith.constant 0 : index
    %c7 = arith.constant 7 : index
    %c0_38 = arith.constant 0 : index
    %38 = vector.load %arg1[%c0_37, %c7, %c0_38] : memref<1x32x64xbf16, #tpu.memory_space<vmem>>, vector<1x10x64xbf16>
    %39 = vector.shape_cast %38 : vector<1x10x64xbf16> to vector<10x64xbf16>
    %c6_39 = arith.constant 6 : index
    %c0_40 = arith.constant 0 : index
    %c0_41 = arith.constant 0 : index
    %40 = vector.load %arg2[%c6_39, %c0_40, %c0_41] : memref<16x64x1xbf16, #tpu.memory_space<vmem>>, vector<1x64x1xbf16>
    %41 = vector.shape_cast %40 : vector<1x64x1xbf16> to vector<64x1xbf16>
    %cst_42 = arith.constant dense<0.000000e+00> : vector<10x1xf32>
    %42 = tpu.matmul %39, %41, %cst_42 {dimension_numbers = #tpu.dot_dimension_numbers<[1], [0], [0], [1], [0, 0, 1, 1], [], []>} : vector<10x64xbf16>, vector<64x1xbf16>, vector<10x1xf32> -> vector<10x1xf32>
    %43 = arith.addf %37, %42 : vector<10x1xf32>
    %c0_43 = arith.constant 0 : index
    %c8 = arith.constant 8 : index
    %c0_44 = arith.constant 0 : index
    %44 = vector.load %arg1[%c0_43, %c8, %c0_44] : memref<1x32x64xbf16, #tpu.memory_space<vmem>>, vector<1x10x64xbf16>
    %45 = vector.shape_cast %44 : vector<1x10x64xbf16> to vector<10x64xbf16>
    %c7_45 = arith.constant 7 : index
    %c0_46 = arith.constant 0 : index
    %c0_47 = arith.constant 0 : index
    %46 = vector.load %arg2[%c7_45, %c0_46, %c0_47] : memref<16x64x1xbf16, #tpu.memory_space<vmem>>, vector<1x64x1xbf16>
    %47 = vector.shape_cast %46 : vector<1x64x1xbf16> to vector<64x1xbf16>
    %cst_48 = arith.constant dense<0.000000e+00> : vector<10x1xf32>
    %48 = tpu.matmul %45, %47, %cst_48 {dimension_numbers = #tpu.dot_dimension_numbers<[1], [0], [0], [1], [0, 0, 1, 1], [], []>} : vector<10x64xbf16>, vector<64x1xbf16>, vector<10x1xf32> -> vector<10x1xf32>
    %49 = arith.addf %43, %48 : vector<10x1xf32>
    %c0_49 = arith.constant 0 : index
    %c10 = arith.constant 10 : index
    %c0_50 = arith.constant 0 : index
    %50 = vector.load %arg1[%c0_49, %c10, %c0_50] : memref<1x32x64xbf16, #tpu.memory_space<vmem>>, vector<1x10x64xbf16>
    %51 = vector.shape_cast %50 : vector<1x10x64xbf16> to vector<10x64xbf16>
    %c8_51 = arith.constant 8 : index
    %c0_52 = arith.constant 0 : index
    %c0_53 = arith.constant 0 : index
    %52 = vector.load %arg2[%c8_51, %c0_52, %c0_53] : memref<16x64x1xbf16, #tpu.memory_space<vmem>>, vector<1x64x1xbf16>
    %53 = vector.shape_cast %52 : vector<1x64x1xbf16> to vector<64x1xbf16>
    %cst_54 = arith.constant dense<0.000000e+00> : vector<10x1xf32>
    %54 = tpu.matmul %51, %53, %cst_54 {dimension_numbers = #tpu.dot_dimension_numbers<[1], [0], [0], [1], [0, 0, 1, 1], [], []>} : vector<10x64xbf16>, vector<64x1xbf16>, vector<10x1xf32> -> vector<10x1xf32>
    %55 = arith.addf %49, %54 : vector<10x1xf32>
    %c0_55 = arith.constant 0 : index
    %c11 = arith.constant 11 : index
    %c0_56 = arith.constant 0 : index
    %56 = vector.load %arg1[%c0_55, %c11, %c0_56] : memref<1x32x64xbf16, #tpu.memory_space<vmem>>, vector<1x10x64xbf16>
    %57 = vector.shape_cast %56 : vector<1x10x64xbf16> to vector<10x64xbf16>
    %c9 = arith.constant 9 : index
    %c0_57 = arith.constant 0 : index
    %c0_58 = arith.constant 0 : index
    %58 = vector.load %arg2[%c9, %c0_57, %c0_58] : memref<16x64x1xbf16, #tpu.memory_space<vmem>>, vector<1x64x1xbf16>
    %59 = vector.shape_cast %58 : vector<1x64x1xbf16> to vector<64x1xbf16>
    %cst_59 = arith.constant dense<0.000000e+00> : vector<10x1xf32>
    %60 = tpu.matmul %57, %59, %cst_59 {dimension_numbers = #tpu.dot_dimension_numbers<[1], [0], [0], [1], [0, 0, 1, 1], [], []>} : vector<10x64xbf16>, vector<64x1xbf16>, vector<10x1xf32> -> vector<10x1xf32>
    %61 = arith.addf %55, %60 : vector<10x1xf32>
    %c0_60 = arith.constant 0 : index
    %c12 = arith.constant 12 : index
    %c0_61 = arith.constant 0 : index
    %62 = vector.load %arg1[%c0_60, %c12, %c0_61] : memref<1x32x64xbf16, #tpu.memory_space<vmem>>, vector<1x10x64xbf16>
    %63 = vector.shape_cast %62 : vector<1x10x64xbf16> to vector<10x64xbf16>
    %c10_62 = arith.constant 10 : index
    %c0_63 = arith.constant 0 : index
    %c0_64 = arith.constant 0 : index
    %64 = vector.load %arg2[%c10_62, %c0_63, %c0_64] : memref<16x64x1xbf16, #tpu.memory_space<vmem>>, vector<1x64x1xbf16>
    %65 = vector.shape_cast %64 : vector<1x64x1xbf16> to vector<64x1xbf16>
    %cst_65 = arith.constant dense<0.000000e+00> : vector<10x1xf32>
    %66 = tpu.matmul %63, %65, %cst_65 {dimension_numbers = #tpu.dot_dimension_numbers<[1], [0], [0], [1], [0, 0, 1, 1], [], []>} : vector<10x64xbf16>, vector<64x1xbf16>, vector<10x1xf32> -> vector<10x1xf32>
    %67 = arith.addf %61, %66 : vector<10x1xf32>
    %c0_66 = arith.constant 0 : index
    %c13 = arith.constant 13 : index
    %c0_67 = arith.constant 0 : index
    %68 = vector.load %arg1[%c0_66, %c13, %c0_67] : memref<1x32x64xbf16, #tpu.memory_space<vmem>>, vector<1x10x64xbf16>
    %69 = vector.shape_cast %68 : vector<1x10x64xbf16> to vector<10x64xbf16>
    %c11_68 = arith.constant 11 : index
    %c0_69 = arith.constant 0 : index
    %c0_70 = arith.constant 0 : index
    %70 = vector.load %arg2[%c11_68, %c0_69, %c0_70] : memref<16x64x1xbf16, #tpu.memory_space<vmem>>, vector<1x64x1xbf16>
    %71 = vector.shape_cast %70 : vector<1x64x1xbf16> to vector<64x1xbf16>
    %cst_71 = arith.constant dense<0.000000e+00> : vector<10x1xf32>
    %72 = tpu.matmul %69, %71, %cst_71 {dimension_numbers = #tpu.dot_dimension_numbers<[1], [0], [0], [1], [0, 0, 1, 1], [], []>} : vector<10x64xbf16>, vector<64x1xbf16>, vector<10x1xf32> -> vector<10x1xf32>
    %73 = arith.addf %67, %72 : vector<10x1xf32>
    %c0_72 = arith.constant 0 : index
    %c15 = arith.constant 15 : index
    %c0_73 = arith.constant 0 : index
    %74 = vector.load %arg1[%c0_72, %c15, %c0_73] : memref<1x32x64xbf16, #tpu.memory_space<vmem>>, vector<1x10x64xbf16>
    %75 = vector.shape_cast %74 : vector<1x10x64xbf16> to vector<10x64xbf16>
    %c12_74 = arith.constant 12 : index
    %c0_75 = arith.constant 0 : index
    %c0_76 = arith.constant 0 : index
    %76 = vector.load %arg2[%c12_74, %c0_75, %c0_76] : memref<16x64x1xbf16, #tpu.memory_space<vmem>>, vector<1x64x1xbf16>
    %77 = vector.shape_cast %76 : vector<1x64x1xbf16> to vector<64x1xbf16>
    %cst_77 = arith.constant dense<0.000000e+00> : vector<10x1xf32>
    %78 = tpu.matmul %75, %77, %cst_77 {dimension_numbers = #tpu.dot_dimension_numbers<[1], [0], [0], [1], [0, 0, 1, 1], [], []>} : vector<10x64xbf16>, vector<64x1xbf16>, vector<10x1xf32> -> vector<10x1xf32>
    %79 = arith.addf %73, %78 : vector<10x1xf32>
    %c0_78 = arith.constant 0 : index
    %c16 = arith.constant 16 : index
    %c0_79 = arith.constant 0 : index
    %80 = vector.load %arg1[%c0_78, %c16, %c0_79] : memref<1x32x64xbf16, #tpu.memory_space<vmem>>, vector<1x10x64xbf16>
    %81 = vector.shape_cast %80 : vector<1x10x64xbf16> to vector<10x64xbf16>
    %c13_80 = arith.constant 13 : index
    %c0_81 = arith.constant 0 : index
    %c0_82 = arith.constant 0 : index
    %82 = vector.load %arg2[%c13_80, %c0_81, %c0_82] : memref<16x64x1xbf16, #tpu.memory_space<vmem>>, vector<1x64x1xbf16>
    %83 = vector.shape_cast %82 : vector<1x64x1xbf16> to vector<64x1xbf16>
    %cst_83 = arith.constant dense<0.000000e+00> : vector<10x1xf32>
    %84 = tpu.matmul %81, %83, %cst_83 {dimension_numbers = #tpu.dot_dimension_numbers<[1], [0], [0], [1], [0, 0, 1, 1], [], []>} : vector<10x64xbf16>, vector<64x1xbf16>, vector<10x1xf32> -> vector<10x1xf32>
    %85 = arith.addf %79, %84 : vector<10x1xf32>
    %c0_84 = arith.constant 0 : index
    %c17 = arith.constant 17 : index
    %c0_85 = arith.constant 0 : index
    %86 = vector.load %arg1[%c0_84, %c17, %c0_85] : memref<1x32x64xbf16, #tpu.memory_space<vmem>>, vector<1x10x64xbf16>
    %87 = vector.shape_cast %86 : vector<1x10x64xbf16> to vector<10x64xbf16>
    %c14 = arith.constant 14 : index
    %c0_86 = arith.constant 0 : index
    %c0_87 = arith.constant 0 : index
    %88 = vector.load %arg2[%c14, %c0_86, %c0_87] : memref<16x64x1xbf16, #tpu.memory_space<vmem>>, vector<1x64x1xbf16>
    %89 = vector.shape_cast %88 : vector<1x64x1xbf16> to vector<64x1xbf16>
    %cst_88 = arith.constant dense<0.000000e+00> : vector<10x1xf32>
    %90 = tpu.matmul %87, %89, %cst_88 {dimension_numbers = #tpu.dot_dimension_numbers<[1], [0], [0], [1], [0, 0, 1, 1], [], []>} : vector<10x64xbf16>, vector<64x1xbf16>, vector<10x1xf32> -> vector<10x1xf32>
    %91 = arith.addf %85, %90 : vector<10x1xf32>
    %c0_89 = arith.constant 0 : index
    %c18 = arith.constant 18 : index
    %c0_90 = arith.constant 0 : index
    %92 = vector.load %arg1[%c0_89, %c18, %c0_90] : memref<1x32x64xbf16, #tpu.memory_space<vmem>>, vector<1x10x64xbf16>
    %93 = vector.shape_cast %92 : vector<1x10x64xbf16> to vector<10x64xbf16>
    %c15_91 = arith.constant 15 : index
    %c0_92 = arith.constant 0 : index
    %c0_93 = arith.constant 0 : index
    %94 = vector.load %arg2[%c15_91, %c0_92, %c0_93] : memref<16x64x1xbf16, #tpu.memory_space<vmem>>, vector<1x64x1xbf16>
    %95 = vector.shape_cast %94 : vector<1x64x1xbf16> to vector<64x1xbf16>
    %cst_94 = arith.constant dense<0.000000e+00> : vector<10x1xf32>
    %96 = tpu.matmul %93, %95, %cst_94 {dimension_numbers = #tpu.dot_dimension_numbers<[1], [0], [0], [1], [0, 0, 1, 1], [], []>} : vector<10x64xbf16>, vector<64x1xbf16>, vector<10x1xf32> -> vector<10x1xf32>
    %97 = arith.addf %91, %96 : vector<10x1xf32>
    %98 = vector.broadcast %0 : vector<1x1xf32> to vector<10x1xf32>
    %99 = arith.addf %97, %98 : vector<10x1xf32>
    %c0_95 = arith.constant 0 : index
    %c0_96 = arith.constant 0 : index
    %c0_97 = arith.constant 0 : index
    %100 = vector.load %arg5[%c0_95, %c0_96, %c0_97] : memref<1x10x1xf32, #tpu.memory_space<vmem>>, vector<1x10x1xf32>
    %101 = vector.shape_cast %100 : vector<1x10x1xf32> to vector<10x1xf32>
    %102 = vector.shape_cast %99 : vector<10x1xf32> to vector<1x10x1xf32>
    tpu.vector_store %arg5[%c0_95, %c0_96, %c0_97], %102 {strides = array<i32>} : memref<1x10x1xf32, #tpu.memory_space<vmem>>, vector<1x10x1xf32>,
    return
  }
  func.func @transform_0(%arg0: i32) -> (i32, i32, i32) {
    %c0_i32 = arith.constant 0 : i32
    %c0_i32_0 = arith.constant 0 : i32
    %c0_i32_1 = arith.constant 0 : i32
    return %arg0, %c0_i32, %c0_i32_0 : i32, i32, i32
  }
  func.func @transform_1(%arg0: i32) -> (i32, i32, i32) {
    %c0_i32 = arith.constant 0 : i32
    %c0_i32_0 = arith.constant 0 : i32
    %c0_i32_1 = arith.constant 0 : i32
    %c0_i32_2 = arith.constant 0 : i32
    return %c0_i32, %c0_i32_0, %c0_i32_1 : i32, i32, i32
  }
  func.func @transform_2(%arg0: i32) -> (i32, i32) {
    %c0_i32 = arith.constant 0 : i32
    %c0_i32_0 = arith.constant 0 : i32
    %c0_i32_1 = arith.constant 0 : i32
    return %c0_i32, %c0_i32_0 : i32, i32
  }
  func.func @transform_3(%arg0: i32) -> (i32, i32) {
    %c0_i32 = arith.constant 0 : i32
    %c0_i32_0 = arith.constant 0 : i32
    %c0_i32_1 = arith.constant 0 : i32
    return %c0_i32, %c0_i32_0 : i32, i32
  }
  func.func @transform_4(%arg0: i32) -> (i32, i32, i32) {
    %c0_i32 = arith.constant 0 : i32
    %c0_i32_0 = arith.constant 0 : i32
    %c0_i32_1 = arith.constant 0 : i32
    return %arg0, %c0_i32, %c0_i32_0 : i32, i32, i32
  }
}

</mosaic_0001>

<bundles_post_ra>
// kernel: discriminator_forward.5
= control target key start
LH: loop header
LB: loop body
LE: loop exit
PB: predicated region body
PF: predicated region fallthrough
CT: control target
= control target key end

     0   :  { %s2027_s15 = smov 0   ;;  %s2419_s0 = inlined_call_operand.vmem [shape: bf16[2,296,12], index: 0, kind: input, shape index: {}]   ;;  %s2420_s1 = inlined_call_operand.vmem [shape: bf16[4,12,8], index: 1, kind: input, shape index: {}]   ;;  %s2421_s2 = inlined_call_operand.vmem [shape: f32[1,8], index: 2, kind: input, shape index: {}]   ;;  %s2422_s3 = inlined_call_operand.vmem [shape: f32[272,1], index: 3, kind: input, shape index: {}]   ;;  %s2423_s4 = inlined_call_operand.vmem [shape: bf16[2,272,8], index: 4, kind: output, shape index: {}]  }
   0x1 LB: > { %s1706_s16 = sadd.s32 4294967295, %s2000_s15   ;;  %p1710_p0 = scmp.ge.s32.totalorder %s2000_s15, 1  ;;  %s2000_s15 = sphi %s2027_s15, %s14_s15  }
   0x2   : > { %p162_p1 = scmp.lt.s32.totalorder %s2000_s15, 3 }
   0x4   : > { %p163_p2 = pnand %p1710_p0, %p162_p1 }
   0x5   : > { %p188_p3 = scmp.lt.s32.totalorder (!%p163_p2), %s1706_s16, 1 }
   0x6   : > { %166 = sbr.rel (%p163_p2) target bundleno = 435 (0x1b3), region = 36 }
   0xb   : > { %v1806_v0 = vld [vmem:[%s2420_s1] sm:$0xf]  ;;  %v1954_v1 = vld [vmem:[%s2420_s1] sm:$0x30]  ;;  %vm526_vm0 = vcmask 1045504   ;;  %s2425_s16 = smov (!%p188_p3, %s1706_s16), 1 }
   0xc   : > { %v1807_v2 = vor.u32 %v1954_v1, %v1806_v0  ;;  %v1916_v3 = vld [vmem:[%s2420_s1 + $0x18] sm:$0xf]  ;;  %v1973_v4 = vld [vmem:[%s2420_s1 + $0x18] sm:$0x30]  ;;  %v1893_v6 = vld [vmem:[%s2420_s1 + $0x10] sm:$0xf] }
   0xd   : > { %v1917_v5 = vor.u32 %v1973_v4, %v1916_v3  ;;  %v1972_v7 = vld [vmem:[%s2420_s1 + $0x10] sm:$0x30]  ;;  %v1785_v10 = vld [vmem:[%s2420_s1 + $0x8] sm:$0xf]  ;;  %v1955_v11 = vld [vmem:[%s2420_s1 + $0x8] sm:$0x30] }
   0xe   : > { %v664_v8 = vsel %vm526_vm0, %v1807_v2, 0  ;;  %v1894_v9 = vor.u32 %v1972_v7, %v1893_v6  ;;  %s1982_s6 = smul.u32 148, %s2425_s16  ;;  %v1786_v13 = vor.u32 %v1955_v11, %v1785_v10  ;;  %vm474_vm1 = vcmask 97280  }
   0xf   : > { %673 = vmatpush.bf16.msra.mxu1 %v664_v8  ;;  %v1313_v12 = vsel %vm526_vm0, %v1917_v5, 0  ;;  %vm1220_vm2 = vcmask 1046528   ;;  %vm328_vm3 = vsmask.f32 7424  ;;  %s1983_s12 = smul.u32 136, %s2425_s16  ;;  %vm1616_vm5 = vcmask 60416  }
  0x10   : > { %1322 = vmatpush.bf16.msra.mxu3 %v1313_v12  ;;  %v1083_v14 = vsel %vm526_vm0, %v1894_v9, 0  ;;  %s2068_s9 = scalar_lea.vmem %s2419_s0, %s1982_s6  ;;  %v528_v15 = vsel %vm526_vm0, %v1786_v13, 0 }
  0x11   : > { %1092 = vmatpush.bf16.msra.mxu2 %v1083_v14  ;;  %v1937_v16 = vld [vmem:[%s2068_s9] sm:$0xff]  ;;  %v1979_v17 = vld [vmem:[%s2068_s9 + $0x8] sm:$0xf0]  ;;  %v1956_v18 = vld [vmem:[%s2068_s9 + $0x10] sm:$0xff]  ;;  %537 = vmatpush.bf16.msra.mxu0 %v528_v15  ;;  %s2177_s17 = scalar_lea.vmem %s2423_s4, %s1983_s12 }
  0x12   : > { %v1980_v19 = vld [vmem:[%s2068_s9 + $0x8] sm:$0xe]  ;;  %v332_v22 = vshll.u32 %v1937_v16, 16  ;;  %1808 = vmatmul.msk.bf16.vlgmr.msra.gmra.mxu1 %vm474_vm1, %v1937_v16  ;;  %v1222_v24 = vrot.slane %v1956_v18, 1  ;;  %v894_v27 = vshll.u32 %v1956_v18, 16  ;;  %v330_v28 = vshrl.u32 %v1937_v16, 16 }
  0x13   : > { %v1978_v20 = vld [vmem:[%s2068_s9 + $0x8] sm:$0xff]   ;;  %v1981_v23 = vor.u32 %v1980_v19, %v1979_v17  ;;  %v1939_v40 = vld [vmem:[%s2068_s9 + $0x10] sm:$0xff]  ;;  %v1957_v41 = vld [vmem:[%s2068_s9 + $0x18] sm:$0xff]  ;;  %v898_v44 = vshrl.u32 %v1956_v18, 16 }
  0x14   : > { %v1938_v21 = vld [vmem:[%s2068_s9 + $0x8] sm:$0xff]  ;;  %v887_v25 = vshrl.u32 %v1978_v20, 16  ;;  %v889_v26 = vshll.u32 %v1978_v20, 16  ;;  %v334_v31 = vrot.slane %v332_v22, 1  ;;  %v896_v33 = vrot.slane %v894_v27, 1  ;;  %v1940_v54 = vld [vmem:[%s2068_s9 + $0x18] sm:$0xff] }
  0x15   : > { %v337_v29 = vshll.u32 %v1938_v21, 16  ;;  %v1221_v30 = vrot.slane %v1981_v23, 1  ;;  %v341_v42 = vshrl.u32 %v1938_v21, 16  ;;  %v345_v43 = vshll.u32 %v1939_v40, 16  ;;  %v1958_v55 = vld [vmem:[%s2068_s9 + $0x20] sm:$0xff]  ;;  %v1959_v5 = vld [vmem:[%s2068_s9 + $0x28] sm:$0xff] }
  0x16   : > { %v891_v32 = vrot.slane %v889_v26, 1  ;;  %v335_v36 = vor.u32 %v334_v31, %v330_v28  ;;  %v902_v45 = vshll.u32 %v1957_v41, 16  ;;  %v1224_v46 = vrot.slane %v1957_v41, 1  ;;  %v1941_v4 = vld [vmem:[%s2068_s9 + $0x20] sm:$0xff]  ;;  %v1942_v18 = vld [vmem:[%s2068_s9 + $0x28] sm:$0xff]  ;;  %v1960_v19 = vld [vmem:[%s2068_s9 + $0x30] sm:$0xff] }
  0x17   : > { %v339_v34 = vrot.slane %v337_v29, 1  ;;  %v1223_v35 = vsel %vm1220_vm2, %v1221_v30, %v1222_v24  ;;  %v347_v48 = vrot.slane %v345_v43, 1  ;;  %v900_v49 = vor.u32 %v898_v44, %v896_v33 }
  0x18   : > { %1918 = vmatmul.msk.bf16.vlgmr.msra.gmra.mxu3 %vm474_vm1, %v1223_v35  ;;  %v892_v37 = vor.u32 %v891_v32, %v887_v25  ;;  %v904_v50 = vrot.slane %v902_v45, 1  ;;  %v1225_v51 = vsel %vm1220_vm2, %v1222_v24, %v1224_v46  ;;  %v349_v56 = vshrl.u32 %v1939_v40, 16  ;;  %v1943_v32 = vld [vmem:[%s2068_s9 + $0x30] sm:$0xff] }
  0x19   : > { %v340_v38 = vsel %vm328_vm3, %v335_v36, %v339_v34  ;;  %v343_v47 = vor.u32 %v341_v42, %v339_v34  ;;  %v353_v57 = vshll.u32 %v1940_v54, 16  ;;  %v906_v58 = vshrl.u32 %v1957_v41, 16 }
  0x1a   : > { %v897_v39 = vsel %vm328_vm3, %v892_v37, %v896_v33  ;;  %1787 = vmatmul.msk.bf16.vlgmr.msra.gmra.mxu0 %vm474_vm1, %v340_v38  ;;  %v905_v53 = vsel %vm328_vm3, %v900_v49, %v904_v50  ;;  %v910_v59 = vshll.u32 %v1958_v55, 16  ;;  %v1226_v60 = vrot.slane %v1958_v55, 1  ;;  %v1961_v33 = vld [vmem:[%s2068_s9 + $0x38] sm:$0xff] }
  0x1b   : > { %1895 = vmatmul.msk.bf16.vlgmr.msra.gmra.mxu2 %vm474_vm1, %v897_v39  ;;  %v348_v52 = vsel %vm328_vm3, %v343_v47, %v347_v48  ;;  %v351_v61 = vor.u32 %v349_v56, %v347_v48  ;;  %v355_v62 = vrot.slane %v353_v57, 1  ;;  %v908_v63 = vor.u32 %v906_v58, %v904_v50  ;;  %v1962_v47 = vld [vmem:[%s2068_s9 + $0x40] sm:$0xff] }
  0x1c   : > { %v912_v0 = vrot.slane %v910_v59, 1  ;;  %v1227_v1 = vsel %vm1220_vm2, %v1224_v46, %v1226_v60  ;;  %v357_v6 = vshrl.u32 %v1940_v54, 16  ;;  %v361_v7 = vshll.u32 %v1941_v4, 16  ;;  %v1944_v46 = vld [vmem:[%s2068_s9 + $0x38] sm:$0xff] }
  0x1d   : > { %v356_v2 = vsel %vm328_vm3, %v351_v61, %v355_v62  ;;  %v914_v8 = vshrl.u32 %v1958_v55, 16  ;;  %v918_v9 = vshll.u32 %v1959_v5, 16  ;;  %v1228_v10 = vrot.slane %v1959_v5, 1  ;;  %v1963_v61 = vld [vmem:[%s2068_s9 + $0x48] sm:$0xff] }
  0x1e   : > { %v913_v3 = vsel %vm328_vm3, %v908_v63, %v912_v0  ;;  %v359_v11 = vor.u32 %v357_v6, %v355_v62  ;;  %v363_v12 = vrot.slane %v361_v7, 1  ;;  %v365_v20 = vshrl.u32 %v1941_v4, 16 }
  0x1f   : > { %v916_v13 = vor.u32 %v914_v8, %v912_v0  ;;  %v920_v14 = vrot.slane %v918_v9, 1  ;;  %v1229_v15 = vsel %vm1220_vm2, %v1226_v60, %v1228_v10  ;;  %v922_v22 = vshrl.u32 %v1959_v5, 16  ;;  %v1945_v60 = vld [vmem:[%s2068_s9 + $0x40] sm:$0xff] }
  0x20   : > { %v364_v16 = vsel %vm328_vm3, %v359_v11, %v363_v12  ;;  %v926_v23 = vshll.u32 %v1960_v19, 16  ;;  %v1230_v24 = vrot.slane %v1960_v19, 1  ;;  %v367_v25 = vor.u32 %v365_v20, %v363_v12  ;;  %v1964_v11 = vld [vmem:[%s2068_s9 + $0x50] sm:$0xff] }
  0x21   : > { %v921_v17 = vsel %vm328_vm3, %v916_v13, %v920_v14  ;;  %v924_v27 = vor.u32 %v922_v22, %v920_v14  ;;  %v373_v34 = vshrl.u32 %v1942_v18, 16  ;;  %v377_v35 = vshll.u32 %v1943_v32, 16 }
  0x22   : > { %1809 = vmatmul.msk.bf16.gmra.mxu1 %vm474_vm1, %v1938_v21  ;;  %v369_v21 = vshll.u32 %v1942_v18, 16  ;;  %v928_v28 = vrot.slane %v926_v23, 1  ;;  %v1231_v29 = vsel %vm1220_vm2, %v1228_v10, %v1230_v24  ;;  %v930_v36 = vshrl.u32 %v1960_v19, 16  ;;  %v1946_v10 = vld [vmem:[%s2068_s9 + $0x48] sm:$0xff] }
  0x23   : > { %v934_v37 = vshll.u32 %v1961_v33, 16  ;;  %v1232_v38 = vrot.slane %v1961_v33, 1  ;;  %v381_v48 = vshrl.u32 %v1943_v32, 16  ;;  %v385_v49 = vshll.u32 %v1944_v46, 16 }
  0x24   : > { %v371_v26 = vrot.slane %v369_v21, 1  ;;  %v929_v31 = vsel %vm328_vm3, %v924_v27, %v928_v28  ;;  %v932_v41 = vor.u32 %v930_v36, %v928_v28  ;;  %v938_v50 = vshrl.u32 %v1961_v33, 16  ;;  %v2165_v33 = vld [vmem:[%s2421_s2] ss:$0 sm:$0xff] }
  0x25   : > { %v936_v42 = vrot.slane %v934_v37, 1  ;;  %v1233_v43 = vsel %vm1220_vm2, %v1230_v24, %v1232_v38  ;;  %v389_v62 = vshrl.u32 %v1944_v46, 16  ;;  %v393_v63 = vshll.u32 %v1945_v60, 16 }
  0x26   : > { %v372_v30 = vsel %vm328_vm3, %v367_v25, %v371_v26  ;;  %v375_v39 = vor.u32 %v373_v34, %v371_v26  ;;  %v946_v0 = vshrl.u32 %v1962_v47, 16  ;;  %v397_v12 = vshrl.u32 %v1945_v60, 16 }
  0x27   : > { %v937_v45 = vsel %vm328_vm3, %v932_v41, %v936_v42  ;;  %v940_v55 = vor.u32 %v938_v50, %v936_v42  ;;  %v401_v13 = vshll.u32 %v1946_v10, 16 }
  0x28   : > { %1919 = vmatmul.msk.bf16.gmra.mxu3 %vm474_vm1, %v1225_v51  ;;  %v942_v51 = vshll.u32 %v1962_v47, 16 }
  0x29   : > { %v403_v19 = vrot.slane %v401_v13, 1 }
  0x2a   : > { %1788 = vmatmul.msk.bf16.gmra.mxu0 %vm474_vm1, %v348_v52  ;;  %v1234_v52 = vrot.slane %v1962_v47, 1  ;;  %v944_v56 = vrot.slane %v942_v51, 1 }
  0x2b   : > { %1896 = vmatmul.msk.bf16.gmra.mxu2 %vm474_vm1, %v905_v53 }
  0x2c   : > { %v1235_v57 = vsel %vm1220_vm2, %v1232_v38, %v1234_v52  ;;  %v945_v59 = vsel %vm328_vm3, %v940_v55, %v944_v56  ;;  %v948_v5 = vor.u32 %v946_v0, %v944_v56  ;;  %v962_v38 = vshrl.u32 %v1964_v11, 16  ;;  %v2191_v0 = vld [vmem:[%s2068_s9 + $0x60] sm:$0xff] }
  0x2d   : > { %v1242_v13 = vrot.slane %v2191_v0, 1 }
  0x32   : > { %1810 = vmatmul.msk.bf16.gmra.mxu1 %vm474_vm1, %v1939_v40  ;;  %v379_v40 = vrot.slane %v377_v35, 1  ;;  %v405_v35 = vshrl.u32 %v1946_v10, 16 }
  0x34   : > { %v380_v44 = vsel %vm328_vm3, %v375_v39, %v379_v40  ;;  %v383_v53 = vor.u32 %v381_v48, %v379_v40 }
  0x38   : > { %1920 = vmatmul.msk.bf16.gmra.mxu3 %vm474_vm1, %v1227_v1  ;;  %v950_v1 = vshll.u32 %v1963_v61, 16 }
  0x3a   : > { %1789 = vmatmul.msk.bf16.gmra.mxu0 %vm474_vm1, %v356_v2  ;;  %v1236_v2 = vrot.slane %v1963_v61, 1  ;;  %v952_v6 = vrot.slane %v950_v1, 1 }
  0x3b   : > { %1897 = vmatmul.msk.bf16.gmra.mxu2 %vm474_vm1, %v913_v3 }
  0x3c   : > { %v1237_v7 = vsel %vm1220_vm2, %v1234_v52, %v1236_v2  ;;  %v953_v9 = vsel %vm328_vm3, %v948_v5, %v952_v6 }
  0x42   : > { %1811 = vmatmul.msk.bf16.gmra.mxu1 %vm474_vm1, %v1940_v54  ;;  %v387_v54 = vrot.slane %v385_v49, 1 }
  0x44   : > { %v388_v58 = vsel %vm328_vm3, %v383_v53, %v387_v54  ;;  %v391_v3 = vor.u32 %v389_v62, %v387_v54 }
  0x48   : > { %1921 = vmatmul.msk.bf16.gmra.mxu3 %vm474_vm1, %v1229_v15  ;;  %v954_v15 = vshrl.u32 %v1963_v61, 16 }
  0x4a   : > { %1790 = vmatmul.msk.bf16.gmra.mxu0 %vm474_vm1, %v364_v16  ;;  %v958_v16 = vshll.u32 %v1964_v11, 16  ;;  %v956_v20 = vor.u32 %v954_v15, %v952_v6 }
  0x4b   : > { %1898 = vmatmul.msk.bf16.gmra.mxu2 %vm474_vm1, %v921_v17  ;;  %v1238_v17 = vrot.slane %v1964_v11, 1  ;;  %v974_v11 = vshll.u32 %v2191_v0, 16 }
  0x4c   : > { %v960_v21 = vrot.slane %v958_v16, 1 }
  0x4d   : > { %v1239_v22 = vsel %vm1220_vm2, %v1236_v2, %v1238_v17 }
  0x4e   : > { %v961_v25 = vsel %vm328_vm3, %v956_v20, %v960_v21 }
  0x52   : > { %1812 = vmatmul.msk.bf16.gmra.mxu1 %vm474_vm1, %v1941_v4  ;;  %v395_v4 = vrot.slane %v393_v63, 1  ;;  %v2188_v63 = vld [vmem:[%s2068_s9 + $0x58] sm:$0xff] }
  0x54   : > { %v396_v8 = vsel %vm328_vm3, %v391_v3, %v395_v4 }
  0x58   : > { %1922 = vmatmul.msk.bf16.gmra.mxu3 %vm474_vm1, %v1231_v29  ;;  %v2157_v29 = vld [vmem:[%s2068_s9 + $0x50] sm:$0xff] }
  0x59   : > { %v409_v36 = vshll.u32 %v2157_v29, 16  ;;  %v413_v6 = vshrl.u32 %v2157_v29, 16 }
  0x5a   : > { %1791 = vmatmul.msk.bf16.gmra.mxu0 %vm474_vm1, %v372_v30  ;;  %v2160_v30 = vld [vmem:[%s2068_s9 + $0x58] sm:$0xff] }
  0x5b   : > { %1899 = vmatmul.msk.bf16.gmra.mxu2 %vm474_vm1, %v929_v31  ;;  %v966_v39 = vshll.u32 %v2160_v30, 16  ;;  %v1240_v41 = vrot.slane %v2160_v30, 1 }
  0x5d   : > { %v968_v47 = vrot.slane %v966_v39, 1  ;;  %v1241_v50 = vsel %vm1220_vm2, %v1238_v17, %v1240_v41 }
  0x62   : > { %1813 = vmatmul.msk.bf16.gmra.mxu1 %vm474_vm1, %v1942_v18  ;;  %v399_v18 = vor.u32 %v397_v12, %v395_v4 }
  0x64   : > { %v404_v24 = vsel %vm328_vm3, %v399_v18, %v403_v19 }
  0x68   : > { %1923 = vmatmul.msk.bf16.gmra.mxu3 %vm474_vm1, %v1233_v43 }
  0x6a   : > { %1792 = vmatmul.msk.bf16.gmra.mxu0 %vm474_vm1, %v380_v44  ;;  %v407_v44 = vor.u32 %v405_v35, %v403_v19  ;;  %v976_v19 = vrot.slane %v974_v11, 1 }
  0x6b   : > { %1900 = vmatmul.msk.bf16.gmra.mxu2 %vm474_vm1, %v937_v45  ;;  %v411_v45 = vrot.slane %v409_v36, 1  ;;  %v2213_v36 = vld [vmem:[%s2068_s9 + $0x60] sm:$0xff] }
  0x6d   : > { %v412_v55 = vsel %vm328_vm3, %v407_v44, %v411_v45  ;;  %v415_v16 = vor.u32 %v413_v6, %v411_v45  ;;  %v425_v44 = vshll.u32 %v2213_v36, 16 }
  0x72   : > { %1814 = vmatmul.msk.bf16.gmra.mxu1 %vm474_vm1, %v1943_v32 }
  0x78   : > { %1924 = vmatmul.msk.bf16.gmra.mxu3 %vm474_vm1, %v1235_v57 }
  0x7a   : > { %1793 = vmatmul.msk.bf16.gmra.mxu0 %vm474_vm1, %v388_v58 }
  0x7b   : > { %1901 = vmatmul.msk.bf16.gmra.mxu2 %vm474_vm1, %v945_v59 }
  0x82   : > { %1815 = vmatmul.msk.bf16.gmra.mxu1 %vm474_vm1, %v1944_v46  ;;  %v964_v46 = vor.u32 %v962_v38, %v960_v21 }
  0x84   : > { %v969_v57 = vsel %vm328_vm3, %v964_v46, %v968_v47 }
  0x88   : > { %1925 = vmatmul.msk.bf16.gmra.mxu3 %vm474_vm1, %v1237_v7  ;;  %v417_v7 = vshll.u32 %v2188_v63, 16 }
  0x8a   : > { %1794 = vmatmul.msk.bf16.gmra.mxu0 %vm474_vm1, %v396_v8  ;;  %v419_v17 = vrot.slane %v417_v7, 1 }
  0x8b   : > { %1902 = vmatmul.msk.bf16.gmra.mxu2 %vm474_vm1, %v953_v9 }
  0x8f   : > { %v675_v14 = vpop.f32.mrf.mxu1 }
  0x92   : > { %1816 = vmatmul.msk.bf16.gmra.mxu1 %vm474_vm1, %v1945_v60 }
  0x97   : > { %v539_v23 = vpop.f32.mrf.mxu0  ;;  %v677_v26 = vpop.f32.mrf.mxu1 }
  0x98   : > { %1926 = vmatmul.msk.bf16.gmra.mxu3 %vm474_vm1, %v1239_v22  ;;  %v676_v27 = vadd.f32 %v675_v14, %v539_v23  ;;  %v1243_v22 = vsel %vm1220_vm2, %v1240_v41, %v1242_v13 }
  0x9a   : > { %1795 = vmatmul.msk.bf16.gmra.mxu0 %vm474_vm1, %v404_v24 }
  0x9b   : > { %1903 = vmatmul.msk.bf16.gmra.mxu2 %vm474_vm1, %v961_v25  ;;  %v1324_v28 = vpop.f32.mrf.mxu3 }
  0x9e   : > { %v1094_v31 = vpop.f32.mrf.mxu2 }
  0x9f   : > { %v1179_v32 = vadd.f32 %v1094_v31, %v676_v27  ;;  %v541_v34 = vpop.f32.mrf.mxu0  ;;  %v680_v37 = vpop.f32.mrf.mxu1  ;;  %v420_v27 = vsel %vm328_vm3, %v415_v16, %v419_v17 }
  0xa0   : > { %v678_v49 = vadd.f32 %v677_v26, %v541_v34 }
  0xa1   : > { %v1409_v40 = vadd.f32 %v1324_v28, %v1179_v32 }
  0xa2   : > { %1817 = vmatmul.msk.bf16.gmra.mxu1 %vm474_vm1, %v1946_v10  ;;  %v970_v10 = vshrl.u32 %v2160_v30, 16 }
  0xa3   : > { %v1446_v42 = vadd.f32 %v2165_v33, %v1409_v40  ;;  %v1326_v43 = vpop.f32.mrf.mxu3 }
  0xa4   : > { %v972_v18 = vor.u32 %v970_v10, %v968_v47  ;;  %v978_v47 = vshrl.u32 %v2191_v0, 16 }
  0xa5   : > { %vm1480_vm4 = vcmp.gt.f32.partialorder %v1446_v42, 0.0  ;;  %v1514_v48 = vmul.f32 0.2, %v1446_v42 }
  0xa6   : > { %v1096_v51 = vpop.f32.mrf.mxu2 }
  0xa7   : > { %v1548_v52 = vsel %vm1480_vm4, %v1446_v42, %v1514_v48  ;;  %v1180_v53 = vadd.f32 %v1096_v51, %v678_v49  ;;  %v544_v54 = vpop.f32.mrf.mxu0  ;;  %v682_v58 = vpop.f32.mrf.mxu1 }
  0xa8   : > { %v1582_v56 = vpack.c.bf16 %v1548_v52, %v1548_v52  ;;  %1927 = vmatmul.msk.bf16.gmra.mxu3 %vm474_vm1, %v1241_v50  ;;  %v681_v61 = vadd.f32 %v680_v37, %v544_v54  ;;  %v2216_v37 = vld [vmem:[%s2068_s9 + $0x68] sm:$0xff]  ;;  %v427_v54 = vrot.slane %v425_v44, 1 }
  0xa9   : > { %v1410_v59 = vadd.f32 %v1326_v43, %v1180_v53  ;;  %v421_v43 = vshrl.u32 %v2188_v63, 16  ;;  %v982_v48 = vshll.u32 %v2216_v37, 16  ;;  %v1244_v50 = vrot.slane %v2216_v37, 1 }
  0xaa   : > { %1617 = vst.msk [vmem:[%s2177_s17] sm:$0xf] %vm1616_vm5, %v1582_v56  ;;  %1796 = vmatmul.msk.bf16.gmra.mxu0 %vm474_vm1, %v412_v55  ;;  %v980_v55 = vor.u32 %v978_v47, %v976_v19 }
  0xab   : > { %v1447_v60 = vadd.f32 %v2165_v33, %v1410_v59  ;;  %1904 = vmatmul.msk.bf16.gmra.mxu2 %vm474_vm1, %v969_v57  ;;  %v1329_v62 = vpop.f32.mrf.mxu3  ;;  %v423_v53 = vor.u32 %v421_v43, %v419_v17  ;;  %v984_v56 = vrot.slane %v982_v48, 1  ;;  %v1245_v59 = vsel %vm1220_vm2, %v1242_v13, %v1244_v50 }
  0xad   : > { %vm1481_vm6 = vcmp.gt.f32.partialorder %v1447_v60, 0.0  ;;  %v1515_v1 = vmul.f32 0.2, %v1447_v60 }
  0xae   : > { %v1099_v2 = vpop.f32.mrf.mxu2 }
  0xaf   : > { %v1549_v3 = vsel %vm1481_vm6, %v1447_v60, %v1515_v1  ;;  %v1181_v4 = vadd.f32 %v1099_v2, %v681_v61  ;;  %v546_v5 = vpop.f32.mrf.mxu0  ;;  %v685_v9 = vpop.f32.mrf.mxu1  ;;  %v428_v1 = vsel %vm328_vm3, %v423_v53, %v427_v54 }
  0xb0   : > { %v1583_v8 = vpack.c.bf16 %v1549_v3, %v1549_v3  ;;  %v683_v21 = vadd.f32 %v682_v58, %v546_v5 }
  0xb1   : > { %v1411_v12 = vadd.f32 %v1329_v62, %v1181_v4 }
  0xb2   : > { %1618 = vst.msk [vmem:[%s2177_s17 + $0x4] sm:$0xf] %vm1616_vm5, %v1583_v8  ;;  %1818 = vmatmul.msk.bf16.gmra.mxu1 %vm474_vm1, %v2157_v29  ;;  %v977_v29 = vsel %vm328_vm3, %v972_v18, %v976_v19  ;;  %v2238_v8 = vld [vmem:[%s2068_s9 + $0x68] sm:$0xff]  ;;  %v986_v19 = vshrl.u32 %v2216_v37, 16 }
  0xb3   : > { %v1448_v14 = vadd.f32 %v2165_v33, %v1411_v12  ;;  %v1331_v15 = vpop.f32.mrf.mxu3  ;;  %v433_v16 = vshll.u32 %v2238_v8, 16 }
  0xb5   : > { %vm1482_vm7 = vcmp.gt.f32.partialorder %v1448_v14, 0.0  ;;  %v1516_v20 = vmul.f32 0.2, %v1448_v14 }
  0xb6   : > { %v1101_v23 = vpop.f32.mrf.mxu2 }
  0xb7   : > { %v1550_v24 = vsel %vm1482_vm7, %v1448_v14, %v1516_v20  ;;  %v1182_v25 = vadd.f32 %v1101_v23, %v683_v21  ;;  %v549_v26 = vpop.f32.mrf.mxu0  ;;  %v687_v30 = vpop.f32.mrf.mxu1 }
  0xb8   : > { %v1584_v28 = vpack.c.bf16 %v1550_v24, %v1550_v24  ;;  %1928 = vmatmul.msk.bf16.gmra.mxu3 %vm474_vm1, %v1243_v22  ;;  %v686_v34 = vadd.f32 %v685_v9, %v549_v26  ;;  %v2241_v9 = vld [vmem:[%s2068_s9 + $0x70] sm:$0xff]  ;;  %v435_v26 = vrot.slane %v433_v16, 1 }
  0xb9   : > { %v1412_v31 = vadd.f32 %v1331_v15, %v1182_v25  ;;  %v429_v15 = vshrl.u32 %v2213_v36, 16  ;;  %v990_v20 = vshll.u32 %v2241_v9, 16  ;;  %v1246_v22 = vrot.slane %v2241_v9, 1 }
  0xba   : > { %1619 = vst.msk [vmem:[%s2177_s17 + $0x8] sm:$0xf] %vm1616_vm5, %v1584_v28  ;;  %1797 = vmatmul.msk.bf16.gmra.mxu0 %vm474_vm1, %v420_v27  ;;  %v988_v27 = vor.u32 %v986_v19, %v984_v56 }
  0xbb   : > { %v1449_v32 = vadd.f32 %v2165_v33, %v1412_v31  ;;  %1905 = vmatmul.msk.bf16.gmra.mxu2 %vm474_vm1, %v977_v29  ;;  %v1334_v35 = vpop.f32.mrf.mxu3  ;;  %v431_v25 = vor.u32 %v429_v15, %v427_v54  ;;  %v992_v28 = vrot.slane %v990_v20, 1  ;;  %v1247_v31 = vsel %vm1220_vm2, %v1244_v50, %v1246_v22 }
  0xbd   : > { %vm1483_vm8 = vcmp.gt.f32.partialorder %v1449_v32, 0.0  ;;  %v1517_v38 = vmul.f32 0.2, %v1449_v32 }
  0xbe   : > { %v1104_v39 = vpop.f32.mrf.mxu2 }
  0xbf   : > { %v1551_v40 = vsel %vm1483_vm8, %v1449_v32, %v1517_v38  ;;  %v1183_v41 = vadd.f32 %v1104_v39, %v686_v34  ;;  %v551_v42 = vpop.f32.mrf.mxu0  ;;  %v690_v46 = vpop.f32.mrf.mxu1  ;;  %v436_v38 = vsel %vm328_vm3, %v431_v25, %v435_v26 }
  0xc0   : > { %v1585_v45 = vpack.c.bf16 %v1551_v40, %v1551_v40  ;;  %v688_v58 = vadd.f32 %v687_v30, %v551_v42 }
  0xc1   : > { %v1413_v49 = vadd.f32 %v1334_v35, %v1183_v41 }
  0xc2   : > { %1620 = vst.msk [vmem:[%s2177_s17 + $0xc] sm:$0xf] %vm1616_vm5, %v1585_v45  ;;  %1819 = vmatmul.msk.bf16.gmra.mxu1 %vm474_vm1, %v2188_v63  ;;  %v985_v63 = vsel %vm328_vm3, %v980_v55, %v984_v56  ;;  %v2263_v45 = vld [vmem:[%s2068_s9 + $0x70] sm:$0xff]  ;;  %v994_v56 = vshrl.u32 %v2241_v9, 16 }
  0xc3   : > { %v1450_v51 = vadd.f32 %v2165_v33, %v1413_v49  ;;  %v1336_v52 = vpop.f32.mrf.mxu3  ;;  %v441_v53 = vshll.u32 %v2263_v45, 16 }
  0xc5   : > { %vm1484_vm9 = vcmp.gt.f32.partialorder %v1450_v51, 0.0  ;;  %v1518_v57 = vmul.f32 0.2, %v1450_v51 }
  0xc6   : > { %v1106_v60 = vpop.f32.mrf.mxu2 }
  0xc7   : > { %v1552_v61 = vsel %vm1484_vm9, %v1450_v51, %v1518_v57  ;;  %v1184_v62 = vadd.f32 %v1106_v60, %v688_v58  ;;  %v554_v0 = vpop.f32.mrf.mxu0  ;;  %v692_v3 = vpop.f32.mrf.mxu1 }
  0xc8   : > { %v1586_v2 = vpack.c.bf16 %v1552_v61, %v1552_v61  ;;  %1929 = vmatmul.msk.bf16.gmra.mxu3 %vm474_vm1, %v1245_v59  ;;  %v691_v6 = vadd.f32 %v690_v46, %v554_v0  ;;  %v2266_v46 = vld [vmem:[%s2068_s9 + $0x78] sm:$0xff]  ;;  %v443_v0 = vrot.slane %v441_v53, 1 }
  0xc9   : > { %v1414_v4 = vadd.f32 %v1336_v52, %v1184_v62  ;;  %v437_v52 = vshrl.u32 %v2238_v8, 16  ;;  %v998_v57 = vshll.u32 %v2266_v46, 16  ;;  %v1248_v59 = vrot.slane %v2266_v46, 1 }
  0xca   : > { %1621 = vst.msk [vmem:[%s2177_s17 + $0x10] sm:$0xf] %vm1616_vm5, %v1586_v2  ;;  %1798 = vmatmul.msk.bf16.gmra.mxu0 %vm474_vm1, %v428_v1  ;;  %v996_v1 = vor.u32 %v994_v56, %v992_v28 }
  0xcb   : > { %v1451_v5 = vadd.f32 %v2165_v33, %v1414_v4  ;;  %1906 = vmatmul.msk.bf16.gmra.mxu2 %vm474_vm1, %v985_v63  ;;  %v1339_v7 = vpop.f32.mrf.mxu3  ;;  %v439_v62 = vor.u32 %v437_v52, %v435_v26  ;;  %v1000_v2 = vrot.slane %v998_v57, 1  ;;  %v1249_v4 = vsel %vm1220_vm2, %v1246_v22, %v1248_v59 }
  0xcd   : > { %vm1485_vm10 = vcmp.gt.f32.partialorder %v1451_v5, 0.0  ;;  %v1519_v10 = vmul.f32 0.2, %v1451_v5 }
  0xce   : > { %v1109_v11 = vpop.f32.mrf.mxu2 }
  0xcf   : > { %v1553_v12 = vsel %vm1485_vm10, %v1451_v5, %v1519_v10  ;;  %v1185_v13 = vadd.f32 %v1109_v11, %v691_v6  ;;  %v556_v14 = vpop.f32.mrf.mxu0  ;;  %v695_v18 = vpop.f32.mrf.mxu1  ;;  %v444_v10 = vsel %vm328_vm3, %v439_v62, %v443_v0 }
  0xd0   : > { %v1587_v17 = vpack.c.bf16 %v1553_v12, %v1553_v12  ;;  %v693_v30 = vadd.f32 %v692_v3, %v556_v14 }
  0xd1   : > { %v1415_v21 = vadd.f32 %v1339_v7, %v1185_v13 }
  0xd2   : > { %1622 = vst.msk [vmem:[%s2177_s17 + $0x14] sm:$0xf] %vm1616_vm5, %v1587_v17  ;;  %1820 = vmatmul.msk.bf16.gmra.mxu1 %vm474_vm1, %v2213_v36  ;;  %v993_v36 = vsel %vm328_vm3, %v988_v27, %v992_v28  ;;  %v2288_v17 = vld [vmem:[%s2068_s9 + $0x78] sm:$0xff]  ;;  %v1002_v28 = vshrl.u32 %v2266_v46, 16 }
  0xd3   : > { %v1452_v23 = vadd.f32 %v2165_v33, %v1415_v21  ;;  %v1341_v24 = vpop.f32.mrf.mxu3  ;;  %v449_v25 = vshll.u32 %v2288_v17, 16 }
  0xd5   : > { %vm1486_vm11 = vcmp.gt.f32.partialorder %v1452_v23, 0.0  ;;  %v1520_v29 = vmul.f32 0.2, %v1452_v23 }
  0xd6   : > { %v1111_v32 = vpop.f32.mrf.mxu2 }
  0xd7   : > { %v1554_v34 = vsel %vm1486_vm11, %v1452_v23, %v1520_v29  ;;  %v1186_v35 = vadd.f32 %v1111_v32, %v693_v30  ;;  %v559_v37 = vpop.f32.mrf.mxu0  ;;  %v697_v40 = vpop.f32.mrf.mxu1 }
  0xd8   : > { %v1588_v39 = vpack.c.bf16 %v1554_v34, %v1554_v34  ;;  %1930 = vmatmul.msk.bf16.gmra.mxu3 %vm474_vm1, %v1247_v31  ;;  %v696_v43 = vadd.f32 %v695_v18, %v559_v37  ;;  %v2291_v18 = vld [vmem:[%s2068_s9 + $0x80] sm:$0xff]  ;;  %v451_v37 = vrot.slane %v449_v25, 1 }
  0xd9   : > { %v1416_v41 = vadd.f32 %v1341_v24, %v1186_v35  ;;  %v445_v24 = vshrl.u32 %v2263_v45, 16  ;;  %v1006_v29 = vshll.u32 %v2291_v18, 16  ;;  %v1250_v31 = vrot.slane %v2291_v18, 1 }
  0xda   : > { %1623 = vst.msk [vmem:[%s2177_s17 + $0x18] sm:$0xf] %vm1616_vm5, %v1588_v39  ;;  %1799 = vmatmul.msk.bf16.gmra.mxu0 %vm474_vm1, %v436_v38  ;;  %v1004_v38 = vor.u32 %v1002_v28, %v1000_v2 }
  0xdb   : > { %v1453_v42 = vadd.f32 %v2165_v33, %v1416_v41  ;;  %1907 = vmatmul.msk.bf16.gmra.mxu2 %vm474_vm1, %v993_v36  ;;  %v1344_v44 = vpop.f32.mrf.mxu3  ;;  %v447_v35 = vor.u32 %v445_v24, %v443_v0  ;;  %v1008_v39 = vrot.slane %v1006_v29, 1  ;;  %v1251_v41 = vsel %vm1220_vm2, %v1248_v59, %v1250_v31 }
  0xdd   : > { %vm1487_vm12 = vcmp.gt.f32.partialorder %v1453_v42, 0.0  ;;  %v1521_v47 = vmul.f32 0.2, %v1453_v42 }
  0xde   : > { %v1114_v48 = vpop.f32.mrf.mxu2 }
  0xdf   : > { %v1555_v49 = vsel %vm1487_vm12, %v1453_v42, %v1521_v47  ;;  %v1187_v50 = vadd.f32 %v1114_v48, %v696_v43  ;;  %v561_v51 = vpop.f32.mrf.mxu0  ;;  %v700_v55 = vpop.f32.mrf.mxu1  ;;  %v452_v47 = vsel %vm328_vm3, %v447_v35, %v451_v37 }
  0xe0   : > { %v1589_v54 = vpack.c.bf16 %v1555_v49, %v1555_v49  ;;  %v698_v3 = vadd.f32 %v697_v40, %v561_v51 }
  0xe1   : > { %v1417_v58 = vadd.f32 %v1344_v44, %v1187_v50 }
  0xe2   : > { %1624 = vst.msk [vmem:[%s2177_s17 + $0x1c] sm:$0xf] %vm1616_vm5, %v1589_v54  ;;  %1821 = vmatmul.msk.bf16.gmra.mxu1 %vm474_vm1, %v2238_v8  ;;  %v1001_v8 = vsel %vm328_vm3, %v996_v1, %v1000_v2  ;;  %v2313_v54 = vld [vmem:[%s2068_s9 + $0x80] sm:$0xff]  ;;  %v1010_v2 = vshrl.u32 %v2291_v18, 16 }
  0xe3   : > { %v1454_v60 = vadd.f32 %v2165_v33, %v1417_v58  ;;  %v1346_v61 = vpop.f32.mrf.mxu3  ;;  %v457_v62 = vshll.u32 %v2313_v54, 16 }
  0xe5   : > { %vm1488_vm13 = vcmp.gt.f32.partialorder %v1454_v60, 0.0  ;;  %v1522_v63 = vmul.f32 0.2, %v1454_v60 }
  0xe6   : > { %v1116_v5 = vpop.f32.mrf.mxu2 }
  0xe7   : > { %v1556_v6 = vsel %vm1488_vm13, %v1454_v60, %v1522_v63  ;;  %v1188_v7 = vadd.f32 %v1116_v5, %v698_v3  ;;  %v564_v9 = vpop.f32.mrf.mxu0  ;;  %v702_v12 = vpop.f32.mrf.mxu1 }
  0xe8   : > { %v1590_v11 = vpack.c.bf16 %v1556_v6, %v1556_v6  ;;  %1931 = vmatmul.msk.bf16.gmra.mxu3 %vm474_vm1, %v1249_v4  ;;  %v701_v15 = vadd.f32 %v700_v55, %v564_v9  ;;  %v2316_v55 = vld [vmem:[%s2068_s9 + $0x88] sm:$0xff]  ;;  %v459_v9 = vrot.slane %v457_v62, 1 }
  0xe9   : > { %v1418_v13 = vadd.f32 %v1346_v61, %v1188_v7  ;;  %v453_v61 = vshrl.u32 %v2288_v17, 16  ;;  %v1014_v63 = vshll.u32 %v2316_v55, 16  ;;  %v1252_v4 = vrot.slane %v2316_v55, 1 }
  0xea   : > { %1625 = vst.msk [vmem:[%s2177_s17 + $0x20] sm:$0xf] %vm1616_vm5, %v1590_v11  ;;  %1800 = vmatmul.msk.bf16.gmra.mxu0 %vm474_vm1, %v444_v10  ;;  %v1012_v10 = vor.u32 %v1010_v2, %v1008_v39 }
  0xeb   : > { %v1455_v14 = vadd.f32 %v2165_v33, %v1418_v13  ;;  %1908 = vmatmul.msk.bf16.gmra.mxu2 %vm474_vm1, %v1001_v8  ;;  %v1349_v16 = vpop.f32.mrf.mxu3  ;;  %v455_v7 = vor.u32 %v453_v61, %v451_v37  ;;  %v1016_v11 = vrot.slane %v1014_v63, 1  ;;  %v236_v8 = vld [vmem:[%s2068_s9 + $0x88] sm:$0x1] }
  0xed   : > { %vm1489_vm14 = vcmp.gt.f32.partialorder %v1455_v14, 0.0  ;;  %v1523_v19 = vmul.f32 0.2, %v1455_v14 }
  0xee   : > { %v1119_v20 = vpop.f32.mrf.mxu2 }
  0xef   : > { %v1557_v21 = vsel %vm1489_vm14, %v1455_v14, %v1523_v19  ;;  %v1189_v22 = vadd.f32 %v1119_v20, %v701_v15  ;;  %v566_v23 = vpop.f32.mrf.mxu0  ;;  %v705_v27 = vpop.f32.mrf.mxu1  ;;  %v1253_v14 = vsel %vm1220_vm2, %v1250_v31, %v1252_v4  ;;  %v794_v15 = vld [vmem:[%s2068_s9 + $0x90] sm:$0x1] }
  0xf0   : > { %v1591_v26 = vpack.c.bf16 %v1557_v21, %v1557_v21  ;;  %v703_v40 = vadd.f32 %v702_v12, %v566_v23  ;;  %v460_v21 = vsel %vm328_vm3, %v455_v7, %v459_v9  ;;  %v1017_v23 = vsel %vm328_vm3, %v1012_v10, %v1016_v11 }
  0xf1   : > { %v1419_v30 = vadd.f32 %v1349_v16, %v1189_v22  ;;  %v309_v22 = vunpack.c.l.b16 %v236_v8  ;;  %v867_v25 = vunpack.c.l.b16 %v794_v15 }
  0xf2   : > { %1626 = vst.msk [vmem:[%s2177_s17 + $0x24] sm:$0xf] %vm1616_vm5, %v1591_v26  ;;  %1822 = vmatmul.msk.bf16.gmra.mxu1 %vm474_vm1, %v2263_v45  ;;  %v1009_v45 = vsel %vm328_vm3, %v1004_v38, %v1008_v39  ;;  %v461_v39 = vshrl.u32 %v2313_v54, 16 }
  0xf3   : > { %v1456_v32 = vadd.f32 %v2165_v33, %v1419_v30  ;;  %v1351_v34 = vpop.f32.mrf.mxu3  ;;  %v327_v30 = vpack.c.b16 %v309_v22, %v309_v22  ;;  %v885_v31 = vpack.c.b16 %v867_v25, %v867_v25 }
  0xf5   : > { %vm1490_vm15 = vcmp.gt.f32.partialorder %v1456_v32, 0.0  ;;  %v1524_v36 = vmul.f32 0.2, %v1456_v32 }
  0xf6   : > { %v1121_v42 = vpop.f32.mrf.mxu2 }
  0xf7   : > { %v1558_v43 = vsel %vm1490_vm15, %v1456_v32, %v1524_v36  ;;  %v1190_v44 = vadd.f32 %v1121_v42, %v703_v40  ;;  %v569_v46 = vpop.f32.mrf.mxu0  ;;  %v707_v49 = vpop.f32.mrf.mxu1  ;;  %v465_v36 = vshll.u32 %v327_v30, 16  ;;  %v1018_v42 = vshrl.u32 %v2316_v55, 16 }
  0xf8   : > { %v1592_v48 = vpack.c.bf16 %v1558_v43, %v1558_v43  ;;  %1932 = vmatmul.msk.bf16.gmra.mxu3 %vm474_vm1, %v1251_v41  ;;  %v706_v52 = vadd.f32 %v705_v27, %v569_v46  ;;  %v1022_v43 = vshll.u32 %v885_v31, 16  ;;  %v1254_v46 = vrot.slane %v885_v31, 1 }
  0xf9   : > { %v1420_v50 = vadd.f32 %v1351_v34, %v1190_v44 }
  0xfa   : > { %1627 = vst.msk [vmem:[%s2177_s17 + $0x28] sm:$0xf] %vm1616_vm5, %v1592_v48  ;;  %1801 = vmatmul.msk.bf16.gmra.mxu0 %vm474_vm1, %v452_v47  ;;  %v1255_v55 = vsel %vm1220_vm2, %v1252_v4, %v1254_v46 }
  0xfb   : > { %v1457_v51 = vadd.f32 %v2165_v33, %v1420_v50  ;;  %1909 = vmatmul.msk.bf16.gmra.mxu2 %vm474_vm1, %v1009_v45  ;;  %v1354_v53 = vpop.f32.mrf.mxu3  ;;  %v463_v45 = vor.u32 %v461_v39, %v459_v9  ;;  %v1020_v50 = vor.u32 %v1018_v42, %v1016_v11 }
  0xfd   : > { %vm1491_vm0 = vcmp.gt.f32.partialorder %v1457_v51, 0.0  ;;  %v1525_v56 = vmul.f32 0.2, %v1457_v51 }
  0xfe   : > { %v1124_v57 = vpop.f32.mrf.mxu2 }
  0xff   : > { %v1559_v58 = vsel %vm1491_vm0, %v1457_v51, %v1525_v56  ;;  %v1191_v59 = vadd.f32 %v1124_v57, %v706_v52  ;;  %v571_v60 = vpop.f32.mrf.mxu0  ;;  %v710_v1 = vpop.f32.mrf.mxu1  ;;  %v1024_v51 = vrot.slane %v1022_v43, 1 }
 0x100   : > { %v1593_v0 = vpack.c.bf16 %v1559_v58, %v1559_v58  ;;  %v708_v13 = vadd.f32 %v707_v49, %v571_v60  ;;  %v467_v49 = vrot.slane %v465_v36, 1 }
 0x101   : > { %v1421_v3 = vadd.f32 %v1354_v53, %v1191_v59 }
 0x102   : > { %1628 = vst.msk [vmem:[%s2177_s17 + $0x2c] sm:$0xf] %vm1616_vm5, %v1593_v0  ;;  %1823 = vmatmul.msk.bf16.gmra.mxu1 %vm474_vm1, %v2288_v17  ;;  %v468_v60 = vsel %vm328_vm3, %v463_v45, %v467_v49 }
 0x103   : > { %v1458_v5 = vadd.f32 %v2165_v33, %v1421_v3  ;;  %v1356_v6 = vpop.f32.mrf.mxu3 }
 0x105   : > { %vm1492_vm4 = vcmp.gt.f32.partialorder %v1458_v5, 0.0  ;;  %v1526_v12 = vmul.f32 0.2, %v1458_v5 }
 0x106   : > { %v1126_v16 = vpop.f32.mrf.mxu2 }
 0x107   : > { %v1560_v18 = vsel %vm1492_vm4, %v1458_v5, %v1526_v12  ;;  %v1192_v19 = vadd.f32 %v1126_v16, %v708_v13  ;;  %v574_v20 = vpop.f32.mrf.mxu0  ;;  %v712_v24 = vpop.f32.mrf.mxu1 }
 0x108   : > { %v1594_v17 = vpack.c.bf16 %v1560_v18, %v1560_v18  ;;  %1933 = vmatmul.msk.bf16.gmra.mxu3 %vm474_vm1, %v1253_v14  ;;  %v711_v28 = vadd.f32 %v710_v1, %v574_v20 }
 0x109   : > { %v1422_v26 = vadd.f32 %v1356_v6, %v1192_v19 }
 0x10a   : > { %1629 = vst.msk [vmem:[%s2177_s17 + $0x30] sm:$0xf] %vm1616_vm5, %v1594_v17  ;;  %1802 = vmatmul.msk.bf16.gmra.mxu0 %vm474_vm1, %v460_v21 }
 0x10b   : > { %v1459_v27 = vadd.f32 %v2165_v33, %v1422_v26  ;;  %1910 = vmatmul.msk.bf16.gmra.mxu2 %vm474_vm1, %v1017_v23  ;;  %v1359_v29 = vpop.f32.mrf.mxu3 }
 0x10d   : > { %vm1493_vm6 = vcmp.gt.f32.partialorder %v1459_v27, 0.0  ;;  %v1527_v32 = vmul.f32 0.2, %v1459_v27 }
 0x10e   : > { %v1129_v34 = vpop.f32.mrf.mxu2 }
 0x10f   : > { %v1561_v35 = vsel %vm1493_vm6, %v1459_v27, %v1527_v32  ;;  %v1193_v37 = vadd.f32 %v1129_v34, %v711_v28  ;;  %v576_v38 = vpop.f32.mrf.mxu0  ;;  %v715_v41 = vpop.f32.mrf.mxu1 }
 0x110   : > { %v1595_v40 = vpack.c.bf16 %v1561_v35, %v1561_v35  ;;  %v713_v53 = vadd.f32 %v712_v24, %v576_v38 }
 0x111   : > { %v1423_v44 = vadd.f32 %v1359_v29, %v1193_v37 }
 0x112   : > { %1630 = vst.msk [vmem:[%s2177_s17 + $0x34] sm:$0xf] %vm1616_vm5, %v1595_v40  ;;  %1824 = vmatmul.msk.bf16.gmra.mxu1 %vm474_vm1, %v2313_v54  ;;  %v1025_v54 = vsel %vm328_vm3, %v1020_v50, %v1024_v51 }
 0x113   : > { %v1460_v47 = vadd.f32 %v2165_v33, %v1423_v44  ;;  %v1361_v48 = vpop.f32.mrf.mxu3 }
 0x115   : > { %vm1494_vm7 = vcmp.gt.f32.partialorder %v1460_v47, 0.0  ;;  %v1528_v52 = vmul.f32 0.2, %v1460_v47 }
 0x116   : > { %v1131_v56 = vpop.f32.mrf.mxu2 }
 0x117   : > { %v1562_v57 = vsel %vm1494_vm7, %v1460_v47, %v1528_v52  ;;  %v1194_v58 = vadd.f32 %v1131_v56, %v713_v53  ;;  %v579_v59 = vpop.f32.mrf.mxu0  ;;  %v717_v62 = vpop.f32.mrf.mxu1 }
 0x118   : > { %v1596_v61 = vpack.c.bf16 %v1562_v57, %v1562_v57  ;;  %1934 = vmatmul.msk.bf16.gmra.mxu3 %vm474_vm1, %v1255_v55  ;;  %v716_v2 = vadd.f32 %v715_v41, %v579_v59 }
 0x119   : > { %v1424_v0 = vadd.f32 %v1361_v48, %v1194_v58 }
 0x11a   : > { %1631 = vst.msk [vmem:[%s2177_s17 + $0x38] sm:$0xf] %vm1616_vm5, %v1596_v61  ;;  %1803 = vmatmul.msk.bf16.gmra.mxu0 %vm474_vm1, %v468_v60 }
 0x11b   : > { %v1461_v1 = vadd.f32 %v2165_v33, %v1424_v0  ;;  %1911 = vmatmul.msk.bf16.gmra.mxu2 %vm474_vm1, %v1025_v54  ;;  %v1364_v63 = vpop.f32.mrf.mxu3 }
 0x11d   : > { %vm1495_vm2 = vcmp.gt.f32.partialorder %v1461_v1, 0.0  ;;  %v1529_v3 = vmul.f32 0.2, %v1461_v1 }
 0x11e   : > { %v1134_v4 = vpop.f32.mrf.mxu2 }
 0x11f   : > { %v1563_v5 = vsel %vm1495_vm2, %v1461_v1, %v1529_v3  ;;  %v1195_v6 = vadd.f32 %v1134_v4, %v716_v2  ;;  %v581_v7 = vpop.f32.mrf.mxu0  ;;  %v720_v10 = vpop.f32.mrf.mxu1 }
 0x120   : > { %v1597_v9 = vpack.c.bf16 %v1563_v5, %v1563_v5  ;;  %v718_v14 = vadd.f32 %v717_v62, %v581_v7 }
 0x121   : > { %v1425_v11 = vadd.f32 %v1364_v63, %v1195_v6 }
 0x122   : > { %1632 = vst.msk [vmem:[%s2177_s17 + $0x3c] sm:$0xf] %vm1616_vm5, %v1597_v9 }
 0x123   : > { %v1462_v8 = vadd.f32 %v2165_v33, %v1425_v11  ;;  %v1366_v12 = vpop.f32.mrf.mxu3 }
 0x125   : > { %vm1496_vm3 = vcmp.gt.f32.partialorder %v1462_v8, 0.0  ;;  %v1530_v13 = vmul.f32 0.2, %v1462_v8 }
 0x126   : > { %v1136_v15 = vpop.f32.mrf.mxu2 }
 0x127   : > { %v1564_v16 = vsel %vm1496_vm3, %v1462_v8, %v1530_v13  ;;  %v1196_v18 = vadd.f32 %v1136_v15, %v718_v14  ;;  %v584_v19 = vpop.f32.mrf.mxu0  ;;  %v722_v21 = vpop.f32.mrf.mxu1 }
 0x128   : > { %v1598_v20 = vpack.c.bf16 %v1564_v16, %v1564_v16  ;;  %v721_v23 = vadd.f32 %v720_v10, %v584_v19 }
 0x129   : > { %v1426_v22 = vadd.f32 %v1366_v12, %v1196_v18 }
 0x12a   : > { %1633 = vst.msk [vmem:[%s2177_s17 + $0x40] sm:$0xf] %vm1616_vm5, %v1598_v20 }
 0x12b   : > { %v1463_v17 = vadd.f32 %v2165_v33, %v1426_v22  ;;  %v1369_v24 = vpop.f32.mrf.mxu3 }
 0x12d   : > { %vm1497_vm1 = vcmp.gt.f32.partialorder %v1463_v17, 0.0  ;;  %v1531_v25 = vmul.f32 0.2, %v1463_v17 }
 0x12e   : > { %v1139_v26 = vpop.f32.mrf.mxu2 }
 0x12f   : > { %v1565_v27 = vsel %vm1497_vm1, %v1463_v17, %v1531_v25  ;;  %v1197_v28 = vadd.f32 %v1139_v26, %v721_v23  ;;  %v586_v29 = vpop.f32.mrf.mxu0  ;;  %v725_v31 = vpop.f32.mrf.mxu1 }
 0x130   : > { %v1599_v30 = vpack.c.bf16 %v1565_v27, %v1565_v27  ;;  %v723_v38 = vadd.f32 %v722_v21, %v586_v29 }
 0x131   : > { %v1427_v32 = vadd.f32 %v1369_v24, %v1197_v28 }
 0x132   : > { %1634 = vst.msk [vmem:[%s2177_s17 + $0x44] sm:$0xf] %vm1616_vm5, %v1599_v30 }
 0x133   : > { %v1464_v34 = vadd.f32 %v2165_v33, %v1427_v32  ;;  %v1371_v35 = vpop.f32.mrf.mxu3 }
 0x135   : > { %vm1498_vm8 = vcmp.gt.f32.partialorder %v1464_v34, 0.0  ;;  %v1532_v37 = vmul.f32 0.2, %v1464_v34 }
 0x136   : > { %v1141_v39 = vpop.f32.mrf.mxu2 }
 0x137   : > { %v1566_v36 = vsel %vm1498_vm8, %v1464_v34, %v1532_v37  ;;  %v1198_v40 = vadd.f32 %v1141_v39, %v723_v38  ;;  %v589_v41 = vpop.f32.mrf.mxu0  ;;  %v727_v43 = vpop.f32.mrf.mxu1 }
 0x138   : > { %v1600_v42 = vpack.c.bf16 %v1566_v36, %v1566_v36  ;;  %v726_v47 = vadd.f32 %v725_v31, %v589_v41 }
 0x139   : > { %v1428_v44 = vadd.f32 %v1371_v35, %v1198_v40 }
 0x13a   : > { %1635 = vst.msk [vmem:[%s2177_s17 + $0x48] sm:$0xf] %vm1616_vm5, %v1600_v42 }
 0x13b   : > { %v1465_v46 = vadd.f32 %v2165_v33, %v1428_v44  ;;  %v1374_v48 = vpop.f32.mrf.mxu3 }
 0x13d   : > { %vm1499_vm9 = vcmp.gt.f32.partialorder %v1465_v46, 0.0  ;;  %v1533_v45 = vmul.f32 0.2, %v1465_v46 }
 0x13e   : > { %v1144_v49 = vpop.f32.mrf.mxu2 }
 0x13f   : > { %v1567_v50 = vsel %vm1499_vm9, %v1465_v46, %v1533_v45  ;;  %v1199_v51 = vadd.f32 %v1144_v49, %v726_v47  ;;  %v591_v52 = vpop.f32.mrf.mxu0  ;;  %v730_v55 = vpop.f32.mrf.mxu1 }
 0x140   : > { %v1601_v53 = vpack.c.bf16 %v1567_v50, %v1567_v50  ;;  %v728_v60 = vadd.f32 %v727_v43, %v591_v52 }
 0x141   : > { %v1429_v56 = vadd.f32 %v1374_v48, %v1199_v51 }
 0x142   : > { %1636 = vst.msk [vmem:[%s2177_s17 + $0x4c] sm:$0xf] %vm1616_vm5, %v1601_v53 }
 0x143   : > { %v1466_v57 = vadd.f32 %v2165_v33, %v1429_v56  ;;  %v1376_v58 = vpop.f32.mrf.mxu3 }
 0x145   : > { %vm1500_vm10 = vcmp.gt.f32.partialorder %v1466_v57, 0.0  ;;  %v1534_v59 = vmul.f32 0.2, %v1466_v57 }
 0x146   : > { %v1146_v61 = vpop.f32.mrf.mxu2 }
 0x147   : > { %v1568_v54 = vsel %vm1500_vm10, %v1466_v57, %v1534_v59  ;;  %v1200_v62 = vadd.f32 %v1146_v61, %v728_v60  ;;  %v594_v0 = vpop.f32.mrf.mxu0  ;;  %v732_v2 = vpop.f32.mrf.mxu1 }
 0x148   : > { %v1602_v1 = vpack.c.bf16 %v1568_v54, %v1568_v54  ;;  %v731_v4 = vadd.f32 %v730_v55, %v594_v0 }
 0x149   : > { %v1430_v63 = vadd.f32 %v1376_v58, %v1200_v62 }
 0x14a   : > { %1637 = vst.msk [vmem:[%s2177_s17 + $0x50] sm:$0xf] %vm1616_vm5, %v1602_v1 }
 0x14b   : > { %v1467_v3 = vadd.f32 %v2165_v33, %v1430_v63  ;;  %v1379_v5 = vpop.f32.mrf.mxu3 }
 0x14d   : > { %vm1501_vm11 = vcmp.gt.f32.partialorder %v1467_v3, 0.0  ;;  %v1535_v6 = vmul.f32 0.2, %v1467_v3 }
 0x14e   : > { %v1149_v7 = vpop.f32.mrf.mxu2 }
 0x14f   : > { %v1569_v9 = vsel %vm1501_vm11, %v1467_v3, %v1535_v6  ;;  %v1201_v10 = vadd.f32 %v1149_v7, %v731_v4  ;;  %v596_v11 = vpop.f32.mrf.mxu0  ;;  %v735_v12 = vpop.f32.mrf.mxu1 }
 0x150   : > { %v1603_v8 = vpack.c.bf16 %v1569_v9, %v1569_v9  ;;  %v733_v18 = vadd.f32 %v732_v2, %v596_v11 }
 0x151   : > { %v1431_v13 = vadd.f32 %v1379_v5, %v1201_v10 }
 0x152   : > { %1638 = vst.msk [vmem:[%s2177_s17 + $0x54] sm:$0xf] %vm1616_vm5, %v1603_v8 }
 0x153   : > { %v1468_v14 = vadd.f32 %v2165_v33, %v1431_v13  ;;  %v1381_v15 = vpop.f32.mrf.mxu3 }
 0x155   : > { %vm1502_vm12 = vcmp.gt.f32.partialorder %v1468_v14, 0.0  ;;  %v1536_v16 = vmul.f32 0.2, %v1468_v14 }
 0x156   : > { %v1151_v19 = vpop.f32.mrf.mxu2 }
 0x157   : > { %v1570_v20 = vsel %vm1502_vm12, %v1468_v14, %v1536_v16  ;;  %v1202_v21 = vadd.f32 %v1151_v19, %v733_v18  ;;  %v599_v22 = vpop.f32.mrf.mxu0  ;;  %v737_v23 = vpop.f32.mrf.mxu1  ;;  %v2396_v16 = vld [vmem:[%s2421_s2] ss:$0 sm:$0xff] }
 0x158   : > { %v1604_v17 = vpack.c.bf16 %v1570_v20, %v1570_v20  ;;  %v736_v26 = vadd.f32 %v735_v12, %v599_v22 }
 0x159   : > { %v1432_v24 = vadd.f32 %v1381_v15, %v1202_v21 }
 0x15a   : > { %1639 = vst.msk [vmem:[%s2177_s17 + $0x58] sm:$0xf] %vm1616_vm5, %v1604_v17 }
 0x15b   : > { %v1469_v25 = vadd.f32 %v2165_v33, %v1432_v24  ;;  %v1384_v27 = vpop.f32.mrf.mxu3 }
 0x15d   : > { %vm1503_vm13 = vcmp.gt.f32.partialorder %v1469_v25, 0.0  ;;  %v1537_v28 = vmul.f32 0.2, %v1469_v25 }
 0x15e   : > { %v1154_v29 = vpop.f32.mrf.mxu2 }
 0x15f   : > { %v1571_v30 = vsel %vm1503_vm13, %v1469_v25, %v1537_v28  ;;  %v1203_v31 = vadd.f32 %v1154_v29, %v736_v26  ;;  %v601_v32 = vpop.f32.mrf.mxu0  ;;  %v740_v35 = vpop.f32.mrf.mxu1 }
 0x160   : > { %v1605_v34 = vpack.c.bf16 %v1571_v30, %v1571_v30  ;;  %v738_v40 = vadd.f32 %v737_v23, %v601_v32 }
 0x161   : > { %v1433_v37 = vadd.f32 %v1384_v27, %v1203_v31 }
 0x162   : > { %1640 = vst.msk [vmem:[%s2177_s17 + $0x5c] sm:$0xf] %vm1616_vm5, %v1605_v34 }
 0x163   : > { %v1470_v38 = vadd.f32 %v2165_v33, %v1433_v37  ;;  %v1386_v39 = vpop.f32.mrf.mxu3 }
 0x165   : > { %vm1504_vm14 = vcmp.gt.f32.partialorder %v1470_v38, 0.0  ;;  %v1538_v36 = vmul.f32 0.2, %v1470_v38 }
 0x166   : > { %v1156_v41 = vpop.f32.mrf.mxu2 }
 0x167   : > { %v1572_v42 = vsel %vm1504_vm14, %v1470_v38, %v1538_v36  ;;  %v1204_v43 = vadd.f32 %v1156_v41, %v738_v40  ;;  %v604_v44 = vpop.f32.mrf.mxu0  ;;  %v742_v47 = vpop.f32.mrf.mxu1 }
 0x168   : > { %v1606_v46 = vpack.c.bf16 %v1572_v42, %v1572_v42  ;;  %v741_v49 = vadd.f32 %v740_v35, %v604_v44 }
 0x169   : > { %v1434_v48 = vadd.f32 %v1386_v39, %v1204_v43 }
 0x16a   : > { %1641 = vst.msk [vmem:[%s2177_s17 + $0x60] sm:$0xf] %vm1616_vm5, %v1606_v46 }
 0x16b   : > { %v1471_v45 = vadd.f32 %v2165_v33, %v1434_v48  ;;  %v1389_v50 = vpop.f32.mrf.mxu3 }
 0x16d   : > { %vm1505_vm15 = vcmp.gt.f32.partialorder %v1471_v45, 0.0  ;;  %v1539_v51 = vmul.f32 0.2, %v1471_v45 }
 0x16e   : > { %v1159_v52 = vpop.f32.mrf.mxu2 }
 0x16f   : > { %v1573_v53 = vsel %vm1505_vm15, %v1471_v45, %v1539_v51  ;;  %v1205_v55 = vadd.f32 %v1159_v52, %v741_v49  ;;  %v606_v56 = vpop.f32.mrf.mxu0  ;;  %v745_v59 = vpop.f32.mrf.mxu1 }
 0x170   : > { %v1607_v57 = vpack.c.bf16 %v1573_v53, %v1573_v53  ;;  %v743_v62 = vadd.f32 %v742_v47, %v606_v56 }
 0x171   : > { %v1435_v58 = vadd.f32 %v1389_v50, %v1205_v55 }
 0x172   : > { %1642 = vst.msk [vmem:[%s2177_s17 + $0x64] sm:$0xf] %vm1616_vm5, %v1607_v57 }
 0x173   : > { %v1472_v60 = vadd.f32 %v2165_v33, %v1435_v58  ;;  %v1391_v61 = vpop.f32.mrf.mxu3 }
 0x175   : > { %vm1506_vm0 = vcmp.gt.f32.partialorder %v1472_v60, 0.0  ;;  %v1540_v54 = vmul.f32 0.2, %v1472_v60 }
 0x176   : > { %v1161_v0 = vpop.f32.mrf.mxu2 }
 0x177   : > { %v1574_v1 = vsel %vm1506_vm0, %v1472_v60, %v1540_v54  ;;  %v1206_v2 = vadd.f32 %v1161_v0, %v743_v62  ;;  %v609_v63 = vpop.f32.mrf.mxu0  ;;  %v747_v9 = vpop.f32.mrf.mxu1 }
 0x178   : > { %v1608_v3 = vpack.c.bf16 %v1574_v1, %v1574_v1  ;;  %v746_v6 = vadd.f32 %v745_v59, %v609_v63 }
 0x179   : > { %v1436_v4 = vadd.f32 %v1391_v61, %v1206_v2 }
 0x17a   : > { %1643 = vst.msk [vmem:[%s2177_s17 + $0x68] sm:$0xf] %vm1616_vm5, %v1608_v3 }
 0x17b   : > { %v1473_v5 = vadd.f32 %v2165_v33, %v1436_v4  ;;  %v1394_v7 = vpop.f32.mrf.mxu3 }
 0x17d   : > { %vm1507_vm4 = vcmp.gt.f32.partialorder %v1473_v5, 0.0  ;;  %v1541_v10 = vmul.f32 0.2, %v1473_v5 }
 0x17e   : > { %v1164_v11 = vpop.f32.mrf.mxu2 }
 0x17f   : > { %v1575_v8 = vsel %vm1507_vm4, %v1473_v5, %v1541_v10  ;;  %v1207_v12 = vadd.f32 %v1164_v11, %v746_v6  ;;  %v611_v13 = vpop.f32.mrf.mxu0  ;;  %v750_v21 = vpop.f32.mrf.mxu1 }
 0x180   : > { %v1609_v14 = vpack.c.bf16 %v1575_v8, %v1575_v8  ;;  %v748_v20 = vadd.f32 %v747_v9, %v611_v13 }
 0x181   : > { %v1437_v15 = vadd.f32 %v1394_v7, %v1207_v12 }
 0x182   : > { %1644 = vst.msk [vmem:[%s2177_s17 + $0x6c] sm:$0xf] %vm1616_vm5, %v1609_v14 }
 0x183   : > { %v1474_v33 = vadd.f32 %v2396_v16, %v1437_v15  ;;  %v1396_v18 = vpop.f32.mrf.mxu3 }
 0x185   : > { %vm1508_vm6 = vcmp.gt.f32.partialorder %v1474_v33, 0.0  ;;  %v1542_v19 = vmul.f32 0.2, %v1474_v33 }
 0x186   : > { %v1166_v22 = vpop.f32.mrf.mxu2 }
 0x187   : > { %v1576_v17 = vsel %vm1508_vm6, %v1474_v33, %v1542_v19  ;;  %v1208_v23 = vadd.f32 %v1166_v22, %v748_v20  ;;  %v614_v24 = vpop.f32.mrf.mxu0  ;;  %v752_v38 = vpop.f32.mrf.mxu1 }
 0x188   : > { %v1610_v25 = vpack.c.bf16 %v1576_v17, %v1576_v17  ;;  %v751_v28 = vadd.f32 %v750_v21, %v614_v24 }
 0x189   : > { %v1438_v26 = vadd.f32 %v1396_v18, %v1208_v23 }
 0x18a   : > { %1645 = vst.msk [vmem:[%s2177_s17 + $0x70] sm:$0xf] %vm1616_vm5, %v1610_v25 }
 0x18b   : > { %v1475_v27 = vadd.f32 %v2396_v16, %v1438_v26  ;;  %v1399_v29 = vpop.f32.mrf.mxu3 }
 0x18d   : > { %vm1509_vm7 = vcmp.gt.f32.partialorder %v1475_v27, 0.0  ;;  %v1543_v30 = vmul.f32 0.2, %v1475_v27 }
 0x18e   : > { %v1169_v31 = vpop.f32.mrf.mxu2 }
 0x18f   : > { %v1577_v32 = vsel %vm1509_vm7, %v1475_v27, %v1543_v30  ;;  %v1209_v34 = vadd.f32 %v1169_v31, %v751_v28  ;;  %v616_v35 = vpop.f32.mrf.mxu0  ;;  %v755_v49 = vpop.f32.mrf.mxu1 }
 0x190   : > { %v1611_v37 = vpack.c.bf16 %v1577_v32, %v1577_v32  ;;  %v753_v42 = vadd.f32 %v752_v38, %v616_v35 }
 0x191   : > { %v1439_v39 = vadd.f32 %v1399_v29, %v1209_v34 }
 0x192   : > { %1646 = vst.msk [vmem:[%s2177_s17 + $0x74] sm:$0xf] %vm1616_vm5, %v1611_v37 }
 0x193   : > { %v1476_v36 = vadd.f32 %v2396_v16, %v1439_v39  ;;  %v1401_v40 = vpop.f32.mrf.mxu3 }
 0x195   : > { %vm1510_vm2 = vcmp.gt.f32.partialorder %v1476_v36, 0.0  ;;  %v1544_v41 = vmul.f32 0.2, %v1476_v36 }
 0x196   : > { %v1171_v43 = vpop.f32.mrf.mxu2 }
 0x197   : > { %v1578_v44 = vsel %vm1510_vm2, %v1476_v36, %v1544_v41  ;;  %v1210_v46 = vadd.f32 %v1171_v43, %v753_v42  ;;  %v619_v48 = vpop.f32.mrf.mxu0  ;;  %v757_v54 = vpop.f32.mrf.mxu1 }
 0x198   : > { %v1612_v47 = vpack.c.bf16 %v1578_v44, %v1578_v44  ;;  %v756_v51 = vadd.f32 %v755_v49, %v619_v48 }
 0x199   : > { %v1440_v45 = vadd.f32 %v1401_v40, %v1210_v46 }
 0x19a   : > { %1647 = vst.msk [vmem:[%s2177_s17 + $0x78] sm:$0xf] %vm1616_vm5, %v1612_v47 }
 0x19b   : > { %v1477_v50 = vadd.f32 %v2396_v16, %v1440_v45  ;;  %v1404_v53 = vpop.f32.mrf.mxu3 }
 0x19d   : > { %vm1511_vm3 = vcmp.gt.f32.partialorder %v1477_v50, 0.0  ;;  %v1545_v52 = vmul.f32 0.2, %v1477_v50 }
 0x19e   : > { %v1174_v55 = vpop.f32.mrf.mxu2 }
 0x19f   : > { %v1579_v56 = vsel %vm1511_vm3, %v1477_v50, %v1545_v52  ;;  %v1211_v57 = vadd.f32 %v1174_v55, %v756_v51  ;;  %v621_v60 = vpop.f32.mrf.mxu0 }
 0x1a0   : > { %v1613_v58 = vpack.c.bf16 %v1579_v56, %v1579_v56  ;;  %v758_v0 = vadd.f32 %v757_v54, %v621_v60 }
 0x1a1   : > { %v1441_v59 = vadd.f32 %v1404_v53, %v1211_v57 }
 0x1a2   : > { %1648 = vst.msk [vmem:[%s2177_s17 + $0x7c] sm:$0xf] %vm1616_vm5, %v1613_v58 }
 0x1a3   : > { %v1478_v61 = vadd.f32 %v2396_v16, %v1441_v59  ;;  %v1406_v4 = vpop.f32.mrf.mxu3 }
 0x1a5   : > { %vm1512_vm1 = vcmp.gt.f32.partialorder %v1478_v61, 0.0  ;;  %v1546_v62 = vmul.f32 0.2, %v1478_v61 }
 0x1a6   : > { %v1176_v1 = vpop.f32.mrf.mxu2 }
 0x1a7   : > { %v1580_v2 = vsel %vm1512_vm1, %v1478_v61, %v1546_v62  ;;  %v1212_v63 = vadd.f32 %v1176_v1, %v758_v0 }
 0x1a8   : > { %v1614_v3 = vpack.c.bf16 %v1580_v2, %v1580_v2 }
 0x1a9   : > { %v1442_v5 = vadd.f32 %v1406_v4, %v1212_v63 }
 0x1aa   : > { %1649 = vst.msk [vmem:[%s2177_s17 + $0x80] sm:$0xf] %vm1616_vm5, %v1614_v3 }
 0x1ab   : > { %v1479_v6 = vadd.f32 %v2396_v16, %v1442_v5 }
 0x1ad   : > { %vm1513_vm8 = vcmp.gt.f32.partialorder %v1479_v6, 0.0  ;;  %v1547_v7 = vmul.f32 0.2, %v1479_v6 }
 0x1af   : > { %v1581_v9 = vsel %vm1513_vm8, %v1479_v6, %v1547_v7 }
 0x1b0   : > { %v1615_v10 = vpack.c.bf16 %v1581_v9, %v1581_v9 }
 0x1b2   : > { %1650 = vst.msk [vmem:[%s2177_s17 + $0x84] sm:$0xf] %vm1616_vm5, %v1615_v10 }
 0x1b3 PF: > { %s14_s15 = sadd.s32 1, %s2000_s15  }
 0x1b4   : > { %p11_p4 = scmp.ge.s32.totalorder %s14_s15, 4  }
 0x1b6   :  { %13 = sbr.rel (!%p11_p4) target bundleno = 1 (0x1), region = 69 }

// kernel: discriminator_forward.6
= control target key start
LH: loop header
LB: loop body
LE: loop exit
PB: predicated region body
PF: predicated region fallthrough
CT: control target
= control target key end

     0   :  { %s1085_s15 = smov 0   ;;  %s1244_s0 = inlined_call_operand.vmem [shape: bf16[2,88,32], index: 0, kind: input, shape index: {}]   ;;  %s1245_s1 = inlined_call_operand.vmem [shape: bf16[4,32,16], index: 1, kind: input, shape index: {}]   ;;  %s1246_s2 = inlined_call_operand.vmem [shape: f32[1,16], index: 2, kind: input, shape index: {}]   ;;  %s1247_s3 = inlined_call_operand.vmem [shape: f32[72,1], index: 3, kind: input, shape index: {}]   ;;  %s1248_s4 = inlined_call_operand.vmem [shape: bf16[2,72,16], index: 4, kind: output, shape index: {}]  }
   0x1 LB: > { %s911_s16 = sadd.s32 4294967295, %s1057_s15   ;;  %p915_p0 = scmp.ge.s32.totalorder %s1057_s15, 1  ;;  %s1057_s15 = sphi %s1085_s15, %s14_s15  }
   0x2   : > { %p162_p1 = scmp.lt.s32.totalorder %s1057_s15, 3 }
   0x4   : > { %p163_p2 = pnand %p915_p0, %p162_p1 }
   0x5   : > { %p188_p3 = scmp.lt.s32.totalorder (!%p163_p2), %s911_s16, 1 }
   0x6   : > { %166 = sbr.rel (%p163_p2) target bundleno = 288 (0x120), region = 36 }
   0xb   : > { %v1021_v0 = vld [vmem:[%s1245_s1 + $0x8] sm:$0xff]  ;;  %v1031_v1 = vld [vmem:[%s1245_s1 + $0x38] sm:$0xff]  ;;  %v1020_v4 = vld [vmem:[%s1245_s1] sm:$0xff]  ;;  %s1250_s16 = smov (!%p188_p3, %s911_s16), 1  ;;  %v1059_v9 = vmov 0   ;;  %vm295_vm0 = vcmask 261120  }
   0xc   : > { %v1023_v2 = vld [vmem:[%s1245_s1 + $0x18] sm:$0xff]  ;;  %v1029_v3 = vld [vmem:[%s1245_s1 + $0x28] sm:$0xff]  ;;  %374 = vmatpush.bf16.msra.mxu1 %v1021_v0  ;;  %601 = vmatpush.bf16.msra.mxu3 %v1031_v1  ;;  %v1030_v5 = vld [vmem:[%s1245_s1 + $0x30] sm:$0xff]  ;;  %s1032_s8 = smul.u32 44, %s1250_s16  ;;  %vm558_vm1 = vcmask 1046528   ;;  %vm700_vm3 = vcmask 130048  }
   0xd   : > { %317 = vmatpush.bf16.msra.mxu0 %v1023_v2  ;;  %513 = vmatpush.bf16.msra.mxu2 %v1029_v3  ;;  %v1022_v6 = vld [vmem:[%s1245_s1 + $0x10] sm:$0xff]  ;;  %v1028_v7 = vld [vmem:[%s1245_s1 + $0x20] sm:$0xff]  ;;  %vm243_vm2 = vsmask.f32 7424  ;;  %v638_v33 = vld [vmem:[%s1247_s3 + $0x8] sm:$0xff]  ;;  %vm846_vm7 = vcmask 125952  }
   0xe   : > { %v637_v8 = vld [vmem:[%s1247_s3] sm:$0xff]  ;;  %1043 = vset.pattern.permute.xlu0 %v1059_v9  ;;  %1044 = vset.pattern.permute.xlu1 %v1059_v9  ;;  %s1126_s11 = scalar_lea.vmem %s1244_s0, %s1032_s8  ;;  %v639_v36 = vld [vmem:[%s1247_s3 + $0x10] sm:$0xff]  ;;  %v640_v50 = vld [vmem:[%s1247_s3 + $0x18] sm:$0xff]  ;;  %s1033_s29 = smul.u32 36, %s1250_s16 }
   0xf   : > { %648 = vperm.xlu0 %1043, %v637_v8   ;;  %1045 = vset.pattern.permute.xlu2 %v1059_v9  ;;  %v1016_v10 = vld [vmem:[%s1126_s11] sm:$0xff]  ;;  %v1048_v12 = vld [vmem:[%s1126_s11 + $0x4] sm:$0xf0]  ;;  %v1024_v13 = vld [vmem:[%s1126_s11 + $0xc] sm:$0xff] }
  0x10   : > { %375 = vmatpush.bf16.msra.mxu1 %v1020_v4  ;;  %602 = vmatpush.bf16.msra.mxu3 %v1030_v5  ;;  %v402_v11 = vld [vmem:[%s1126_s11 + $0x4] sm:$0xff]   ;;  %v247_v16 = vshll.u32 %v1016_v10, 16  ;;  %v245_v17 = vshrl.u32 %v1016_v10, 16  ;;  %v449_v19 = vshll.u32 %v1024_v13, 16  ;;  %v560_v21 = vrot.slane %v1024_v13, 1  ;;  %v1018_v34 = vld [vmem:[%s1126_s11 + $0x10] sm:$0xff]  ;;  %s197_s5 = scalar_lea.vmem %s1248_s4, %s1033_s29 }
  0x11   : > { %318 = vmatpush.bf16.msra.mxu0 %v1022_v6  ;;  %514 = vmatpush.bf16.msra.mxu2 %v1028_v7  ;;  %v1049_v14 = vld [vmem:[%s1126_s11 + $0x4] sm:$0xe]  ;;  %v1017_v15 = vld [vmem:[%s1126_s11 + $0x8] sm:$0xff]  ;;  %v442_v24 = vshrl.u32 %v402_v11, 16  ;;  %v444_v25 = vshll.u32 %v402_v11, 16  ;;  %v1025_v37 = vld [vmem:[%s1126_s11 + $0x14] sm:$0xff] }
  0x12   : > { %v252_v18 = vshll.u32 %v1017_v15, 16  ;;  %v1050_v20 = vor.u32 %v1049_v14, %v1048_v12  ;;  %v249_v22 = vrot.slane %v247_v16, 1  ;;  %v451_v29 = vrot.slane %v449_v19, 1  ;;  %658 = vperm.xlu1 %1044, %v639_v36   ;;  %v1019_v51 = vld [vmem:[%s1126_s11 + $0x18] sm:$0xff]  ;;  %v207_v60 = vld [vmem:[%s1126_s11 + $0x20] sm:$0xf] }
  0x13   : > { %959 = vmatmul.msk.bf16.vlgmr.msra.gmra.mxu1 %vm295_vm0, %v1016_v10  ;;  %v446_v28 = vrot.slane %v444_v25, 1  ;;  %v256_v38 = vshrl.u32 %v1017_v15, 16  ;;  %v260_v39 = vshll.u32 %v1018_v34, 16  ;;  %v453_v40 = vshrl.u32 %v1024_v13, 16  ;;  %v1026_v52 = vld [vmem:[%s1126_s11 + $0x1c] sm:$0xff]  ;;  %v643_v5 = vld [vmem:[%s1247_s3 + $0x30] sm:$0xff] }
  0x14   : > { %v254_v23 = vrot.slane %v252_v18, 1  ;;  %v559_v26 = vrot.slane %v1050_v20, 1  ;;  %v250_v27 = vor.u32 %v249_v22, %v245_v17  ;;  %v457_v41 = vshll.u32 %v1025_v37, 16  ;;  %v212_v61 = vld [vmem:[%s1126_s11 + $0x24] sm:$0x1]  ;;  %v644_v9 = vld [vmem:[%s1247_s3 + $0x38] sm:$0xff] }
  0x15   : > { %v447_v32 = vor.u32 %v446_v28, %v442_v24  ;;  %v562_v42 = vrot.slane %v1025_v37, 1  ;;  %v262_v44 = vrot.slane %v260_v39, 1  ;;  %v455_v45 = vor.u32 %v453_v40, %v451_v29  ;;  %v982_v7 = vld [vmem:[%s1126_s11 + $0x24] sm:$0xf]  ;;  %v1027_v8 = vld [vmem:[%s1126_s11 + $0x24] sm:$0x10] }
  0x16   : > { %v561_v30 = vsel %vm558_vm1, %v559_v26, %v560_v21  ;;  %v255_v31 = vsel %vm243_vm2, %v250_v27, %v254_v23  ;;  %v258_v43 = vor.u32 %v256_v38, %v254_v23  ;;  %v459_v46 = vrot.slane %v457_v41, 1  ;;  %v641_v10 = vld [vmem:[%s1247_s3 + $0x20] sm:$0xff]  ;;  %v642_v19 = vld [vmem:[%s1247_s3 + $0x28] sm:$0xff] }
  0x17   : > { %1009 = vmatmul.msk.bf16.vlgmr.msra.gmra.mxu3 %vm295_vm0, %v561_v30  ;;  %946 = vmatmul.msk.bf16.vlgmr.msra.gmra.mxu0 %vm295_vm0, %v255_v31  ;;  %v452_v35 = vsel %vm243_vm2, %v447_v32, %v451_v29  ;;  %v563_v47 = vsel %vm558_vm1, %v560_v21, %v562_v42  ;;  %v264_v53 = vshrl.u32 %v1018_v34, 16  ;;  %v268_v54 = vshll.u32 %v1019_v51, 16  ;;  %v645_v25 = vld [vmem:[%s1247_s3 + $0x40] sm:$0xff] }
  0x18   : > { %653 = vperm.xlu0 %1043, %v638_v33   ;;  %992 = vmatmul.msk.bf16.vlgmr.msra.gmra.mxu2 %vm295_vm0, %v452_v35  ;;  %v263_v48 = vsel %vm243_vm2, %v258_v43, %v262_v44  ;;  %v460_v49 = vsel %vm243_vm2, %v455_v45, %v459_v46  ;;  %v461_v55 = vshrl.u32 %v1025_v37, 16  ;;  %v465_v56 = vshll.u32 %v1026_v52, 16 }
  0x19   : > { %v564_v57 = vrot.slane %v1026_v52, 1  ;;  %v266_v58 = vor.u32 %v264_v53, %v262_v44  ;;  %v270_v59 = vrot.slane %v268_v54, 1  ;;  %v236_v2 = vunpack.c.l.b16 %v207_v60  ;;  %668 = vperm.xlu2 %1045, %v641_v10  }
  0x1a   : > { %663 = vperm.xlu1 %1044, %v640_v50   ;;  %v463_v62 = vor.u32 %v461_v55, %v459_v46  ;;  %v467_v63 = vrot.slane %v465_v56, 1  ;;  %v237_v3 = vunpack.c.l.b16 %v212_v61  ;;  %v983_v11 = vor.u32 %v1027_v8, %v982_v7 }
  0x1b   : > { %v565_v0 = vsel %vm558_vm1, %v562_v42, %v564_v57  ;;  %v271_v1 = vsel %vm243_vm2, %v266_v58, %v270_v59  ;;  %v272_v12 = vshrl.u32 %v1019_v51, 16  ;;  %v469_v14 = vshrl.u32 %v1026_v52, 16 }
  0x1c   : > { %v468_v4 = vsel %vm243_vm2, %v463_v62, %v467_v63  ;;  %v242_v6 = vpack.c.b16 %v237_v3, %v236_v2  ;;  %v566_v16 = vrot.slane %v983_v11, 1  ;;  %v344_v26 = vpack.c.b16 %v236_v2, %v236_v2 }
  0x1d   : > { %v274_v17 = vor.u32 %v272_v12, %v270_v59  ;;  %v471_v20 = vor.u32 %v469_v14, %v467_v63  ;;  %v477_v28 = vshrl.u32 %v983_v11, 16 }
  0x1e   : > { %v276_v13 = vshll.u32 %v242_v6, 16  ;;  %v567_v22 = vsel %vm558_vm1, %v564_v57, %v566_v16  ;;  %v280_v27 = vshrl.u32 %v242_v6, 16 }
  0x20   : > { %678 = vperm.xlu0 %1043, %v643_v5   ;;  %v278_v18 = vrot.slane %v276_v13, 1 }
  0x21   : > { %673 = vperm.xlu2 %1045, %v642_v19  }
  0x22   : > { %683 = vperm.xlu1 %1044, %v644_v9   ;;  %v279_v23 = vsel %vm243_vm2, %v274_v17, %v278_v18  ;;  %v282_v29 = vor.u32 %v280_v27, %v278_v18 }
  0x23   : > { %960 = vmatmul.msk.bf16.gmra.mxu1 %vm295_vm0, %v1017_v15  ;;  %v473_v15 = vshll.u32 %v983_v11, 16 }
  0x25   : > { %v475_v21 = vrot.slane %v473_v15, 1 }
  0x27   : > { %1010 = vmatmul.msk.bf16.gmra.mxu3 %vm295_vm0, %v563_v47  ;;  %947 = vmatmul.msk.bf16.gmra.mxu0 %vm295_vm0, %v263_v48  ;;  %v476_v24 = vsel %vm243_vm2, %v471_v20, %v475_v21  ;;  %v479_v30 = vor.u32 %v477_v28, %v475_v21 }
  0x28   : > { %993 = vmatmul.msk.bf16.gmra.mxu2 %vm295_vm0, %v460_v49 }
  0x29   : > { %688 = vperm.xlu2 %1045, %v645_v25  }
  0x33   : > { %961 = vmatmul.msk.bf16.gmra.mxu1 %vm295_vm0, %v1018_v34 }
  0x37   : > { %1011 = vmatmul.msk.bf16.gmra.mxu3 %vm295_vm0, %v565_v0  ;;  %948 = vmatmul.msk.bf16.gmra.mxu0 %vm295_vm0, %v271_v1 }
  0x38   : > { %994 = vmatmul.msk.bf16.gmra.mxu2 %vm295_vm0, %v468_v4 }
  0x43   : > { %962 = vmatmul.msk.bf16.gmra.mxu1 %vm295_vm0, %v1019_v51 }
  0x47   : > { %1012 = vmatmul.msk.bf16.gmra.mxu3 %vm295_vm0, %v567_v22  ;;  %949 = vmatmul.msk.bf16.gmra.mxu0 %vm295_vm0, %v279_v23 }
  0x48   : > { %995 = vmatmul.msk.bf16.gmra.mxu2 %vm295_vm0, %v476_v24 }
  0x53   : > { %963 = vmatmul.msk.bf16.gmra.mxu1 %vm295_vm0, %v344_v26 }
  0x57   : > { %1013 = vmatmul.msk.bf16.gmra.mxu3 %vm295_vm0, %v566_v16  ;;  %950 = vmatmul.msk.bf16.gmra.mxu0 %vm295_vm0, %v282_v29 }
  0x58   : > { %996 = vmatmul.msk.bf16.gmra.mxu2 %vm295_vm0, %v479_v30 }
  0x73   : > { %v669_v14 = vpop.permute.xlu2 %668 }
  0x81   : > { %v649_v5 = vpop.permute.xlu0 %648 }
  0x84   : > { %v659_v7 = vpop.permute.xlu1 %658 }
  0x8a   : > { %v654_v17 = vpop.permute.xlu0 %653 }
  0x8c   : > { %v664_v22 = vpop.permute.xlu1 %663 }
  0x90   : > { %v377_v31 = vpop.f32.mrf.mxu1 }
  0x94   : > { %v320_v32 = vpop.f32.mrf.mxu0 }
  0x95   : > { %v378_v34 = vadd.f32 %v377_v31, %v320_v32  ;;  %v674_v32 = vpop.permute.xlu2 %673 }
  0x98   : > { %v379_v33 = vpop.f32.mrf.mxu1 }
  0x9a   : > { %v604_v35 = vpop.f32.mrf.mxu3 }
  0x9b   : > { %v516_v37 = vpop.f32.mrf.mxu2 }
  0x9c   : > { %v322_v36 = vpop.f32.mrf.mxu0  ;;  %v540_v39 = vadd.f32 %v516_v37, %v378_v34 }
  0x9d   : > { %v380_v42 = vadd.f32 %v379_v33, %v322_v36 }
  0x9e   : > { %v628_v40 = vadd.f32 %v604_v35, %v540_v39 }
  0xa0   : > { %v382_v38 = vpop.f32.mrf.mxu1  ;;  %758 = vst.msk [vmem:[#allocation2] sm:$0xff] %vm700_vm3, %v628_v40  ;;  %v691_v24 = vmul.f32 %v649_v5, %v628_v40 }
  0xa2   : > { %v606_v41 = vpop.f32.mrf.mxu3  ;;  %v725_v30 = vmul.f32 %v691_v24, %v628_v40  ;;  %v701_v37 = vsel %vm700_vm3, %v691_v24, 0.0 }
  0xa3   : > { %v518_v44 = vpop.f32.mrf.mxu2 }
  0xa4   : > { %v325_v43 = vpop.f32.mrf.mxu0  ;;  %v541_v46 = vadd.f32 %v518_v44, %v380_v42  ;;  %v734_v40 = vsel %vm700_vm3, %v725_v30, 0.0 }
  0xa5   : > { %v383_v48 = vadd.f32 %v382_v38, %v325_v43 }
  0xa6   : > { %v629_v47 = vadd.f32 %v606_v41, %v541_v46 }
  0xa8   : > { %v384_v45 = vpop.f32.mrf.mxu1  ;;  %759 = vst.msk [vmem:[#allocation2 + $0x8] sm:$0xff] %vm700_vm3, %v629_v47  ;;  %v692_v21 = vmul.f32 %v654_v17, %v629_v47 }
  0xaa   : > { %v609_v49 = vpop.f32.mrf.mxu3  ;;  %v726_v28 = vmul.f32 %v692_v21, %v629_v47  ;;  %v702_v33 = vsel %vm700_vm3, %v692_v21, 0.0 }
  0xab   : > { %v521_v51 = vpop.f32.mrf.mxu2  ;;  %v703_v46 = vadd.f32 %v702_v33, %v701_v37 }
  0xac   : > { %v327_v50 = vpop.f32.mrf.mxu0  ;;  %v542_v53 = vadd.f32 %v521_v51, %v383_v48  ;;  %v735_v42 = vsel %vm700_vm3, %v726_v28, 0.0  ;;  %v679_v48 = vpop.permute.xlu0 %678 }
  0xad   : > { %v385_v56 = vadd.f32 %v384_v45, %v327_v50 }
  0xae   : > { %v630_v54 = vadd.f32 %v609_v49, %v542_v53  ;;  %v736_v53 = vadd.f32 %v735_v42, %v734_v40 }
  0xb0   : > { %v387_v52 = vpop.f32.mrf.mxu1  ;;  %760 = vst.msk [vmem:[#allocation2 + $0x10] sm:$0xff] %vm700_vm3, %v630_v54  ;;  %v693_v25 = vmul.f32 %v659_v7, %v630_v54 }
  0xb2   : > { %v611_v55 = vpop.f32.mrf.mxu3  ;;  %v727_v31 = vmul.f32 %v693_v25, %v630_v54  ;;  %v704_v43 = vsel %vm700_vm3, %v693_v25, 0.0 }
  0xb3   : > { %v523_v58 = vpop.f32.mrf.mxu2  ;;  %v705_v54 = vadd.f32 %v704_v43, %v703_v46 }
  0xb4   : > { %v330_v57 = vpop.f32.mrf.mxu0  ;;  %v543_v60 = vadd.f32 %v523_v58, %v385_v56  ;;  %v737_v47 = vsel %vm700_vm3, %v727_v31, 0.0  ;;  %v684_v56 = vpop.permute.xlu1 %683 }
  0xb5   : > { %v388_v62 = vadd.f32 %v387_v52, %v330_v57 }
  0xb6   : > { %v631_v61 = vadd.f32 %v611_v55, %v543_v60 }
  0xb8   : > { %v389_v59 = vpop.f32.mrf.mxu1  ;;  %761 = vst.msk [vmem:[#allocation2 + $0x18] sm:$0xff] %vm700_vm3, %v631_v61  ;;  %v694_v27 = vmul.f32 %v664_v22, %v631_v61 }
  0xba   : > { %v614_v63 = vpop.f32.mrf.mxu3  ;;  %v728_v38 = vmul.f32 %v694_v27, %v631_v61  ;;  %v706_v49 = vsel %vm700_vm3, %v694_v27, 0.0 }
  0xbb   : > { %v526_v1 = vpop.f32.mrf.mxu2 }
  0xbc   : > { %v332_v0 = vpop.f32.mrf.mxu0  ;;  %v544_v3 = vadd.f32 %v526_v1, %v388_v62  ;;  %v739_v55 = vsel %vm700_vm3, %v728_v38, 0.0  ;;  %v738_v62 = vadd.f32 %v737_v47, %v736_v53  ;;  %v783_v53 = vld [vmem:[#allocation2] sm:$0xff] }
  0xbd   : > { %v390_v8 = vadd.f32 %v389_v59, %v332_v0 }
  0xbe   : > { %v632_v4 = vadd.f32 %v614_v63, %v544_v3  ;;  %v707_v63 = vadd.f32 %v706_v49, %v705_v54 }
  0xc0   : > { %v392_v2 = vpop.f32.mrf.mxu1  ;;  %762 = vst.msk [vmem:[#allocation2 + $0x20] sm:$0xff] %vm700_vm3, %v632_v4  ;;  %v695_v34 = vmul.f32 %v669_v14, %v632_v4 }
  0xc2   : > { %v616_v6 = vpop.f32.mrf.mxu3  ;;  %v729_v50 = vmul.f32 %v695_v34, %v632_v4  ;;  %v708_v57 = vsel %vm700_vm3, %v695_v34, 0.0  ;;  %v740_v4 = vadd.f32 %v739_v55, %v738_v62  ;;  %v784_v55 = vld [vmem:[#allocation2 + $0x8] sm:$0xff] }
  0xc3   : > { %v528_v10 = vpop.f32.mrf.mxu2  ;;  %v709_v5 = vadd.f32 %v708_v57, %v707_v63  ;;  %v786_v57 = vld [vmem:[#allocation2 + $0x18] sm:$0xff] }
  0xc4   : > { %v335_v9 = vpop.f32.mrf.mxu0  ;;  %v545_v12 = vadd.f32 %v528_v10, %v390_v8  ;;  %v741_v0 = vsel %vm700_vm3, %v729_v50, 0.0 }
  0xc5   : > { %v393_v15 = vadd.f32 %v392_v2, %v335_v9 }
  0xc6   : > { %v633_v13 = vadd.f32 %v616_v6, %v545_v12 }
  0xc8   : > { %v394_v11 = vpop.f32.mrf.mxu1  ;;  %763 = vst.msk [vmem:[#allocation2 + $0x28] sm:$0xff] %vm700_vm3, %v633_v13  ;;  %v696_v44 = vmul.f32 %v674_v32, %v633_v13 }
  0xca   : > { %v619_v16 = vpop.f32.mrf.mxu3  ;;  %v730_v58 = vmul.f32 %v696_v44, %v633_v13  ;;  %v710_v1 = vsel %vm700_vm3, %v696_v44, 0.0 }
  0xcb   : > { %v531_v19 = vpop.f32.mrf.mxu2  ;;  %v711_v12 = vadd.f32 %v710_v1, %v709_v5 }
  0xcc   : > { %v337_v18 = vpop.f32.mrf.mxu0  ;;  %v546_v23 = vadd.f32 %v531_v19, %v393_v15  ;;  %v743_v7 = vsel %vm700_vm3, %v730_v58, 0.0  ;;  %v787_v58 = vld [vmem:[#allocation2 + $0x20] sm:$0xff] }
  0xcd   : > { %v395_v35 = vadd.f32 %v394_v11, %v337_v18  ;;  %v742_v11 = vadd.f32 %v741_v0, %v740_v4  ;;  %v689_v18 = vpop.permute.xlu2 %688 }
  0xce   : > { %v634_v26 = vadd.f32 %v619_v16, %v546_v23 }
  0xcf   : > { %v744_v16 = vadd.f32 %v743_v7, %v742_v11 }
  0xd0   : > { %v397_v20 = vpop.f32.mrf.mxu1  ;;  %764 = vst.msk [vmem:[#allocation2 + $0x30] sm:$0xff] %vm700_vm3, %v634_v26  ;;  %v697_v51 = vmul.f32 %v679_v48, %v634_v26 }
  0xd2   : > { %v621_v29 = vpop.f32.mrf.mxu3  ;;  %v731_v2 = vmul.f32 %v697_v51, %v634_v26  ;;  %v712_v8 = vsel %vm700_vm3, %v697_v51, 0.0 }
  0xd3   : > { %v533_v39 = vpop.f32.mrf.mxu2  ;;  %v713_v17 = vadd.f32 %v712_v8, %v711_v12 }
  0xd4   : > { %v340_v36 = vpop.f32.mrf.mxu0  ;;  %v547_v45 = vadd.f32 %v533_v39, %v395_v35  ;;  %v745_v13 = vsel %vm700_vm3, %v731_v2, 0.0 }
  0xd5   : > { %v398_v59 = vadd.f32 %v397_v20, %v340_v36  ;;  %v746_v22 = vadd.f32 %v745_v13, %v744_v16 }
  0xd6   : > { %v635_v52 = vadd.f32 %v621_v29, %v547_v45 }
  0xd8   : > { %v399_v41 = vpop.f32.mrf.mxu1  ;;  %v698_v60 = vmul.f32 %v684_v56, %v635_v52  ;;  %765 = vst.msk [vmem:[#allocation2 + $0x38] sm:$0xff] %vm700_vm3, %v635_v52  ;;  %v785_v56 = vld [vmem:[#allocation2 + $0x10] sm:$0xff] }
  0xda   : > { %v624_v61 = vpop.f32.mrf.mxu3  ;;  %v732_v9 = vmul.f32 %v698_v60, %v635_v52  ;;  %v714_v14 = vsel %vm700_vm3, %v698_v60, 0.0  ;;  %v789_v60 = vld [vmem:[#allocation2 + $0x30] sm:$0xff] }
  0xdb   : > { %v536_v6 = vpop.f32.mrf.mxu2  ;;  %v715_v23 = vadd.f32 %v714_v14, %v713_v17 }
  0xdc   : > { %v342_v3 = vpop.f32.mrf.mxu0  ;;  %v548_v10 = vadd.f32 %v536_v6, %v398_v59  ;;  %v747_v19 = vsel %vm700_vm3, %v732_v9, 0.0  ;;  %v788_v59 = vld [vmem:[#allocation2 + $0x28] sm:$0xff] }
  0xdd   : > { %v748_v26 = vadd.f32 %v747_v19, %v746_v22 }
  0xde   : > { %v636_v15 = vadd.f32 %v624_v61, %v548_v10 }
  0xdf   : > { %v790_v0 = vld [vmem:[#allocation2 + $0x38] sm:$0xff] }
  0xe0   : > { %v699_v20 = vmul.f32 %v689_v18, %v636_v15  ;;  %766 = vst.msk [vmem:[#allocation2 + $0x40] sm:$0xff] %vm700_vm3, %v636_v15 }
  0xe2   : > { %v626_v21 = vpop.f32.mrf.mxu3  ;;  %v716_v24 = vsel %vm700_vm3, %v699_v20, 0.0  ;;  %v733_v25 = vmul.f32 %v699_v20, %v636_v15 }
  0xe3   : > { %v717_v27 = vadd.f32 %v716_v24, %v715_v23  ;;  %v538_v28 = vpop.f32.mrf.mxu2 }
  0xe4   : > { %v749_v29 = vsel %vm700_vm3, %v733_v25, 0.0 }
  0xe5   : > { %v718_v30 = vrot.slane %v717_v27, 4  ;;  %v750_v31 = vadd.f32 %v749_v29, %v748_v26 }
  0xe7   : > { %v719_v32 = vadd.f32 %v718_v30, %v717_v27  ;;  %v751_v33 = vrot.slane %v750_v31, 4  ;;  %v791_v1 = vld [vmem:[#allocation2 + $0x40] sm:$0xff] }
  0xe9   : > { %v720_v34 = vrot.slane %v719_v32, 2  ;;  %v752_v35 = vadd.f32 %v751_v33, %v750_v31 }
  0xeb   : > { %v721_v36 = vadd.f32 %v720_v34, %v719_v32  ;;  %v753_v37 = vrot.slane %v752_v35, 2 }
  0xed   : > { %v722_v38 = vrot.slane %v721_v36, 1  ;;  %v754_v39 = vadd.f32 %v753_v37, %v752_v35 }
  0xef   : > { %v723_v41 = vadd.f32 %v722_v38, %v721_v36  ;;  %v755_v42 = vrot.slane %v754_v39, 1 }
  0xf1   : > { %v756_v43 = vadd.f32 %v755_v42, %v754_v39  ;;  %v767_v44 = vmul.f32 0.015625, %v723_v41 }
  0xf3   : > { %v768_v45 = vmul.f32 0.015625, %v756_v43  ;;  %v769_v40 = vmul.f32 %v767_v44, %v767_v44  ;;  %v792_v62 = vsub.f32 %v783_v53, %v767_v44  ;;  %v793_v63 = vsub.f32 %v784_v55, %v767_v44 }
  0xf4   : > { %v794_v2 = vsub.f32 %v785_v56, %v767_v44  ;;  %v795_v3 = vsub.f32 %v786_v57, %v767_v44  ;;  %v796_v4 = vsub.f32 %v787_v58, %v767_v44  ;;  %v797_v5 = vsub.f32 %v788_v59, %v767_v44 }
  0xf5   : > { %v770_v46 = vsub.f32 %v768_v45, %v769_v40  ;;  %v798_v7 = vsub.f32 %v789_v60, %v767_v44  ;;  %v799_v8 = vsub.f32 %v790_v0, %v767_v44  ;;  %v800_v9 = vsub.f32 %v791_v1, %v767_v44 }
  0xf7   : > { %v771_v47 = vmax.f32 %v770_v46, 0.0 }
  0xf9   : > { %v772_v48 = vadd.f32 1e-05, %v771_v47 }
  0xfb   : > { %1046 = vrsqrt.f32 %v772_v48  ;;  %vm779_vm5 = vweird.f32 %v772_v48 }
 0x101   : > { %v1047_v49 = vpop.eup %1046 }
 0x102   : > { %v774_v50 = vmul.f32 %v1047_v49, %v772_v48  ;;  %vm780_vm4 = vweird.f32 %v1047_v49 }
 0x103   : > { %vm781_vm6 = vmor %vm779_vm5, %vm780_vm4 }
 0x104   : > { %v775_v51 = vmul.f32 %v1047_v49, %v774_v50 }
 0x106   : > { %v776_v52 = vmul.f32 0.5, %v775_v51 }
 0x108   : > { %v777_v54 = vsub.f32 1.5, %v776_v52 }
 0x10a   : > { %v778_v61 = vmul.f32 %v1047_v49, %v777_v54 }
 0x10c   : > { %v782_v6 = vsel %vm781_vm6, %v1047_v49, %v778_v61 }
 0x10d   : > { %v801_v10 = vmul.f32 %v792_v62, %v782_v6  ;;  %v802_v11 = vmul.f32 %v793_v63, %v782_v6  ;;  %v803_v12 = vmul.f32 %v794_v2, %v782_v6  ;;  %v804_v13 = vmul.f32 %v795_v3, %v782_v6 }
 0x10e   : > { %v805_v14 = vmul.f32 %v796_v4, %v782_v6  ;;  %v806_v15 = vmul.f32 %v797_v5, %v782_v6  ;;  %v807_v16 = vmul.f32 %v798_v7, %v782_v6  ;;  %v808_v17 = vmul.f32 %v799_v8, %v782_v6 }
 0x10f   : > { %v809_v18 = vmul.f32 %v800_v9, %v782_v6  ;;  %vm810_vm8 = vcmp.gt.f32.partialorder %v801_v10, 0.0  ;;  %vm811_vm9 = vcmp.gt.f32.partialorder %v802_v11, 0.0  ;;  %vm812_vm10 = vcmp.gt.f32.partialorder %v803_v12, 0.0 }
 0x110   : > { %vm813_vm11 = vcmp.gt.f32.partialorder %v804_v13, 0.0  ;;  %vm814_vm12 = vcmp.gt.f32.partialorder %v805_v14, 0.0  ;;  %vm815_vm13 = vcmp.gt.f32.partialorder %v806_v15, 0.0  ;;  %v819_v19 = vmul.f32 0.2, %v801_v10 }
 0x111   : > { %v820_v20 = vmul.f32 0.2, %v802_v11  ;;  %v821_v21 = vmul.f32 0.2, %v803_v12  ;;  %v822_v22 = vmul.f32 0.2, %v804_v13 }
 0x112   : > { %v823_v23 = vmul.f32 0.2, %v805_v14  ;;  %vm816_vm14 = vcmp.gt.f32.partialorder %v807_v16, 0.0  ;;  %v824_v24 = vmul.f32 0.2, %v806_v15  ;;  %v828_v26 = vsel %vm810_vm8, %v801_v10, %v819_v19 }
 0x113   : > { %v825_v25 = vmul.f32 0.2, %v807_v16  ;;  %v826_v27 = vmul.f32 0.2, %v808_v17  ;;  %v829_v28 = vsel %vm811_vm9, %v802_v11, %v820_v20  ;;  %v830_v29 = vsel %vm812_vm10, %v803_v12, %v821_v21 }
 0x114   : > { %v831_v30 = vsel %vm813_vm11, %v804_v13, %v822_v22  ;;  %vm817_vm15 = vcmp.gt.f32.partialorder %v808_v17, 0.0  ;;  %vm818_vm0 = vcmp.gt.f32.partialorder %v809_v18, 0.0  ;;  %v827_v31 = vmul.f32 0.2, %v809_v18 }
 0x115   : > { %v832_v32 = vsel %vm814_vm12, %v805_v14, %v823_v23  ;;  %v833_v33 = vsel %vm815_vm13, %v806_v15, %v824_v24  ;;  %v837_v34 = vpack.c.bf16 %v828_v26, %v828_v26  ;;  %v838_v35 = vpack.c.bf16 %v829_v28, %v829_v28 }
 0x116   : > { %v839_v36 = vpack.c.bf16 %v830_v29, %v830_v29  ;;  %v834_v37 = vsel %vm816_vm14, %v807_v16, %v825_v25  ;;  %v840_v38 = vpack.c.bf16 %v831_v30, %v831_v30  ;;  %v835_v39 = vsel %vm817_vm15, %v808_v17, %v826_v27 }
 0x117   : > { %v841_v41 = vpack.c.bf16 %v832_v32, %v832_v32  ;;  %847 = vst.msk [vmem:[%s197_s5] sm:$0xf] %vm846_vm7, %v837_v34  ;;  %v836_v42 = vsel %vm818_vm0, %v809_v18, %v827_v31  ;;  %v842_v43 = vpack.c.bf16 %v833_v33, %v833_v33  ;;  %v843_v44 = vpack.c.bf16 %v834_v37, %v834_v37 }
 0x118   : > { %848 = vst.msk [vmem:[%s197_s5 + $0x4] sm:$0xf] %vm846_vm7, %v838_v35  ;;  %v844_v45 = vpack.c.bf16 %v835_v39, %v835_v39  ;;  %v845_v40 = vpack.c.bf16 %v836_v42, %v836_v42 }
 0x119   : > { %849 = vst.msk [vmem:[%s197_s5 + $0x8] sm:$0xf] %vm846_vm7, %v839_v36 }
 0x11a   : > { %850 = vst.msk [vmem:[%s197_s5 + $0xc] sm:$0xf] %vm846_vm7, %v840_v38 }
 0x11b   : > { %851 = vst.msk [vmem:[%s197_s5 + $0x10] sm:$0xf] %vm846_vm7, %v841_v41 }
 0x11c   : > { %852 = vst.msk [vmem:[%s197_s5 + $0x14] sm:$0xf] %vm846_vm7, %v842_v43 }
 0x11d   : > { %853 = vst.msk [vmem:[%s197_s5 + $0x18] sm:$0xf] %vm846_vm7, %v843_v44 }
 0x11e   : > { %854 = vst.msk [vmem:[%s197_s5 + $0x1c] sm:$0xf] %vm846_vm7, %v844_v45 }
 0x11f   : > { %855 = vst.msk [vmem:[%s197_s5 + $0x20] sm:$0xf] %vm846_vm7, %v845_v40 }
 0x120 PF: > { %s14_s15 = sadd.s32 1, %s1057_s15  }
 0x121   : > { %p11_p4 = scmp.ge.s32.totalorder %s14_s15, 4  }
 0x123   :  { %13 = sbr.rel (!%p11_p4) target bundleno = 1 (0x1), region = 69 }

// kernel: discriminator_forward.7
= control target key start
LH: loop header
LB: loop body
LE: loop exit
PB: predicated region body
PF: predicated region fallthrough
CT: control target
= control target key end

     0   :  { %s833_s15 = smov 0   ;;  %s942_s0 = inlined_call_operand.vmem [shape: bf16[2,32,64], index: 0, kind: input, shape index: {}]   ;;  %s943_s1 = inlined_call_operand.vmem [shape: bf16[4,64,32], index: 1, kind: input, shape index: {}]   ;;  %s944_s2 = inlined_call_operand.vmem [shape: f32[1,32], index: 2, kind: input, shape index: {}]   ;;  %s945_s3 = inlined_call_operand.vmem [shape: f32[20,1], index: 3, kind: input, shape index: {}]   ;;  %s946_s4 = inlined_call_operand.vmem [shape: bf16[2,20,32], index: 4, kind: output, shape index: {}]  }
   0x1 LB: > { %s652_s16 = sadd.s32 4294967295, %s805_s15   ;;  %p656_p0 = scmp.ge.s32.totalorder %s805_s15, 1  ;;  %s805_s15 = sphi %s833_s15, %s14_s15  }
   0x2   : > { %p162_p1 = scmp.lt.s32.totalorder %s805_s15, 3 }
   0x4   : > { %p163_p2 = pnand %p656_p0, %p162_p1 }
   0x5   : > { %p188_p3 = scmp.lt.s32.totalorder (!%p163_p2), %s652_s16, 1 }
   0x6   : > { %166 = sbr.rel (%p163_p2) target bundleno = 236 (0xec), region = 36 }
   0xb   : > { %v775_v0 = vld [vmem:[%s943_s1 + $0x38] sm:$0xff]  ;;  %v774_v4 = vld [vmem:[%s943_s1 + $0x30] sm:$0xff]  ;;  %s948_s16 = smov (!%p188_p3, %s652_s16), 1  ;;  %v773_v8 = vld [vmem:[%s943_s1 + $0x28] sm:$0xff]  ;;  %v807_v10 = vmov 0   ;;  %vm448_vm1 = vcmask 1044480  }
   0xc   : > { %v771_v1 = vld [vmem:[%s943_s1 + $0x18] sm:$0xff]  ;;  %279 = vmatpush.bf16.msra.mxu0 %v775_v0  ;;  %v770_v5 = vld [vmem:[%s943_s1 + $0x10] sm:$0xff]  ;;  %v769_v9 = vld [vmem:[%s943_s1 + $0x8] sm:$0xff]  ;;  %s766_s10 = sshll.u32 %s948_s16, 4  ;;  %795 = vset.pattern.permute.xlu0 %v807_v10  ;;  %vm228_vm0 = vsmask.f32 7424 }
   0xd   : > { %v780_v2 = vld [vmem:[%s943_s1 + $0x58] sm:$0xff]  ;;  %329 = vmatpush.bf16.msra.mxu1 %v771_v1  ;;  %v779_v6 = vld [vmem:[%s943_s1 + $0x50] sm:$0xff]  ;;  %796 = vset.pattern.permute.xlu1 %v807_v10  ;;  %v778_v11 = vld [vmem:[%s943_s1 + $0x48] sm:$0xff]  ;;  %s883_s18 = scalar_lea.vmem %s942_s0, %s766_s10  ;;  %vm268_vm2 = vcmask 523264   ;;  %vm366_vm3 = vsmask.f32 5376 }
   0xe   : > { %v784_v3 = vld [vmem:[%s943_s1 + $0x78] sm:$0xff]  ;;  %418 = vmatpush.bf16.msra.mxu2 %v780_v2  ;;  %v783_v7 = vld [vmem:[%s943_s1 + $0x70] sm:$0xff]  ;;  %v782_v12 = vld [vmem:[%s943_s1 + $0x68] sm:$0xff]  ;;  %vm524_vm4 = vcmask 261120   ;;  %vm528_vm5 = vcmask 257024   ;;  %s785_s7 = smul.u32 12, %s948_s16 }
   0xf   : > { %486 = vmatpush.bf16.msra.mxu3 %v784_v3  ;;  %v503_v13 = vld [vmem:[%s945_s3] sm:$0xff]  ;;  %v210_v15 = vld [vmem:[%s883_s18 + $0x8] sm:$0x7]  ;;  %v776_v20 = vld [vmem:[%s883_s18 + $0x8] sm:$0x10]  ;;  %vm595_vm12 = vcmask 254976  }
  0x10   : > { %280 = vmatpush.bf16.msra.mxu0 %v774_v4  ;;  %v767_v14 = vld [vmem:[%s883_s18] sm:$0xff]  ;;  %v225_v17 = vunpack.c.l.b16 %v210_v15  ;;  %v718_v19 = vld [vmem:[%s883_s18 + $0x8] sm:$0xf]  ;;  %508 = vperm.xlu0 %795, %v503_v13   ;;  %v505_v29 = vld [vmem:[%s945_s3 + $0x10] sm:$0xf]  ;;  %s197_s10 = scalar_lea.vmem %s946_s4, %s785_s7 }
  0x11   : > { %330 = vmatpush.bf16.msra.mxu1 %v770_v5  ;;  %v343_v16 = vld [vmem:[%s883_s18] sm:$0xc]  ;;  %v344_v18 = vld [vmem:[%s883_s18 + $0x4] sm:$0xf]  ;;  %v230_v22 = vshrl.u32 %v767_v14, 16  ;;  %v232_v23 = vshll.u32 %v767_v14, 16  ;;  %v719_v25 = vor.u32 %v776_v20, %v718_v19  ;;  %518 = vperm.xlu1 %796, %v505_v29  }
  0x12   : > { %419 = vmatpush.bf16.msra.mxu2 %v779_v6  ;;  %v360_v21 = vunpack.c.l.b16 %v343_v16  ;;  %v361_v24 = vunpack.c.l.b16 %v344_v18  ;;  %v435_v26 = vld [vmem:[%s883_s18] sm:$0x8]  ;;  %v227_v27 = vpack.c.b16 %v225_v17, %v225_v17  ;;  %v504_v48 = vld [vmem:[%s945_s3 + $0x8] sm:$0xff] }
  0x13   : > { %487 = vmatpush.bf16.msra.mxu3 %v783_v7  ;;  %v446_v28 = vunpack.c.l.b16 %v435_v26  ;;  %v772_v30 = vld [vmem:[%s943_s1 + $0x20] sm:$0xff]  ;;  %v234_v32 = vrot.slane %v232_v23, 1  ;;  %v376_v34 = vshrl.u32 %v719_v25, 16  ;;  %v379_v35 = vshll.u32 %v719_v25, 16  ;;  %v201_v56 = vld [vmem:[%s883_s18 + $0x8] sm:$0x3] }
  0x14   : > { %281 = vmatpush.bf16.msra.mxu0 %v773_v8  ;;  %v768_v31 = vld [vmem:[%s943_s1] sm:$0xff]  ;;  %v364_v33 = vpack.c.b16 %v361_v24, %v360_v21  ;;  %v237_v38 = vshll.u32 %v227_v27, 16  ;;  %v450_v40 = vrot.slane %v719_v25, 3  ;;  %v241_v57 = vshrl.u32 %v227_v27, 16 }
  0x15   : > { %331 = vmatpush.bf16.msra.mxu1 %v769_v9  ;;  %v777_v36 = vld [vmem:[%s943_s1 + $0x40] sm:$0xff]  ;;  %v447_v39 = vpack.c.b16 %v361_v24, %v446_v28  ;;  %v235_v41 = vor.u32 %v234_v32, %v230_v22  ;;  %v378_v44 = vrot.slane %v376_v34, 2  ;;  %v381_v46 = vrot.slane %v379_v35, 3 }
  0x16   : > { %420 = vmatpush.bf16.msra.mxu2 %v778_v11  ;;  %v781_v37 = vld [vmem:[%s943_s1 + $0x60] sm:$0xff]  ;;  %v368_v42 = vshrl.u32 %v364_v33, 16  ;;  %v371_v43 = vshll.u32 %v364_v33, 16  ;;  %v239_v45 = vrot.slane %v237_v38, 1  ;;  %v294_v58 = vunpack.c.l.b16 %v201_v56 }
  0x17   : > { %488 = vmatpush.bf16.msra.mxu3 %v782_v12  ;;  %v449_v47 = vrot.slane %v447_v39, 3  ;;  %v382_v52 = vor.u32 %v381_v46, %v378_v44 }
  0x18   : > { %282 = vmatpush.bf16.msra.mxu0 %v772_v30  ;;  %v370_v49 = vrot.slane %v368_v42, 2  ;;  %v373_v50 = vrot.slane %v371_v43, 3  ;;  %v240_v51 = vsel %vm228_vm0, %v235_v41, %v239_v45  ;;  %513 = vperm.xlu0 %795, %v504_v48   ;;  %v243_v59 = vor.u32 %v241_v57, %v239_v45 }
  0x19   : > { %332 = vmatpush.bf16.msra.mxu1 %v768_v31  ;;  %v451_v53 = vsel %vm448_vm1, %v449_v47, %v450_v40  ;;  %v295_v60 = vpack.c.b16 %v294_v58, %v294_v58 }
  0x1a   : > { %421 = vmatpush.bf16.msra.mxu2 %v777_v36  ;;  %v374_v54 = vor.u32 %v373_v50, %v370_v49 }
  0x1b   : > { %489 = vmatpush.bf16.msra.mxu3 %v781_v37  ;;  %688 = vmatmul.msk.bf16.vlgmr.msra.gmra.mxu0 %vm268_vm2, %v240_v51 }
  0x1c   : > { %706 = vmatmul.msk.bf16.vlgmr.msra.gmra.mxu1 %vm268_vm2, %v767_v14  ;;  %v383_v55 = vsel %vm366_vm3, %v374_v54, %v382_v52 }
  0x1d   : > { %736 = vmatmul.msk.bf16.vlgmr.msra.gmra.mxu2 %vm268_vm2, %v383_v55 }
  0x1e   : > { %762 = vmatmul.msk.bf16.vlgmr.msra.gmra.mxu3 %vm268_vm2, %v451_v53 }
  0x2b   : > { %689 = vmatmul.msk.bf16.gmra.mxu0 %vm268_vm2, %v243_v59 }
  0x2c   : > { %707 = vmatmul.msk.bf16.gmra.mxu1 %vm268_vm2, %v295_v60 }
  0x2d   : > { %737 = vmatmul.msk.bf16.gmra.mxu2 %vm268_vm2, %v382_v52 }
  0x2e   : > { %763 = vmatmul.msk.bf16.gmra.mxu3 %vm268_vm2, %v450_v40 }
  0x82   : > { %v509_v5 = vpop.permute.xlu0 %508 }
  0x83   : > { %v519_v24 = vpop.permute.xlu1 %518 }
  0x8a   : > { %v514_v14 = vpop.permute.xlu0 %513 }
  0x98   : > { %v284_v61 = vpop.f32.mrf.mxu0 }
  0x99   : > { %v334_v62 = vpop.f32.mrf.mxu1 }
  0x9a   : > { %v335_v63 = vadd.f32 %v334_v62, %v284_v61 }
  0xa0   : > { %v423_v1 = vpop.f32.mrf.mxu2  ;;  %v286_v2 = vpop.f32.mrf.mxu0 }
  0xa1   : > { %v491_v0 = vpop.f32.mrf.mxu3  ;;  %v432_v3 = vadd.f32 %v423_v1, %v335_v63  ;;  %v336_v4 = vpop.f32.mrf.mxu1 }
  0xa2   : > { %v337_v7 = vadd.f32 %v336_v4, %v286_v2 }
  0xa3   : > { %v500_v6 = vadd.f32 %v491_v0, %v432_v3 }
  0xa5   : > { %553 = vst.msk [vmem:[#allocation2] sm:$0xff] %vm524_vm4, %v500_v6  ;;  %v521_v17 = vmul.f32 %v509_v5, %v500_v6 }
  0xa7   : > { %v538_v25 = vmul.f32 %v521_v17, %v500_v6  ;;  %v525_v28 = vsel %vm524_vm4, %v521_v17, 0.0 }
  0xa8   : > { %v425_v9 = vpop.f32.mrf.mxu2  ;;  %v289_v10 = vpop.f32.mrf.mxu0 }
  0xa9   : > { %v493_v8 = vpop.f32.mrf.mxu3  ;;  %v433_v11 = vadd.f32 %v425_v9, %v337_v7  ;;  %v339_v12 = vpop.f32.mrf.mxu1  ;;  %v541_v32 = vsel %vm524_vm4, %v538_v25, 0.0 }
  0xaa   : > { %v340_v16 = vadd.f32 %v339_v12, %v289_v10 }
  0xab   : > { %v501_v13 = vadd.f32 %v493_v8, %v433_v11 }
  0xac   : > { %v572_v1 = vld [vmem:[#allocation2] sm:$0xff] }
  0xad   : > { %554 = vst.msk [vmem:[#allocation2 + $0x8] sm:$0xff] %vm524_vm4, %v501_v13  ;;  %v522_v15 = vmul.f32 %v514_v14, %v501_v13 }
  0xaf   : > { %v539_v21 = vmul.f32 %v522_v15, %v501_v13  ;;  %v526_v26 = vsel %vm524_vm4, %v522_v15, 0.0 }
  0xb0   : > { %v428_v19 = vpop.f32.mrf.mxu2  ;;  %v291_v20 = vpop.f32.mrf.mxu0  ;;  %v527_v31 = vadd.f32 %v526_v26, %v525_v28 }
  0xb1   : > { %v496_v18 = vpop.f32.mrf.mxu3  ;;  %v434_v22 = vadd.f32 %v428_v19, %v340_v16  ;;  %v341_v23 = vpop.f32.mrf.mxu1  ;;  %v542_v29 = vsel %vm524_vm4, %v539_v21, 0.0 }
  0xb2   : > { %v543_v36 = vadd.f32 %v542_v29, %v541_v32 }
  0xb3   : > { %v502_v27 = vadd.f32 %v496_v18, %v434_v22 }
  0xb4   : > { %v573_v2 = vld [vmem:[#allocation2 + $0x8] sm:$0xff] }
  0xb5   : > { %555 = vst.msk [vmem:[#allocation2 + $0x10] sm:$0xf] %vm528_vm5, %v502_v27  ;;  %v523_v30 = vmul.f32 %v519_v24, %v502_v27 }
  0xb7   : > { %v529_v33 = vsel %vm528_vm5, %v523_v30, 0.0  ;;  %v540_v34 = vmul.f32 %v523_v30, %v502_v27 }
  0xb8   : > { %v530_v37 = vadd.f32 %v529_v33, %v527_v31  ;;  %v430_v38 = vpop.f32.mrf.mxu2 }
  0xb9   : > { %v498_v35 = vpop.f32.mrf.mxu3  ;;  %v544_v39 = vsel %vm528_vm5, %v540_v34, 0.0 }
  0xba   : > { %v531_v40 = vrot.slane %v530_v37, 4  ;;  %v545_v41 = vadd.f32 %v544_v39, %v543_v36 }
  0xbc   : > { %v532_v42 = vadd.f32 %v531_v40, %v530_v37  ;;  %v546_v43 = vrot.slane %v545_v41, 4  ;;  %v574_v3 = vld [vmem:[#allocation2 + $0x10] sm:$0xf] }
  0xbe   : > { %v533_v44 = vrot.slane %v532_v42, 2  ;;  %v547_v45 = vadd.f32 %v546_v43, %v545_v41 }
  0xc0   : > { %v534_v46 = vadd.f32 %v533_v44, %v532_v42  ;;  %v548_v47 = vrot.slane %v547_v45, 2 }
  0xc2   : > { %v535_v48 = vrot.slane %v534_v46, 1  ;;  %v549_v49 = vadd.f32 %v548_v47, %v547_v45 }
  0xc4   : > { %v536_v50 = vadd.f32 %v535_v48, %v534_v46  ;;  %v550_v51 = vrot.slane %v549_v49, 1 }
  0xc6   : > { %v551_v52 = vadd.f32 %v550_v51, %v549_v49  ;;  %v556_v53 = vmul.f32 0.0625, %v536_v50 }
  0xc8   : > { %v557_v54 = vmul.f32 0.0625, %v551_v52  ;;  %v558_v55 = vmul.f32 %v556_v53, %v556_v53  ;;  %v575_v4 = vsub.f32 %v572_v1, %v556_v53  ;;  %v576_v5 = vsub.f32 %v573_v2, %v556_v53 }
  0xc9   : > { %v577_v6 = vsub.f32 %v574_v3, %v556_v53 }
  0xca   : > { %v559_v56 = vsub.f32 %v557_v54, %v558_v55 }
  0xcc   : > { %v560_v57 = vmax.f32 %v559_v56, 0.0 }
  0xce   : > { %v561_v58 = vadd.f32 1e-05, %v560_v57 }
  0xd0   : > { %797 = vrsqrt.f32 %v561_v58  ;;  %vm568_vm7 = vweird.f32 %v561_v58 }
  0xd6   : > { %v798_v59 = vpop.eup %797 }
  0xd7   : > { %v563_v60 = vmul.f32 %v798_v59, %v561_v58  ;;  %vm569_vm6 = vweird.f32 %v798_v59 }
  0xd8   : > { %vm570_vm8 = vmor %vm568_vm7, %vm569_vm6 }
  0xd9   : > { %v564_v61 = vmul.f32 %v798_v59, %v563_v60 }
  0xdb   : > { %v565_v62 = vmul.f32 0.5, %v564_v61 }
  0xdd   : > { %v566_v63 = vsub.f32 1.5, %v565_v62 }
  0xdf   : > { %v567_v0 = vmul.f32 %v798_v59, %v566_v63 }
  0xe1   : > { %v571_v7 = vsel %vm570_vm8, %v798_v59, %v567_v0 }
  0xe2   : > { %v578_v8 = vmul.f32 %v575_v4, %v571_v7  ;;  %v579_v9 = vmul.f32 %v576_v5, %v571_v7  ;;  %v580_v10 = vmul.f32 %v577_v6, %v571_v7 }
  0xe4   : > { %vm581_vm9 = vcmp.gt.f32.partialorder %v578_v8, 0.0  ;;  %vm582_vm10 = vcmp.gt.f32.partialorder %v579_v9, 0.0  ;;  %vm583_vm11 = vcmp.gt.f32.partialorder %v580_v10, 0.0  ;;  %v584_v11 = vmul.f32 0.2, %v578_v8 }
  0xe5   : > { %v585_v12 = vmul.f32 0.2, %v579_v9  ;;  %v586_v13 = vmul.f32 0.2, %v580_v10 }
  0xe6   : > { %v587_v14 = vsel %vm581_vm9, %v578_v8, %v584_v11 }
  0xe7   : > { %v588_v15 = vsel %vm582_vm10, %v579_v9, %v585_v12  ;;  %v589_v16 = vsel %vm583_vm11, %v580_v10, %v586_v13  ;;  %v590_v17 = vpack.c.bf16 %v587_v14, %v587_v14 }
  0xe8   : > { %v591_v18 = vpack.c.bf16 %v588_v15, %v588_v15  ;;  %v592_v19 = vpack.c.bf16 %v589_v16, %v589_v16 }
  0xe9   : > { %593 = vst.msk [vmem:[%s197_s10] sm:$0xf] %vm528_vm5, %v590_v17 }
  0xea   : > { %594 = vst.msk [vmem:[%s197_s10 + $0x4] sm:$0xf] %vm528_vm5, %v591_v18 }
  0xeb   : > { %596 = vst.msk [vmem:[%s197_s10 + $0x8] sm:$0x3] %vm595_vm12, %v592_v19 }
  0xec PF: > { %s14_s15 = sadd.s32 1, %s805_s15  }
  0xed   : > { %p11_p4 = scmp.ge.s32.totalorder %s14_s15, 4  }
  0xef   :  { %13 = sbr.rel (!%p11_p4) target bundleno = 1 (0x1), region = 69 }

// kernel: discriminator_forward.8
= control target key start
LH: loop header
LB: loop body
LE: loop exit
PB: predicated region body
PF: predicated region fallthrough
CT: control target
= control target key end

     0   :  { %s1627_s15 = smov 0   ;;  %s1875_s0 = inlined_call_operand.vmem [shape: bf16[2,40,32], index: 0, kind: input, shape index: {}]   ;;  %s1876_s1 = inlined_call_operand.vmem [shape: bf16[16,32,64], index: 1, kind: input, shape index: {}]   ;;  %s1877_s2 = inlined_call_operand.vmem [shape: f32[1,64], index: 2, kind: input, shape index: {}]   ;;  %s1878_s3 = inlined_call_operand.vmem [shape: f32[18,1], index: 3, kind: input, shape index: {}]   ;;  %s1879_s4 = inlined_call_operand.vmem [shape: bf16[2,18,64], index: 4, kind: output, shape index: {}]  }
   0x1 LB: > { %s1303_s16 = sadd.s32 4294967295, %s1599_s15   ;;  %p1307_p0 = scmp.ge.s32.totalorder %s1599_s15, 1  ;;  %s1599_s15 = sphi %s1627_s15, %s14_s15  }
   0x2   : > { %p162_p1 = scmp.lt.s32.totalorder %s1599_s15, 3 }
   0x4   : > { %p163_p2 = pnand %p1307_p0, %p162_p1 }
   0x5   : > { %p188_p3 = scmp.lt.s32.totalorder (!%p163_p2), %s1303_s16, 1 }
   0x6   : > { %166 = sbr.rel (%p163_p2) target bundleno = 330 (0x14a), region = 36 }
   0xb   : > { %v1537_v0 = vld [vmem:[%s1876_s1 + $0x8] sm:$0xff]  ;;  %v1539_v2 = vld [vmem:[%s1876_s1 + $0x18] sm:$0xff]  ;;  %v1536_v4 = vld [vmem:[%s1876_s1] sm:$0xff]  ;;  %s1881_s16 = smov (!%p188_p3, %s1303_s16), 1  ;;  %vm248_vm0 = vcmask 261120   ;;  %vm320_vm1 = vcmask 1046528  }
   0xc   : > { %v1541_v1 = vld [vmem:[%s1876_s1 + $0x28] sm:$0xff]  ;;  %v1543_v3 = vld [vmem:[%s1876_s1 + $0x38] sm:$0xff]  ;;  %299 = vmatpush.bf16.msra.mxu1 %v1537_v0  ;;  %v1540_v5 = vld [vmem:[%s1876_s1 + $0x20] sm:$0xff]  ;;  %261 = vmatpush.bf16.msra.mxu0 %v1539_v2  ;;  %s1573_s6 = smul.u32 20, %s1881_s16  ;;  %vm220_vm2 = vsmask.f32 7424 }
   0xd   : > { %348 = vmatpush.bf16.msra.mxu2 %v1541_v1  ;;  %414 = vmatpush.bf16.msra.mxu3 %v1543_v3  ;;  %v1538_v6 = vld [vmem:[%s1876_s1 + $0x10] sm:$0xff]  ;;  %v1549_v8 = vld [vmem:[%s1876_s1 + $0x68] sm:$0xff]  ;;  %v1551_v10 = vld [vmem:[%s1876_s1 + $0x78] sm:$0xff]  ;;  %vm372_vm3 = vsmask.f32 6400  ;;  %vm442_vm5 = vcmask 1044480  }
   0xe   : > { %v1542_v7 = vld [vmem:[%s1876_s1 + $0x30] sm:$0xff]  ;;  %v1545_v9 = vld [vmem:[%s1876_s1 + $0x48] sm:$0xff]  ;;  %s1674_s2 = scalar_lea.vmem %s1875_s0, %s1573_s6  ;;  %v1547_v11 = vld [vmem:[%s1876_s1 + $0x58] sm:$0xff]  ;;  %vm504_vm4 = vsmask.f32 4352  ;;  %vm682_vm7 = vcmask 1045504  }
   0xf   : > { %v1680_v12 = vld [vmem:[%s1674_s2] sm:$0xff]   ;;  %v206_v14 = vld [vmem:[%s1674_s2 + $0x8] sm:$0x3]  ;;  %v1550_v24 = vld [vmem:[%s1876_s1 + $0x70] sm:$0xff]  ;;  %vm734_vm6 = vsmask.f32 5376 }
  0x10   : > { %300 = vmatpush.bf16.msra.mxu1 %v1536_v4  ;;  %v311_v13 = vld [vmem:[%s1674_s2] sm:$0xe]  ;;  %262 = vmatpush.bf16.msra.mxu0 %v1538_v6  ;;  %v1572_v15 = vunpack.c.h.b16 %v1680_v12  ;;  %v222_v16 = vshrl.u32 %v1680_v12, 16  ;;  %v224_v17 = vshll.u32 %v1680_v12, 16  ;;  %v363_v19 = vld [vmem:[%s1674_s2 + $0x8] sm:$0x7]  ;;  %v217_v22 = vunpack.c.l.b16 %v206_v14 }
  0x11   : > { %349 = vmatpush.bf16.msra.mxu2 %v1540_v5  ;;  %415 = vmatpush.bf16.msra.mxu3 %v1542_v7  ;;  %v318_v18 = vunpack.c.l.b16 %v311_v13  ;;  %v1548_v20 = vld [vmem:[%s1876_s1 + $0x60] sm:$0xff]  ;;  %v370_v23 = vunpack.c.l.b16 %v363_v19  ;;  %v1546_v27 = vld [vmem:[%s1876_s1 + $0x50] sm:$0xff]  ;;  %v201_v40 = vld [vmem:[%s1674_s2 + $0x8] sm:$0x1]  ;;  %vm1174_vm8 = vcmask 523264   ;;  %vm1178_vm9 = vcmask 517120  }
  0x12   : > { %v1544_v21 = vld [vmem:[%s1876_s1 + $0x40] sm:$0xff]  ;;  %v226_v25 = vrot.slane %v224_v17, 1  ;;  %v219_v28 = vpack.c.b16 %v217_v22, %v217_v22  ;;  %v488_v48 = vld [vmem:[%s1674_s2 + $0xc] sm:$0x1]  ;;  %v274_v52 = vunpack.c.l.b16 %v201_v40  ;;  %v1560_v58 = vld [vmem:[%s1876_s1 + $0xb8] sm:$0xff]  ;;  %s1574_s14 = smul.u32 12, %s1881_s16 }
  0x13   : > { %1332 = vmatmul.msk.bf16.vlgmr.msra.gmra.mxu1 %vm248_vm0, %v1680_v12  ;;  %v319_v26 = vpack.c.b16 %v1572_v15, %v318_v18  ;;  %v371_v29 = vpack.c.b16 %v370_v23, %v370_v23  ;;  %v1594_v41 = vld [vmem:[%s1674_s2] sm:$0x8]  ;;  %v1708_v46 = vld [vmem:[%s1674_s2 + $0x4] sm:$0xff]   ;;  %v1718_v54 = vunpack.c.l.b16 %v488_v48  ;;  %v1555_v60 = vld [vmem:[%s1876_s1 + $0x98] sm:$0xff] }
  0x14   : > { %470 = vmatpush.bf16.msrb.mxu0 %v1545_v9  ;;  %546 = vmatpush.bf16.msrb.mxu1 %v1547_v11  ;;  %v227_v31 = vor.u32 %v226_v25, %v222_v16  ;;  %v322_v34 = vrot.slane %v219_v28, 1  ;;  %v229_v35 = vshll.u32 %v219_v28, 16  ;;  %v1596_v47 = vld [vmem:[%s1674_s2] sm:$0xf0]   ;;  %v1716_v53 = vunpack.c.h.b16 %v1708_v46  ;;  %v1557_v55 = vld [vmem:[%s1876_s1 + $0xa8] sm:$0xff]  ;;  %v1554_v22 = vld [vmem:[%s1876_s1 + $0x90] sm:$0xff]  ;;  %s197_s19 = scalar_lea.vmem %s1879_s4, %s1574_s14 }
  0x15   : > { %592 = vmatpush.bf16.msrb.mxu2 %v1549_v8  ;;  %654 = vmatpush.bf16.msrb.mxu3 %v1551_v10  ;;  %v321_v30 = vrot.slane %v319_v26, 1  ;;  %v374_v32 = vshrl.u32 %v319_v26, 16  ;;  %v377_v33 = vshll.u32 %v319_v26, 16  ;;  %v382_v36 = vshrl.u32 %v371_v29, 16  ;;  %v1553_v57 = vld [vmem:[%s1876_s1 + $0x88] sm:$0xff]  ;;  %v1556_v17 = vld [vmem:[%s1876_s1 + $0xa0] sm:$0xff] }
  0x16   : > { %v385_v37 = vshll.u32 %v371_v29, 16  ;;  %v231_v43 = vrot.slane %v229_v35, 1  ;;  %v275_v59 = vpack.c.b16 %v274_v52, %v274_v52  ;;  %v1595_v61 = vor.u32 %v1596_v47, %v1594_v41  ;;  %v607_v9 = vld [vmem:[%s1674_s2 + $0xc] sm:$0x3]  ;;  %v429_v10 = vld [vmem:[%s1674_s2] sm:$0x8] }
  0x17   : > { %v376_v38 = vrot.slane %v374_v32, 1  ;;  %v379_v39 = vrot.slane %v377_v33, 2  ;;  %v323_v42 = vsel %vm320_vm1, %v321_v30, %v322_v34  ;;  %v384_v44 = vrot.slane %v382_v36, 1  ;;  %v430_v11 = vld [vmem:[%s1674_s2 + $0x8] sm:$0xff]   ;;  %v669_v35 = vld [vmem:[%s1674_s2 + $0x4] sm:$0xc] }
  0x18   : > { %471 = vmatpush.bf16.msrb.mxu0 %v1544_v21  ;;  %547 = vmatpush.bf16.msrb.mxu1 %v1546_v27  ;;  %v387_v45 = vrot.slane %v385_v37, 2  ;;  %v232_v50 = vsel %vm220_vm2, %v227_v31, %v231_v43  ;;  %v503_v62 = vpack.c.b16 %v1718_v54, %v1716_v53  ;;  %v233_v63 = vshrl.u32 %v219_v28, 16  ;;  %v1559_v21 = vld [vmem:[%s1876_s1 + $0xb0] sm:$0xff]  ;;  %v1568_v40 = vld [vmem:[%s1876_s1 + $0xf8] sm:$0xff] }
  0x19   : > { %593 = vmatpush.bf16.msrb.mxu2 %v1548_v20  ;;  %655 = vmatpush.bf16.msrb.mxu3 %v1550_v24  ;;  %v380_v49 = vor.u32 %v379_v39, %v376_v38  ;;  %v506_v0 = vshrl.u32 %v1595_v61, 16  ;;  %v509_v1 = vshll.u32 %v1595_v61, 16  ;;  %v614_v13 = vunpack.c.l.b16 %v607_v9  ;;  %v1552_v20 = vld [vmem:[%s1876_s1 + $0x80] sm:$0xff]  ;;  %v1566_v38 = vld [vmem:[%s1876_s1 + $0xe8] sm:$0xff]  ;;  %v1564_v41 = vld [vmem:[%s1876_s1 + $0xd8] sm:$0xff] }
  0x1a   : > { %1346 = vmatmul.msk.bf16.vlgmr.msra.gmra.mxu2 %vm248_vm0, %v323_v42  ;;  %v388_v51 = vor.u32 %v387_v45, %v384_v44  ;;  %1322 = vmatmul.msk.bf16.vlgmr.msra.gmra.mxu0 %vm248_vm0, %v232_v50  ;;  %v514_v2 = vshrl.u32 %v503_v62, 16  ;;  %v517_v3 = vshll.u32 %v503_v62, 16  ;;  %v235_v4 = vor.u32 %v233_v63, %v231_v43  ;;  %v1562_v39 = vld [vmem:[%s1876_s1 + $0xc8] sm:$0xff]  ;;  %v1466_v61 = vld [vmem:[%s1674_s2 + $0x4] sm:$0x8]  ;;  %v1567_v9 = vld [vmem:[%s1876_s1 + $0xf0] sm:$0xff] }
  0x1b   : > { %v508_v5 = vrot.slane %v506_v0, 3  ;;  %v511_v6 = vrot.slane %v509_v1, 4  ;;  %v438_v18 = vunpack.c.l.b16 %v429_v10  ;;  %v439_v19 = vunpack.c.l.b16 %v430_v11  ;;  %v1791_v48 = vld [vmem:[%s1674_s2 + $0xc] sm:$0xff]   ;;  %v1558_v62 = vld [vmem:[%s1674_s2 + $0x4] sm:$0xf0] }
  0x1c   : > { %v389_v56 = vsel %vm372_vm3, %v380_v49, %v388_v51  ;;  %710 = vmatpush.bf16.msra.mxu0 %v1553_v57  ;;  %776 = vmatpush.bf16.msra.mxu1 %v1555_v60  ;;  %v516_v7 = vrot.slane %v514_v2, 3  ;;  %v519_v8 = vrot.slane %v517_v3, 4  ;;  %v615_v23 = vpack.c.b16 %v614_v13, %v614_v13  ;;  %v845_v49 = vld [vmem:[%s1674_s2 + $0x10] sm:$0x1]  ;;  %v670_v1 = vld [vmem:[%s1674_s2 + $0xc] sm:$0x7] }
  0x1d   : > { %1360 = vmatmul.msk.bf16.vlgmr.msra.gmra.mxu3 %vm248_vm0, %v389_v56  ;;  %827 = vmatpush.bf16.msra.mxu2 %v1557_v55  ;;  %v512_v14 = vor.u32 %v511_v6, %v508_v5  ;;  %v618_v24 = vshll.u32 %v1708_v46, 16  ;;  %v440_v26 = vpack.c.b16 %v1572_v15, %v438_v18  ;;  %v441_v27 = vpack.c.b16 %v439_v19, %v439_v19  ;;  %v791_v56 = vld [vmem:[%s1674_s2 + $0x4] sm:$0x8]  ;;  %v1563_v10 = vld [vmem:[%s1876_s1 + $0xd0] sm:$0xff] }
  0x1e   : > { %902 = vmatpush.bf16.msra.mxu3 %v1560_v58  ;;  %v520_v16 = vor.u32 %v519_v8, %v516_v7  ;;  %v616_v28 = vshrl.u32 %v1708_v46, 16  ;;  %v623_v30 = vshll.u32 %v615_v23, 16  ;;  %v678_v15 = vunpack.c.l.b16 %v669_v35  ;;  %v1565_v5 = vld [vmem:[%s1876_s1 + $0xe0] sm:$0xff] }
  0x1f   : > { %v620_v29 = vrot.slane %v618_v24, 1  ;;  %v443_v31 = vrot.slane %v440_v26, 3  ;;  %v444_v32 = vrot.slane %v441_v27, 3  ;;  %v732_v37 = vunpack.c.h.b16 %v430_v11  ;;  %v1561_v8 = vld [vmem:[%s1876_s1 + $0xc0] sm:$0xff] }
  0x20   : > { %v521_v25 = vsel %vm504_vm4, %v512_v14, %v520_v16  ;;  %711 = vmatpush.bf16.msra.mxu0 %v1552_v20  ;;  %777 = vmatpush.bf16.msra.mxu1 %v1554_v22  ;;  %v1781_v42 = vpack.c.b16 %v1716_v53, %v678_v15  ;;  %v567_v50 = vpack.c.b16 %v1718_v54, %v1718_v54  ;;  %v1798_v57 = vunpack.c.l.b16 %v1791_v48 }
  0x21   : > { %828 = vmatpush.bf16.msra.mxu2 %v1556_v17  ;;  %v621_v33 = vor.u32 %v620_v29, %v616_v28  ;;  %v445_v36 = vsel %vm442_vm5, %v443_v31, %v444_v32  ;;  %v1783_v43 = vpack.c.b16 %v732_v37, %v732_v37  ;;  %v858_v58 = vunpack.c.l.b16 %v845_v49  ;;  %v972_v31 = vld [vmem:[%s1674_s2 + $0x10] sm:$0x7] }
  0x22   : > { %903 = vmatpush.bf16.msra.mxu3 %v1559_v21  ;;  %v736_v44 = vshrl.u32 %v1781_v42, 16  ;;  %v739_v45 = vshll.u32 %v1781_v42, 16  ;;  %v798_v0 = vunpack.c.l.b16 %v791_v56  ;;  %v1467_v2 = vor.u32 %v1558_v62, %v1466_v61 }
  0x23   : > { %1333 = vmatmul.msk.bf16.gmra.mxu1 %vm248_vm0, %v275_v59  ;;  %v747_v47 = vshll.u32 %v1783_v43, 16  ;;  %v860_v54 = vpack.c.b16 %v858_v58, %v1798_v57  ;;  %v679_v6 = vunpack.c.l.b16 %v670_v1  ;;  %v801_v19 = vrot.slane %v1783_v43, 3 }
  0x24   : > { %v738_v52 = vrot.slane %v736_v44, 2  ;;  %v741_v55 = vrot.slane %v739_v45, 3  ;;  %v799_v7 = vpack.c.b16 %v1716_v53, %v798_v0  ;;  %v862_v11 = vshrl.u32 %v1467_v2, 16 }
  0x25   : > { %v749_v60 = vrot.slane %v747_v47, 3  ;;  %v865_v13 = vshll.u32 %v1467_v2, 16  ;;  %v870_v14 = vshrl.u32 %v860_v54, 16  ;;  %v681_v53 = vpack.c.b16 %v679_v6, %v679_v6 }
  0x26   : > { %v742_v3 = vor.u32 %v741_v55, %v738_v52  ;;  %v800_v18 = vrot.slane %v799_v7, 3  ;;  %v864_v20 = vrot.slane %v862_v11, 3  ;;  %v683_v24 = vrot.slane %v1781_v42, 2  ;;  %v1155_v11 = vld [vmem:[%s1878_s3 + $0x10] sm:$0x3] }
  0x27   : > { %v867_v21 = vrot.slane %v865_v13, 4  ;;  %v872_v22 = vrot.slane %v870_v14, 3  ;;  %v1601_v55 = vmov 0  }
  0x28   : > { %v802_v26 = vsel %vm442_vm5, %v800_v18, %v801_v19  ;;  %1584 = vset.pattern.permute.xlu0 %v1601_v55  ;;  %1585 = vset.pattern.permute.xlu1 %v1601_v55 }
  0x29   : > { %v868_v27 = vor.u32 %v867_v21, %v864_v20  ;;  %1168 = vperm.xlu1 %1585, %v1155_v11  }
  0x2a   : > { %1347 = vmatmul.msk.bf16.gmra.mxu2 %vm248_vm0, %v322_v34  ;;  %1323 = vmatmul.msk.bf16.gmra.mxu0 %vm248_vm0, %v235_v4  ;;  %v625_v34 = vrot.slane %v623_v30, 1  ;;  %v917_v30 = vld [vmem:[%s1674_s2 + $0x8] sm:$0xe] }
  0x2c   : > { %v626_v12 = vsel %vm220_vm2, %v621_v33, %v625_v34  ;;  %v926_v33 = vunpack.c.l.b16 %v917_v30 }
  0x2d   : > { %1361 = vmatmul.msk.bf16.gmra.mxu3 %vm248_vm0, %v388_v51  ;;  %v627_v51 = vshrl.u32 %v615_v23, 16 }
  0x2e   : > { %v928_v35 = vpack.c.b16 %v1798_v57, %v926_v33 }
  0x2f   : > { %v629_v63 = vor.u32 %v627_v51, %v625_v34  ;;  %v979_v34 = vunpack.c.l.b16 %v972_v31 }
  0x30   : > { %v985_v15 = vshll.u32 %v928_v35, 16 }
  0x33   : > { %1388 = vmatmul.msk.bf16.vlgmr.msrb.gmra.mxu1 %vm248_vm0, %v521_v25  ;;  %v684_v25 = vrot.slane %v681_v53, 2 }
  0x34   : > { %1022 = vmatpush.bf16.msrb.mxu1 %v1564_v41  ;;  %v1095_v41 = vunpack.c.h.b16 %v1791_v48  ;;  %v1153_v48 = vld [vmem:[%s1878_s3] sm:$0xff] }
  0x35   : > { %v685_v29 = vsel %vm682_vm7, %v683_v24, %v684_v25  ;;  %1158 = vperm.xlu0 %1584, %v1153_v48  }
  0x36   : > { %v1096_v49 = vpack.c.b16 %v1095_v41, %v1095_v41 }
  0x38   : > { %1023 = vmatpush.bf16.msrb.mxu1 %v1563_v10 }
  0x3a   : > { %1402 = vmatmul.msk.bf16.vlgmr.msrb.gmra.mxu2 %vm248_vm0, %v1708_v46  ;;  %1374 = vmatmul.msk.bf16.vlgmr.msrb.gmra.mxu0 %vm248_vm0, %v445_v36  ;;  %v744_v46 = vshrl.u32 %v1783_v43, 16  ;;  %v980_v36 = vpack.c.b16 %v979_v34, %v979_v34  ;;  %v987_v43 = vrot.slane %v985_v15, 2 }
  0x3b   : > { %1073 = vmatpush.bf16.msrb.mxu2 %v1566_v38  ;;  %957 = vmatpush.bf16.msrb.mxu0 %v1562_v39  ;;  %v1037_v39 = vld [vmem:[%s1674_s2 + $0x8] sm:$0xc] }
  0x3c   : > { %v746_v59 = vrot.slane %v744_v46, 2  ;;  %v990_v37 = vshrl.u32 %v980_v36, 16  ;;  %v993_v38 = vshll.u32 %v980_v36, 16  ;;  %v918_v46 = vld [vmem:[%s1674_s2 + $0x10] sm:$0x3] }
  0x3d   : > { %1416 = vmatmul.msk.bf16.vlgmr.msrb.gmra.mxu3 %vm248_vm0, %v626_v12  ;;  %v982_v12 = vshrl.u32 %v928_v35, 16  ;;  %v927_v52 = vunpack.c.l.b16 %v918_v46 }
  0x3e   : > { %1138 = vmatpush.bf16.msrb.mxu3 %v1568_v40  ;;  %v750_v4 = vor.u32 %v749_v60, %v746_v59  ;;  %v1044_v40 = vunpack.c.l.b16 %v1037_v39  ;;  %v992_v44 = vrot.slane %v990_v37, 1  ;;  %v995_v45 = vrot.slane %v993_v38, 2 }
  0x3f   : > { %1074 = vmatpush.bf16.msrb.mxu2 %v1565_v5  ;;  %958 = vmatpush.bf16.msrb.mxu0 %v1561_v8  ;;  %v984_v42 = vrot.slane %v982_v12, 1  ;;  %v1106_v59 = vshrl.u32 %v1096_v49, 16  ;;  %v1109_v60 = vshll.u32 %v1096_v49, 16  ;;  %v929_v61 = vpack.c.b16 %v927_v52, %v927_v52 }
  0x40   : > { %v751_v17 = vsel %vm734_vm6, %v742_v3, %v750_v4  ;;  %v1045_v47 = vpack.c.b16 %v1798_v57, %v1044_v40  ;;  %v996_v51 = vor.u32 %v995_v45, %v992_v44  ;;  %v1154_v3 = vld [vmem:[%s1878_s3 + $0x8] sm:$0xff] }
  0x41   : > { %v1108_v2 = vrot.slane %v1106_v59, 2  ;;  %v931_v5 = vrot.slane %v929_v61, 1  ;;  %1163 = vperm.xlu0 %1584, %v1154_v3  }
  0x42   : > { %1139 = vmatpush.bf16.msrb.mxu3 %v1567_v9  ;;  %v1098_v56 = vshrl.u32 %v1045_v47, 16  ;;  %v1101_v58 = vshll.u32 %v1045_v47, 16  ;;  %v1046_v62 = vrot.slane %v1045_v47, 2 }
  0x43   : > { %1389 = vmatmul.msk.bf16.gmra.mxu1 %vm248_vm0, %v520_v16  ;;  %v873_v16 = vshll.u32 %v860_v54, 16  ;;  %v1111_v54 = vrot.slane %v1109_v60, 3 }
  0x44   : > { %v1100_v0 = vrot.slane %v1098_v56, 2  ;;  %v1103_v1 = vrot.slane %v1101_v58, 3 }
  0x45   : > { %v875_v23 = vrot.slane %v873_v16, 4  ;;  %v1112_v8 = vor.u32 %v1111_v54, %v1108_v2 }
  0x46   : > { %v1104_v7 = vor.u32 %v1103_v1, %v1100_v0 }
  0x47   : > { %v876_v28 = vor.u32 %v875_v23, %v872_v22 }
  0x48   : > { %v1113_v10 = vsel %vm734_vm6, %v1104_v7, %v1112_v8 }
  0x4a   : > { %1403 = vmatmul.msk.bf16.gmra.mxu2 %vm248_vm0, %v567_v50  ;;  %1375 = vmatmul.msk.bf16.gmra.mxu0 %vm248_vm0, %v444_v32  ;;  %v877_v32 = vsel %vm504_vm4, %v868_v27, %v876_v28  ;;  %v988_v50 = vor.u32 %v987_v43, %v984_v42 }
  0x4c   : > { %v997_v57 = vsel %vm372_vm3, %v988_v50, %v996_v51 }
  0x4d   : > { %1417 = vmatmul.msk.bf16.gmra.mxu3 %vm248_vm0, %v629_v63  ;;  %v1047_v63 = vrot.slane %v980_v36, 2 }
  0x4f   : > { %v1048_v6 = vsel %vm682_vm7, %v1046_v62, %v1047_v63 }
  0x53   : > { %1444 = vmatmul.msk.bf16.vlgmr.msra.gmra.mxu1 %vm248_vm0, %v751_v17 }
  0x5a   : > { %1458 = vmatmul.msk.bf16.vlgmr.msra.gmra.mxu2 %vm248_vm0, %v802_v26  ;;  %1430 = vmatmul.msk.bf16.vlgmr.msra.gmra.mxu0 %vm248_vm0, %v685_v29 }
  0x5d   : > { %1476 = vmatmul.msk.bf16.vlgmr.msra.gmra.mxu3 %vm248_vm0, %v877_v32 }
  0x63   : > { %1445 = vmatmul.msk.bf16.gmra.mxu1 %vm248_vm0, %v750_v4  ;;  %v930_v4 = vrot.slane %v928_v35, 1 }
  0x65   : > { %v932_v9 = vsel %vm320_vm1, %v930_v4, %v931_v5  ;;  %vm1246_vm1 = vcmask 516096  }
  0x6a   : > { %1459 = vmatmul.msk.bf16.gmra.mxu2 %vm248_vm0, %v801_v19  ;;  %1431 = vmatmul.msk.bf16.gmra.mxu0 %vm248_vm0, %v684_v25 }
  0x6d   : > { %1477 = vmatmul.msk.bf16.gmra.mxu3 %vm248_vm0, %v876_v28 }
  0x73   : > { %1504 = vmatmul.msk.bf16.vlgmr.msrb.gmra.mxu1 %vm248_vm0, %v997_v57 }
  0x7a   : > { %1518 = vmatmul.msk.bf16.vlgmr.msrb.gmra.mxu2 %vm248_vm0, %v1048_v6  ;;  %1490 = vmatmul.msk.bf16.vlgmr.msrb.gmra.mxu0 %vm248_vm0, %v932_v9 }
  0x7d   : > { %1532 = vmatmul.msk.bf16.vlgmr.msrb.gmra.mxu3 %vm248_vm0, %v1113_v10 }
  0x83   : > { %1505 = vmatmul.msk.bf16.gmra.mxu1 %vm248_vm0, %v996_v51 }
  0x8a   : > { %1519 = vmatmul.msk.bf16.gmra.mxu2 %vm248_vm0, %v1047_v63  ;;  %1491 = vmatmul.msk.bf16.gmra.mxu0 %vm248_vm0, %v931_v5 }
  0x8d   : > { %1533 = vmatmul.msk.bf16.gmra.mxu3 %vm248_vm0, %v1112_v8  ;;  %vm1243_vm0 = vcmask 519168  }
  0x90   : > { %v302_v13 = vpop.f32.mrf.mxu1 }
  0x97   : > { %v264_v16 = vpop.f32.mrf.mxu0 }
  0x98   : > { %v304_v14 = vpop.f32.mrf.mxu1  ;;  %v303_v17 = vadd.f32 %v302_v13, %v264_v16 }
  0x9d   : > { %v351_v53 = vpop.f32.mrf.mxu2 }
  0x9e   : > { %v360_v18 = vadd.f32 %v351_v53, %v303_v17 }
  0x9f   : > { %v266_v20 = vpop.f32.mrf.mxu0 }
  0xa0   : > { %v307_v19 = vpop.f32.mrf.mxu1  ;;  %v417_v21 = vpop.f32.mrf.mxu3  ;;  %v305_v22 = vadd.f32 %v304_v14, %v266_v20 }
  0xa1   : > { %v426_v23 = vadd.f32 %v417_v21, %v360_v18 }
  0xa5   : > { %v353_v24 = vpop.f32.mrf.mxu2 }
  0xa6   : > { %v361_v25 = vadd.f32 %v353_v24, %v305_v22 }
  0xa7   : > { %v269_v27 = vpop.f32.mrf.mxu0 }
  0xa8   : > { %v309_v26 = vpop.f32.mrf.mxu1  ;;  %v419_v28 = vpop.f32.mrf.mxu3  ;;  %v308_v29 = vadd.f32 %v307_v19, %v269_v27 }
  0xa9   : > { %v427_v30 = vadd.f32 %v419_v28, %v361_v25 }
  0xad   : > { %v356_v31 = vpop.f32.mrf.mxu2 }
  0xae   : > { %v362_v32 = vadd.f32 %v356_v31, %v308_v29 }
  0xaf   : > { %v271_v34 = vpop.f32.mrf.mxu0 }
  0xb0   : > { %v549_v33 = vpop.f32.mrf.mxu1  ;;  %v422_v35 = vpop.f32.mrf.mxu3 }
  0xb1   : > { %v428_v36 = vadd.f32 %v422_v35, %v362_v32  ;;  %v1159_v34 = vpop.permute.xlu0 %1158 }
  0xb5   : > { %v358_v12 = vpop.f32.mrf.mxu2 }
  0xb7   : > { %v473_v38 = vpop.f32.mrf.mxu0 }
  0xb8   : > { %v551_v15 = vpop.f32.mrf.mxu1  ;;  %v424_v37 = vpop.f32.mrf.mxu3  ;;  %v482_v61 = vadd.f32 %v473_v38, %v426_v23 }
  0xba   : > { %v558_v63 = vadd.f32 %v549_v33, %v482_v61 }
  0xbd   : > { %v595_v39 = vpop.f32.mrf.mxu2 }
  0xbe   : > { %v604_v54 = vadd.f32 %v595_v39, %v558_v63 }
  0xbf   : > { %v475_v41 = vpop.f32.mrf.mxu0 }
  0xc0   : > { %v554_v40 = vpop.f32.mrf.mxu1  ;;  %v657_v42 = vpop.f32.mrf.mxu3  ;;  %v483_v3 = vadd.f32 %v475_v41, %v427_v30 }
  0xc1   : > { %v666_v4 = vadd.f32 %v657_v42, %v604_v54 }
  0xc2   : > { %v559_v6 = vadd.f32 %v551_v15, %v483_v3 }
  0xc5   : > { %v597_v43 = vpop.f32.mrf.mxu2 }
  0xc6   : > { %v605_v11 = vadd.f32 %v597_v43, %v559_v6 }
  0xc7   : > { %v478_v45 = vpop.f32.mrf.mxu0 }
  0xc8   : > { %v556_v44 = vpop.f32.mrf.mxu1  ;;  %v659_v46 = vpop.f32.mrf.mxu3  ;;  %v484_v13 = vadd.f32 %v478_v45, %v428_v36 }
  0xc9   : > { %v667_v16 = vadd.f32 %v659_v46, %v605_v11 }
  0xca   : > { %v560_v53 = vadd.f32 %v554_v40, %v484_v13 }
  0xcd   : > { %v600_v47 = vpop.f32.mrf.mxu2 }
  0xce   : > { %v606_v24 = vadd.f32 %v600_v47, %v560_v53 }
  0xcf   : > { %v480_v50 = vpop.f32.mrf.mxu0 }
  0xd0   : > { %v779_v49 = vpop.f32.mrf.mxu1  ;;  %v662_v51 = vpop.f32.mrf.mxu3 }
  0xd1   : > { %v668_v27 = vadd.f32 %v662_v51, %v606_v24  ;;  %v1164_v51 = vpop.permute.xlu0 %1163 }
  0xd5   : > { %v602_v52 = vpop.f32.mrf.mxu2 }
  0xd7   : > { %v713_v56 = vpop.f32.mrf.mxu0 }
  0xd8   : > { %v781_v55 = vpop.f32.mrf.mxu1  ;;  %v664_v48 = vpop.f32.mrf.mxu3  ;;  %v722_v7 = vadd.f32 %v713_v56, %v666_v4 }
  0xda   : > { %v788_v14 = vadd.f32 %v779_v49, %v722_v7 }
  0xdd   : > { %v830_v58 = vpop.f32.mrf.mxu2 }
  0xde   : > { %v839_v18 = vadd.f32 %v830_v58, %v788_v14 }
  0xdf   : > { %v715_v60 = vpop.f32.mrf.mxu0 }
  0xe0   : > { %v784_v59 = vpop.f32.mrf.mxu1  ;;  %v905_v57 = vpop.f32.mrf.mxu3  ;;  %v723_v19 = vadd.f32 %v715_v60, %v667_v16 }
  0xe1   : > { %v914_v20 = vadd.f32 %v905_v57, %v839_v18 }
  0xe2   : > { %v789_v25 = vadd.f32 %v781_v55, %v723_v19 }
  0xe5   : > { %v832_v62 = vpop.f32.mrf.mxu2 }
  0xe6   : > { %v840_v30 = vadd.f32 %v832_v62, %v789_v25 }
  0xe7   : > { %v718_v1 = vpop.f32.mrf.mxu0 }
  0xe8   : > { %v786_v0 = vpop.f32.mrf.mxu1  ;;  %v907_v2 = vpop.f32.mrf.mxu3  ;;  %v724_v31 = vadd.f32 %v718_v1, %v668_v27 }
  0xe9   : > { %v915_v32 = vadd.f32 %v907_v2, %v840_v30  ;;  %v1169_v0 = vpop.permute.xlu1 %1168 }
  0xea   : > { %v790_v15 = vadd.f32 %v784_v59, %v724_v31 }
  0xed   : > { %v835_v5 = vpop.f32.mrf.mxu2 }
  0xee   : > { %v841_v41 = vadd.f32 %v835_v5, %v790_v15 }
  0xef   : > { %v720_v9 = vpop.f32.mrf.mxu0 }
  0xf0   : > { %v1025_v8 = vpop.f32.mrf.mxu1  ;;  %v910_v10 = vpop.f32.mrf.mxu3 }
  0xf1   : > { %v916_v42 = vadd.f32 %v910_v10, %v841_v41 }
  0xf5   : > { %v837_v17 = vpop.f32.mrf.mxu2 }
  0xf7   : > { %v960_v23 = vpop.f32.mrf.mxu0 }
  0xf8   : > { %v1027_v21 = vpop.f32.mrf.mxu1  ;;  %v912_v22 = vpop.f32.mrf.mxu3  ;;  %v969_v26 = vadd.f32 %v960_v23, %v914_v20 }
  0xfa   : > { %v1034_v28 = vadd.f32 %v1025_v8, %v969_v26 }
  0xfd   : > { %v1076_v29 = vpop.f32.mrf.mxu2 }
  0xfe   : > { %v1085_v33 = vadd.f32 %v1076_v29, %v1034_v28 }
  0xff   : > { %v962_v36 = vpop.f32.mrf.mxu0 }
 0x100   : > { %v1030_v35 = vpop.f32.mrf.mxu1  ;;  %v1141_v12 = vpop.f32.mrf.mxu3  ;;  %v970_v37 = vadd.f32 %v962_v36, %v915_v32 }
 0x101   : > { %v1150_v38 = vadd.f32 %v1141_v12, %v1085_v33 }
 0x102   : > { %v1035_v39 = vadd.f32 %v1027_v21, %v970_v37 }
 0x103   : > { %1203 = vst.msk [vmem:[#allocation2] sm:$0xff] %vm1174_vm8, %v1150_v38  ;;  %v1171_v43 = vmul.f32 %v1159_v34, %v1150_v38 }
 0x105   : > { %v1078_v40 = vpop.f32.mrf.mxu2  ;;  %v1188_v52 = vmul.f32 %v1171_v43, %v1150_v38  ;;  %v1175_v59 = vsel %vm1174_vm8, %v1171_v43, 0.0 }
 0x106   : > { %v1086_v44 = vadd.f32 %v1078_v40, %v1035_v39 }
 0x107   : > { %v965_v46 = vpop.f32.mrf.mxu0  ;;  %v1191_v61 = vsel %vm1174_vm8, %v1188_v52, 0.0 }
 0x108   : > { %v1032_v45 = vpop.f32.mrf.mxu1  ;;  %v1143_v47 = vpop.f32.mrf.mxu3  ;;  %v971_v49 = vadd.f32 %v965_v46, %v916_v42 }
 0x109   : > { %v1151_v50 = vadd.f32 %v1143_v47, %v1086_v44 }
 0x10a   : > { %v1036_v48 = vadd.f32 %v1030_v35, %v971_v49  ;;  %v1222_v12 = vld [vmem:[#allocation2] sm:$0xff] }
 0x10b   : > { %v1172_v55 = vmul.f32 %v1164_v51, %v1151_v50  ;;  %1204 = vst.msk [vmem:[#allocation2 + $0x8] sm:$0xff] %vm1174_vm8, %v1151_v50 }
 0x10d   : > { %v1081_v56 = vpop.f32.mrf.mxu2  ;;  %v1189_v58 = vmul.f32 %v1172_v55, %v1151_v50  ;;  %v1176_v60 = vsel %vm1174_vm8, %v1172_v55, 0.0 }
 0x10e   : > { %v1177_v57 = vadd.f32 %v1176_v60, %v1175_v59  ;;  %v1087_v63 = vadd.f32 %v1081_v56, %v1036_v48 }
 0x10f   : > { %v1192_v62 = vsel %vm1174_vm8, %v1189_v58, 0.0  ;;  %v967_v1 = vpop.f32.mrf.mxu0 }
 0x110   : > { %v1146_v2 = vpop.f32.mrf.mxu3  ;;  %v1193_v54 = vadd.f32 %v1192_v62, %v1191_v61 }
 0x111   : > { %v1152_v3 = vadd.f32 %v1146_v2, %v1087_v63 }
 0x112   : > { %v1223_v15 = vld [vmem:[#allocation2 + $0x8] sm:$0xff] }
 0x113   : > { %v1173_v4 = vmul.f32 %v1169_v0, %v1152_v3  ;;  %1205 = vst.msk [vmem:[#allocation2 + $0x10] sm:$0x3] %vm1178_vm9, %v1152_v3 }
 0x115   : > { %v1083_v5 = vpop.f32.mrf.mxu2  ;;  %v1179_v6 = vsel %vm1178_vm9, %v1173_v4, 0.0  ;;  %v1190_v7 = vmul.f32 %v1173_v4, %v1152_v3 }
 0x116   : > { %v1180_v8 = vadd.f32 %v1179_v6, %v1177_v57 }
 0x117   : > { %v1194_v9 = vsel %vm1178_vm9, %v1190_v7, 0.0 }
 0x118   : > { %v1181_v10 = vrot.slane %v1180_v8, 4  ;;  %v1195_v11 = vadd.f32 %v1194_v9, %v1193_v54  ;;  %v1148_v13 = vpop.f32.mrf.mxu3 }
 0x11a   : > { %v1182_v14 = vadd.f32 %v1181_v10, %v1180_v8  ;;  %v1196_v16 = vrot.slane %v1195_v11, 4  ;;  %v1224_v37 = vld [vmem:[#allocation2 + $0x10] sm:$0x3] }
 0x11c   : > { %v1183_v17 = vrot.slane %v1182_v14, 2  ;;  %v1197_v53 = vadd.f32 %v1196_v16, %v1195_v11 }
 0x11e   : > { %v1184_v18 = vadd.f32 %v1183_v17, %v1182_v14  ;;  %v1198_v19 = vrot.slane %v1197_v53, 2 }
 0x120   : > { %v1185_v20 = vrot.slane %v1184_v18, 1  ;;  %v1199_v21 = vadd.f32 %v1198_v19, %v1197_v53 }
 0x122   : > { %v1186_v22 = vadd.f32 %v1185_v20, %v1184_v18  ;;  %v1200_v23 = vrot.slane %v1199_v21, 1 }
 0x124   : > { %v1201_v24 = vadd.f32 %v1200_v23, %v1199_v21  ;;  %v1206_v25 = vmul.f32 0.11111111, %v1186_v22 }
 0x126   : > { %v1207_v26 = vmul.f32 0.11111111, %v1201_v24  ;;  %v1208_v27 = vmul.f32 %v1206_v25, %v1206_v25  ;;  %v1225_v38 = vsub.f32 %v1222_v12, %v1206_v25  ;;  %v1226_v39 = vsub.f32 %v1223_v15, %v1206_v25 }
 0x127   : > { %v1227_v40 = vsub.f32 %v1224_v37, %v1206_v25 }
 0x128   : > { %v1209_v28 = vsub.f32 %v1207_v26, %v1208_v27 }
 0x12a   : > { %v1210_v29 = vmax.f32 %v1209_v28, 0.0 }
 0x12c   : > { %v1211_v30 = vadd.f32 1e-05, %v1210_v29 }
 0x12e   : > { %1586 = vrsqrt.f32 %v1211_v30  ;;  %vm1218_vm11 = vweird.f32 %v1211_v30 }
 0x134   : > { %v1587_v31 = vpop.eup %1586 }
 0x135   : > { %v1213_v32 = vmul.f32 %v1587_v31, %v1211_v30  ;;  %vm1219_vm10 = vweird.f32 %v1587_v31 }
 0x136   : > { %vm1220_vm12 = vmor %vm1218_vm11, %vm1219_vm10 }
 0x137   : > { %v1214_v33 = vmul.f32 %v1587_v31, %v1213_v32 }
 0x139   : > { %v1215_v34 = vmul.f32 0.5, %v1214_v33 }
 0x13b   : > { %v1216_v35 = vsub.f32 1.5, %v1215_v34 }
 0x13d   : > { %v1217_v36 = vmul.f32 %v1587_v31, %v1216_v35 }
 0x13f   : > { %v1221_v41 = vsel %vm1220_vm12, %v1587_v31, %v1217_v36 }
 0x140   : > { %v1228_v42 = vmul.f32 %v1225_v38, %v1221_v41  ;;  %v1229_v43 = vmul.f32 %v1226_v39, %v1221_v41  ;;  %v1230_v44 = vmul.f32 %v1227_v40, %v1221_v41 }
 0x142   : > { %vm1231_vm13 = vcmp.gt.f32.partialorder %v1228_v42, 0.0  ;;  %vm1232_vm14 = vcmp.gt.f32.partialorder %v1229_v43, 0.0  ;;  %vm1233_vm15 = vcmp.gt.f32.partialorder %v1230_v44, 0.0  ;;  %v1234_v45 = vmul.f32 0.2, %v1228_v42 }
 0x143   : > { %v1235_v46 = vmul.f32 0.2, %v1229_v43  ;;  %v1236_v47 = vmul.f32 0.2, %v1230_v44 }
 0x144   : > { %v1237_v49 = vsel %vm1231_vm13, %v1228_v42, %v1234_v45 }
 0x145   : > { %v1238_v50 = vsel %vm1232_vm14, %v1229_v43, %v1235_v46  ;;  %v1239_v51 = vsel %vm1233_vm15, %v1230_v44, %v1236_v47  ;;  %v1240_v52 = vpack.c.bf16 %v1237_v49, %v1237_v49 }
 0x146   : > { %v1241_v55 = vpack.c.bf16 %v1238_v50, %v1238_v50  ;;  %v1242_v48 = vpack.c.bf16 %v1239_v51, %v1239_v51 }
 0x147   : > { %1244 = vst.msk [vmem:[%s197_s19] sm:$0xf] %vm1243_vm0, %v1240_v52 }
 0x148   : > { %1245 = vst.msk [vmem:[%s197_s19 + $0x4] sm:$0xf] %vm1243_vm0, %v1241_v55 }
 0x149   : > { %1247 = vst.msk [vmem:[%s197_s19 + $0x8] sm:$0x1] %vm1246_vm1, %v1242_v48 }
 0x14a PF: > { %s14_s15 = sadd.s32 1, %s1599_s15  }
 0x14b   : > { %p11_p4 = scmp.ge.s32.totalorder %s14_s15, 4  }
 0x14d   :  { %13 = sbr.rel (!%p11_p4) target bundleno = 1 (0x1), region = 81 }

// kernel: discriminator_forward.9
= control target key start
LH: loop header
LB: loop body
LE: loop exit
PB: predicated region body
PF: predicated region fallthrough
CT: control target
= control target key end

     0   :  { %s1767_s17 = smov 0   ;;  %s2044_s0 = inlined_call_operand.vmem [shape: bf16[2,32,64], index: 0, kind: input, shape index: {}]   ;;  %s2045_s1 = inlined_call_operand.vmem [shape: bf16[16,64,1], index: 1, kind: input, shape index: {}]   ;;  %s2046_s2 = inlined_call_operand.<no memory space> [shape: f32[1,1], index: 2, kind: input, shape index: {}]   ;;  %s2047_s3 = inlined_call_operand.vmem [shape: f32[10,1], index: 3, kind: input, shape index: {}]   ;;  %s2048_s4 = inlined_call_operand.vmem [shape: f32[2,10,1], index: 4, kind: output, shape index: {}]  }
   0x1   :  { %v9_v0 = vstv %s2046_s2 }
   0x2   :  { %10 = vst [vmem:[#allocation2] sm:$0x1] %v9_v0 }
   0x3 LB: > { %s1253_s18 = sadd.s32 4294967295, %s1737_s17   ;;  %p1257_p0 = scmp.ge.s32.totalorder %s1737_s17, 1  ;;  %s1737_s17 = sphi %s1767_s17, %s16_s17  }
   0x4   : > { %p164_p1 = scmp.lt.s32.totalorder %s1737_s17, 3 }
   0x6   : > { %p165_p2 = pnand %p1257_p0, %p164_p1 }
   0x7   : > { %p190_p3 = scmp.lt.s32.totalorder (!%p165_p2), %s1253_s18, 1 }
   0x8   : > { %168 = sbr.rel (%p165_p2) target bundleno = 226 (0xe2), region = 36 }
   0xd   : > { %v1665_v1 = vld [vmem:[%s2045_s1 + $0x38] sm:$0xff]  ;;  %v1664_v5 = vld [vmem:[%s2045_s1 + $0x30] sm:$0xff]  ;;  %s2050_s18 = smov (!%p190_p3, %s1253_s18), 1  ;;  %v1663_v9 = vld [vmem:[%s2045_s1 + $0x28] sm:$0xff]  ;;  %vm258_vm0 = vcmask 523264   ;;  %vm1194_vm2 = vcmask 7168  }
   0xe   : > { %v1661_v2 = vld [vmem:[%s2045_s1 + $0x18] sm:$0xff]  ;;  %266 = vmatpush.bf16.msra.mxu0 %v1665_v1  ;;  %v1660_v6 = vld [vmem:[%s2045_s1 + $0x10] sm:$0xff]  ;;  %s1656_s7 = sshll.u32 %s2050_s18, 4  ;;  %v1659_v10 = vld [vmem:[%s2045_s1 + $0x8] sm:$0xff]  ;;  %vm585_vm1 = vsmask.f32 4352 }
   0xf   : > { %v1669_v3 = vld [vmem:[%s2045_s1 + $0x58] sm:$0xff]  ;;  %310 = vmatpush.bf16.msra.mxu1 %v1661_v2  ;;  %v1668_v7 = vld [vmem:[%s2045_s1 + $0x50] sm:$0xff]  ;;  %v1667_v11 = vld [vmem:[%s2045_s1 + $0x48] sm:$0xff]  ;;  %s1816_s16 = scalar_lea.vmem %s2044_s0, %s1656_s7  ;;  %s199_s28 = scalar_lea.vmem %s2048_s4, %s1656_s7  ;;  %vm1196_vm3 = vcmask 1024  }
  0x10   : > { %v1673_v4 = vld [vmem:[%s2045_s1 + $0x78] sm:$0xff]  ;;  %365 = vmatpush.bf16.msra.mxu2 %v1669_v3  ;;  %v1672_v8 = vld [vmem:[%s2045_s1 + $0x70] sm:$0xff]  ;;  %v1819_v12 = vld [vmem:[%s1816_s16] sm:$0xff]  }
  0x11   : > { %429 = vmatpush.bf16.msra.mxu3 %v1673_v4  ;;  %v212_v13 = vld [vmem:[%s1816_s16 + $0x4] sm:$0x3]  ;;  %v1671_v15 = vld [vmem:[%s2045_s1 + $0x68] sm:$0xff]  ;;  %v224_v16 = vunpack.c.l.b16 %v1819_v12  ;;  %v320_v18 = vld [vmem:[%s1816_s16] sm:$0xe]  ;;  %v455_v40 = vunpack.c.h.b16 %v1819_v12 }
  0x12   : > { %267 = vmatpush.bf16.msra.mxu0 %v1664_v5  ;;  %v203_v14 = vld [vmem:[%s1816_s16 + $0x4] sm:$0x1]  ;;  %v225_v17 = vunpack.c.l.b16 %v212_v13  ;;  %v331_v20 = vunpack.c.l.b16 %v320_v18  ;;  %v1685_v34 = vld [vmem:[%s2045_s1 + $0xd8] sm:$0xff]  ;;  %v441_v36 = vld [vmem:[%s1816_s16] sm:$0xc] }
  0x13   : > { %311 = vmatpush.bf16.msra.mxu1 %v1660_v6  ;;  %v377_v19 = vld [vmem:[%s1816_s16 + $0x4] sm:$0x7]  ;;  %v277_v23 = vunpack.c.l.b16 %v203_v14  ;;  %v1677_v35 = vld [vmem:[%s2045_s1 + $0x98] sm:$0xff]  ;;  %v454_v39 = vunpack.c.l.b16 %v441_v36  ;;  %v565_v41 = vld [vmem:[%s1816_s16] sm:$0x8] }
  0x14   : > { %366 = vmatpush.bf16.msra.mxu2 %v1668_v7  ;;  %v388_v21 = vunpack.c.l.b16 %v377_v19  ;;  %v226_v22 = vpack.c.b16 %v225_v17, %v224_v16  ;;  %v1662_v24 = vld [vmem:[%s2045_s1 + $0x20] sm:$0xff]  ;;  %v332_v26 = vpack.c.b16 %v225_v17, %v331_v20  ;;  %v567_v46 = vld [vmem:[%s1816_s16 + $0x8] sm:$0x1]  ;;  %v580_v47 = vunpack.c.l.b16 %v565_v41  ;;  %v1681_v49 = vld [vmem:[%s2045_s1 + $0xb8] sm:$0xff] }
  0x15   : > { %430 = vmatpush.bf16.msra.mxu3 %v1672_v8  ;;  %v1658_v25 = vld [vmem:[%s2045_s1] sm:$0xff]  ;;  %v278_v38 = vpack.c.b16 %v277_v23, %v224_v16  ;;  %v1689_v50 = vld [vmem:[%s2045_s1 + $0xf8] sm:$0xff]  ;;  %v1861_v52 = vunpack.c.l.b16 %v567_v46  ;;  %v1684_v54 = vld [vmem:[%s2045_s1 + $0xd0] sm:$0xff]  ;;  %v456_v56 = vpack.c.b16 %v455_v40, %v454_v39 }
  0x16   : > { %268 = vmatpush.bf16.msra.mxu0 %v1663_v9  ;;  %v389_v27 = vpack.c.b16 %v388_v21, %v331_v20  ;;  %v1666_v28 = vld [vmem:[%s2045_s1 + $0x40] sm:$0xff]  ;;  %v228_v30 = vshrl.u32 %v226_v22, 16  ;;  %v230_v31 = vshll.u32 %v226_v22, 16  ;;  %v333_v43 = vrot.slane %v332_v26, 1  ;;  %v1676_v55 = vld [vmem:[%s2045_s1 + $0x90] sm:$0xff]  ;;  %v1683_v0 = vld [vmem:[%s2045_s1 + $0xc8] sm:$0xff] }
  0x17   : > { %312 = vmatpush.bf16.msra.mxu1 %v1659_v10  ;;  %v1670_v29 = vld [vmem:[%s2045_s1 + $0x60] sm:$0xff]  ;;  %v1680_v58 = vld [vmem:[%s2045_s1 + $0xb0] sm:$0xff]  ;;  %v584_v61 = vpack.c.b16 %v1861_v52, %v1861_v52  ;;  %v1675_v1 = vld [vmem:[%s2045_s1 + $0x88] sm:$0xff]  ;;  %v458_v2 = vshrl.u32 %v456_v56, 16  ;;  %v461_v3 = vshll.u32 %v456_v56, 16 }
  0x18   : > { %367 = vmatpush.bf16.msra.mxu2 %v1667_v11  ;;  %v391_v32 = vshrl.u32 %v389_v27, 16  ;;  %v394_v33 = vshll.u32 %v389_v27, 16  ;;  %v232_v37 = vrot.slane %v230_v31, 1  ;;  %v1851_v42 = vld [vmem:[%s1816_s16 + $0x4] sm:$0xff]   ;;  %v1688_v59 = vld [vmem:[%s2045_s1 + $0xf0] sm:$0xff]  ;;  %v1701_v14 = vld [vmem:[%s2045_s1 + $0x158] sm:$0xff] }
  0x19   : > { %431 = vmatpush.bf16.msra.mxu3 %v1671_v15  ;;  %v581_v51 = vunpack.c.l.b16 %v1851_v42  ;;  %v508_v60 = vld [vmem:[%s1816_s16] sm:$0x8]  ;;  %v1679_v5 = vld [vmem:[%s2045_s1 + $0xa8] sm:$0xff]  ;;  %v595_v9 = vshll.u32 %v584_v61, 16  ;;  %v460_v12 = vrot.slane %v458_v2, 2  ;;  %v463_v13 = vrot.slane %v461_v3, 3 }
  0x1a   : > { %269 = vmatpush.bf16.msra.mxu0 %v1662_v24  ;;  %v393_v44 = vrot.slane %v391_v32, 1  ;;  %v396_v45 = vrot.slane %v394_v33, 2  ;;  %v233_v48 = vor.u32 %v232_v37, %v228_v30  ;;  %v519_v4 = vunpack.c.l.b16 %v508_v60  ;;  %v1687_v6 = vld [vmem:[%s2045_s1 + $0xe8] sm:$0xff]  ;;  %v1682_v10 = vld [vmem:[%s2045_s1 + $0xc0] sm:$0xff]  ;;  %v1693_v15 = vld [vmem:[%s2045_s1 + $0x118] sm:$0xff] }
  0x1b   : > { %313 = vmatpush.bf16.msra.mxu1 %v1658_v25  ;;  %v583_v57 = vpack.c.b16 %v581_v51, %v580_v47  ;;  %v1674_v11 = vld [vmem:[%s2045_s1 + $0x80] sm:$0xff]  ;;  %v597_v20 = vrot.slane %v595_v9, 4  ;;  %v755_v22 = vld [vmem:[%s1816_s16 + $0x8] sm:$0x7]  ;;  %v1697_v23 = vld [vmem:[%s2045_s1 + $0x138] sm:$0xff]  ;;  %v464_v26 = vor.u32 %v463_v13, %v460_v12  ;;  %v651_v32 = vpack.c.b16 %v1861_v52, %v581_v51 }
  0x1c   : > { %368 = vmatpush.bf16.msra.mxu2 %v1666_v28  ;;  %v397_v53 = vor.u32 %v396_v45, %v393_v44  ;;  %v1678_v16 = vld [vmem:[%s2045_s1 + $0xa0] sm:$0xff]  ;;  %v520_v17 = vpack.c.b16 %v455_v40, %v519_v4  ;;  %v1705_v24 = vld [vmem:[%s2045_s1 + $0x178] sm:$0xff]  ;;  %v1700_v27 = vld [vmem:[%s2045_s1 + $0x150] sm:$0xff]  ;;  %v766_v30 = vunpack.c.l.b16 %v755_v22 }
  0x1d   : > { %432 = vmatpush.bf16.msra.mxu3 %v1670_v29  ;;  %1286 = vmatmul.msk.bf16.vlgmr.msra.gmra.mxu0 %vm258_vm0, %v233_v48  ;;  %v587_v62 = vshrl.u32 %v583_v57, 16  ;;  %v590_v63 = vshll.u32 %v583_v57, 16  ;;  %v1686_v18 = vld [vmem:[%s2045_s1 + $0xe0] sm:$0xff]  ;;  %v1692_v33 = vld [vmem:[%s2045_s1 + $0x110] sm:$0xff]  ;;  %v696_v39 = vld [vmem:[%s1816_s16 + $0x8] sm:$0x3] }
  0x1e   : > { %496 = vmatpush.bf16.msrb.mxu0 %v1677_v35  ;;  %1303 = vmatmul.msk.bf16.vlgmr.msra.gmra.mxu1 %vm258_vm0, %v278_v38  ;;  %v695_v21 = vld [vmem:[%s1816_s16 + $0x4] sm:$0xe]  ;;  %v521_v28 = vrot.slane %v520_v17, 3  ;;  %v887_v35 = vunpack.c.h.b16 %v1851_v42  ;;  %v1696_v36 = vld [vmem:[%s2045_s1 + $0x130] sm:$0xff]  ;;  %v1699_v38 = vld [vmem:[%s2045_s1 + $0x148] sm:$0xff]  ;;  %v709_v46 = vunpack.c.l.b16 %v696_v39 }
  0x1f   : > { %1328 = vmatmul.msk.bf16.vlgmr.msra.gmra.mxu2 %vm258_vm0, %v333_v43  ;;  %553 = vmatpush.bf16.msrb.mxu1 %v1681_v49  ;;  %v589_v7 = vrot.slane %v587_v62, 3  ;;  %v592_v8 = vrot.slane %v590_v63, 4  ;;  %v819_v25 = vld [vmem:[%s1816_s16 + $0x4] sm:$0xc]  ;;  %v708_v29 = vunpack.c.l.b16 %v695_v21  ;;  %v1704_v37 = vld [vmem:[%s2045_s1 + $0x170] sm:$0xff]  ;;  %v1691_v41 = vld [vmem:[%s2045_s1 + $0x108] sm:$0xff] }
  0x20   : > { %630 = vmatpush.bf16.msrb.mxu2 %v1685_v34  ;;  %1353 = vmatmul.msk.bf16.vlgmr.msra.gmra.mxu3 %vm258_vm0, %v397_v53  ;;  %v830_v34 = vunpack.c.l.b16 %v819_v25  ;;  %v1695_v43 = vld [vmem:[%s2045_s1 + $0x128] sm:$0xff]  ;;  %v1698_v45 = vld [vmem:[%s2045_s1 + $0x140] sm:$0xff]  ;;  %v1713_v60 = vld [vmem:[%s2045_s1 + $0x1b8] sm:$0xff] }
  0x21   : > { %683 = vmatpush.bf16.msrb.mxu3 %v1689_v50  ;;  %v593_v19 = vor.u32 %v592_v8, %v589_v7  ;;  %v767_v40 = vpack.c.b16 %v766_v30, %v708_v29  ;;  %v1703_v44 = vld [vmem:[%s2045_s1 + $0x168] sm:$0xff]  ;;  %v1690_v47 = vld [vmem:[%s2045_s1 + $0x100] sm:$0xff]  ;;  %v1717_v50 = vld [vmem:[%s2045_s1 + $0x1d8] sm:$0xff]  ;;  %v710_v57 = vpack.c.b16 %v709_v46, %v708_v29 }
  0x22   : > { %497 = vmatpush.bf16.msrb.mxu0 %v1676_v55  ;;  %v888_v42 = vpack.c.b16 %v887_v35, %v830_v34  ;;  %v940_v53 = vld [vmem:[%s1816_s16 + $0x4] sm:$0x8]  ;;  %v1721_v63 = vld [vmem:[%s2045_s1 + $0x1f8] sm:$0xff]  ;;  %v1712_v9 = vld [vmem:[%s2045_s1 + $0x1b0] sm:$0xff] }
  0x23   : > { %554 = vmatpush.bf16.msrb.mxu1 %v1680_v58  ;;  %v598_v31 = vsel %vm585_vm1, %v593_v19, %v597_v20  ;;  %v769_v48 = vshrl.u32 %v767_v40, 16  ;;  %v772_v49 = vshll.u32 %v767_v40, 16  ;;  %v1694_v55 = vld [vmem:[%s2045_s1 + $0x120] sm:$0xff]  ;;  %v831_v58 = vpack.c.b16 %v766_v30, %v830_v34  ;;  %v1715_v17 = vld [vmem:[%s2045_s1 + $0x1c8] sm:$0xff] }
  0x24   : > { %631 = vmatpush.bf16.msrb.mxu2 %v1684_v54  ;;  %v890_v51 = vshrl.u32 %v888_v42, 16  ;;  %v893_v52 = vshll.u32 %v888_v42, 16  ;;  %v941_v54 = vld [vmem:[%s1816_s16 + $0x8] sm:$0xf]  ;;  %v1702_v56 = vld [vmem:[%s2045_s1 + $0x160] sm:$0xff]  ;;  %v711_v7 = vrot.slane %v710_v57, 1 }
  0x25   : > { %684 = vmatpush.bf16.msrb.mxu3 %v1688_v59  ;;  %v1709_v59 = vld [vmem:[%s2045_s1 + $0x198] sm:$0xff]  ;;  %v771_v61 = vrot.slane %v769_v48, 1  ;;  %v774_v62 = vrot.slane %v772_v49, 2  ;;  %v1986_v2 = vunpack.c.l.b16 %v941_v54  ;;  %v832_v8 = vrot.slane %v831_v58, 2  ;;  %v1714_v25 = vld [vmem:[%s2045_s1 + $0x1c0] sm:$0xff] }
  0x26   : > { %498 = vmatpush.bf16.msrb.mxu0 %v1675_v1  ;;  %v955_v1 = vunpack.c.l.b16 %v940_v53  ;;  %v892_v3 = vrot.slane %v890_v51, 2  ;;  %v895_v4 = vrot.slane %v893_v52, 3  ;;  %v1718_v34 = vld [vmem:[%s2045_s1 + $0x1e0] sm:$0xff] }
  0x27   : > { %555 = vmatpush.bf16.msrb.mxu1 %v1679_v5  ;;  %v942_v5 = vld [vmem:[%s1816_s16 + $0xc] sm:$0x1] }
  0x28   : > { %632 = vmatpush.bf16.msrb.mxu2 %v1683_v0  ;;  %v1716_v0 = vld [vmem:[%s2045_s1 + $0x1d0] sm:$0xff]  ;;  %v958_v12 = vpack.c.b16 %v1986_v2, %v955_v1 }
  0x29   : > { %685 = vmatpush.bf16.msrb.mxu3 %v1687_v6  ;;  %v1069_v6 = vld [vmem:[%s1816_s16 + $0xc] sm:$0x3] }
  0x2a   : > { %499 = vmatpush.bf16.msrb.mxu0 %v1674_v11  ;;  %v957_v11 = vunpack.c.l.b16 %v942_v5  ;;  %v1080_v13 = vunpack.c.l.b16 %v1069_v6  ;;  %v961_v20 = vshrl.u32 %v958_v12, 16  ;;  %v964_v21 = vshll.u32 %v958_v12, 16 }
  0x2b   : > { %556 = vmatpush.bf16.msrb.mxu1 %v1678_v16  ;;  %v1720_v16 = vld [vmem:[%s2045_s1 + $0x1f0] sm:$0xff] }
  0x2c   : > { %633 = vmatpush.bf16.msrb.mxu2 %v1682_v10  ;;  %v775_v10 = vor.u32 %v774_v62, %v771_v61  ;;  %v959_v19 = vpack.c.b16 %v957_v11, %v957_v11  ;;  %v1081_v22 = vpack.c.b16 %v1080_v13, %v1986_v2  ;;  %v966_v29 = vrot.slane %v964_v21, 4 }
  0x2d   : > { %686 = vmatpush.bf16.msrb.mxu3 %v1686_v18  ;;  %1378 = vmatmul.msk.bf16.vlgmr.msrb.gmra.mxu0 %vm258_vm0, %v464_v26  ;;  %v1711_v18 = vld [vmem:[%s2045_s1 + $0x1a8] sm:$0xff] }
  0x2e   : > { %743 = vmatpush.bf16.msra.mxu0 %v1693_v15  ;;  %1403 = vmatmul.msk.bf16.vlgmr.msrb.gmra.mxu1 %vm258_vm0, %v521_v28  ;;  %v1708_v15 = vld [vmem:[%s2045_s1 + $0x190] sm:$0xff]  ;;  %v1132_v26 = vld [vmem:[%s1816_s16 + $0x8] sm:$0xe]  ;;  %v963_v28 = vrot.slane %v961_v20, 3  ;;  %v969_v30 = vshll.u32 %v959_v19, 16 }
  0x2f   : > { %807 = vmatpush.bf16.msra.mxu1 %v1697_v23  ;;  %1428 = vmatmul.msk.bf16.vlgmr.msrb.gmra.mxu2 %vm258_vm0, %v598_v31  ;;  %v1707_v23 = vld [vmem:[%s2045_s1 + $0x188] sm:$0xff]  ;;  %v1085_v31 = vshll.u32 %v1081_v22, 16 }
  0x30   : > { %864 = vmatpush.bf16.msra.mxu2 %v1701_v14  ;;  %1453 = vmatmul.msk.bf16.vlgmr.msrb.gmra.mxu3 %vm258_vm0, %v651_v32  ;;  %v896_v14 = vor.u32 %v895_v4, %v892_v3  ;;  %v1706_v32 = vld [vmem:[%s2045_s1 + $0x180] sm:$0xff]  ;;  %v967_v35 = vor.u32 %v966_v29, %v963_v28 }
  0x31   : > { %928 = vmatpush.bf16.msra.mxu3 %v1705_v24  ;;  %v1719_v24 = vld [vmem:[%s2045_s1 + $0x1e8] sm:$0xff] }
  0x32   : > { %744 = vmatpush.bf16.msra.mxu0 %v1692_v33  ;;  %v1143_v33 = vunpack.c.l.b16 %v1132_v26 }
  0x33   : > { %808 = vmatpush.bf16.msra.mxu1 %v1696_v36  ;;  %v971_v36 = vrot.slane %v969_v30, 4 }
  0x34   : > { %865 = vmatpush.bf16.msra.mxu2 %v1700_v27  ;;  %v1710_v27 = vld [vmem:[%s2045_s1 + $0x1a0] sm:$0xff]  ;;  %v1144_v39 = vpack.c.b16 %v1080_v13, %v1143_v33 }
  0x35   : > { %929 = vmatpush.bf16.msra.mxu3 %v1704_v37  ;;  %v1083_v37 = vshrl.u32 %v1081_v22, 16  ;;  %v972_v40 = vsel %vm585_vm1, %v967_v35, %v971_v36  ;;  %v1730_v33 = vld [vmem:[#allocation2] ss:$0 sm:$0xff] }
  0x36   : > { %745 = vmatpush.bf16.msra.mxu0 %v1691_v41  ;;  %v1025_v41 = vpack.c.b16 %v957_v11, %v1986_v2 }
  0x37   : > { %809 = vmatpush.bf16.msra.mxu1 %v1695_v43  ;;  %v1145_v43 = vrot.slane %v1144_v39, 1 }
  0x38   : > { %866 = vmatpush.bf16.msra.mxu2 %v1699_v38  ;;  %v1087_v38 = vrot.slane %v1085_v31, 1 }
  0x39   : > { %930 = vmatpush.bf16.msra.mxu3 %v1703_v44 }
  0x3a   : > { %746 = vmatpush.bf16.msra.mxu0 %v1690_v47  ;;  %v1088_v42 = vor.u32 %v1087_v38, %v1083_v37 }
  0x3b   : > { %810 = vmatpush.bf16.msra.mxu1 %v1694_v55 }
  0x3c   : > { %867 = vmatpush.bf16.msra.mxu2 %v1698_v45 }
  0x3d   : > { %931 = vmatpush.bf16.msra.mxu3 %v1702_v56  ;;  %1478 = vmatmul.msk.bf16.vlgmr.msra.gmra.mxu0 %vm258_vm0, %v711_v7 }
  0x3e   : > { %1004 = vmatpush.bf16.msrb.mxu0 %v1709_v59  ;;  %1503 = vmatmul.msk.bf16.vlgmr.msra.gmra.mxu1 %vm258_vm0, %v775_v10 }
  0x3f   : > { %1057 = vmatpush.bf16.msrb.mxu1 %v1713_v60  ;;  %1528 = vmatmul.msk.bf16.vlgmr.msra.gmra.mxu2 %vm258_vm0, %v832_v8 }
  0x40   : > { %1120 = vmatpush.bf16.msrb.mxu2 %v1717_v50  ;;  %1553 = vmatmul.msk.bf16.vlgmr.msra.gmra.mxu3 %vm258_vm0, %v896_v14 }
  0x41   : > { %1177 = vmatpush.bf16.msrb.mxu3 %v1721_v63 }
  0x42   : > { %1005 = vmatpush.bf16.msrb.mxu0 %v1708_v15 }
  0x43   : > { %1058 = vmatpush.bf16.msrb.mxu1 %v1712_v9 }
  0x44   : > { %1121 = vmatpush.bf16.msrb.mxu2 %v1716_v0 }
  0x45   : > { %1178 = vmatpush.bf16.msrb.mxu3 %v1720_v16 }
  0x46   : > { %1006 = vmatpush.bf16.msrb.mxu0 %v1707_v23 }
  0x47   : > { %1059 = vmatpush.bf16.msrb.mxu1 %v1711_v18 }
  0x48   : > { %1122 = vmatpush.bf16.msrb.mxu2 %v1715_v17 }
  0x49   : > { %1179 = vmatpush.bf16.msrb.mxu3 %v1719_v24 }
  0x4a   : > { %1007 = vmatpush.bf16.msrb.mxu0 %v1706_v32 }
  0x4b   : > { %1060 = vmatpush.bf16.msrb.mxu1 %v1710_v27 }
  0x4c   : > { %1123 = vmatpush.bf16.msrb.mxu2 %v1714_v25 }
  0x4d   : > { %1180 = vmatpush.bf16.msrb.mxu3 %v1718_v34  ;;  %1578 = vmatmul.msk.bf16.vlgmr.msrb.gmra.mxu0 %vm258_vm0, %v972_v40 }
  0x4e   : > { %1603 = vmatmul.msk.bf16.vlgmr.msrb.gmra.mxu1 %vm258_vm0, %v1025_v41 }
  0x4f   : > { %1628 = vmatmul.msk.bf16.vlgmr.msrb.gmra.mxu2 %vm258_vm0, %v1088_v42 }
  0x50   : > { %1653 = vmatmul.msk.bf16.vlgmr.msrb.gmra.mxu3 %vm258_vm0, %v1145_v43 }
  0x9a   : > { %v271_v44 = vpop.f32.mrf.mxu0 }
  0x9b   : > { %v315_v45 = vpop.f32.mrf.mxu1 }
  0x9c   : > { %v316_v54 = vadd.f32 %v315_v45, %v271_v44 }
  0xa2   : > { %v370_v46 = vpop.f32.mrf.mxu2  ;;  %v273_v48 = vpop.f32.mrf.mxu0 }
  0xa3   : > { %v434_v47 = vpop.f32.mrf.mxu3  ;;  %v317_v49 = vpop.f32.mrf.mxu1  ;;  %v375_v55 = vadd.f32 %v370_v46, %v316_v54 }
  0xa4   : > { %v318_v61 = vadd.f32 %v317_v49, %v273_v48 }
  0xa5   : > { %v439_v57 = vadd.f32 %v434_v47, %v375_v55 }
  0xaa   : > { %v372_v50 = vpop.f32.mrf.mxu2  ;;  %v501_v52 = vpop.f32.mrf.mxu0 }
  0xab   : > { %v436_v51 = vpop.f32.mrf.mxu3  ;;  %v558_v53 = vpop.f32.mrf.mxu1  ;;  %v506_v62 = vadd.f32 %v501_v52, %v439_v57  ;;  %v376_v63 = vadd.f32 %v372_v50, %v318_v61 }
  0xad   : > { %v563_v0 = vadd.f32 %v558_v53, %v506_v62  ;;  %v440_v2 = vadd.f32 %v436_v51, %v376_v63 }
  0xb2   : > { %v635_v56 = vpop.f32.mrf.mxu2  ;;  %v503_v59 = vpop.f32.mrf.mxu0 }
  0xb3   : > { %v688_v58 = vpop.f32.mrf.mxu3  ;;  %v560_v60 = vpop.f32.mrf.mxu1  ;;  %v640_v3 = vadd.f32 %v635_v56, %v563_v0  ;;  %v507_v7 = vadd.f32 %v503_v59, %v440_v2 }
  0xb5   : > { %v693_v8 = vadd.f32 %v688_v58, %v640_v3  ;;  %v564_v9 = vadd.f32 %v560_v60, %v507_v7 }
  0xba   : > { %v637_v1 = vpop.f32.mrf.mxu2  ;;  %v748_v5 = vpop.f32.mrf.mxu0 }
  0xbb   : > { %v690_v4 = vpop.f32.mrf.mxu3  ;;  %v812_v6 = vpop.f32.mrf.mxu1  ;;  %v753_v10 = vadd.f32 %v748_v5, %v693_v8  ;;  %v641_v12 = vadd.f32 %v637_v1, %v564_v9 }
  0xbd   : > { %v817_v16 = vadd.f32 %v812_v6, %v753_v10  ;;  %v694_v17 = vadd.f32 %v690_v4, %v641_v12 }
  0xc2   : > { %v869_v11 = vpop.f32.mrf.mxu2  ;;  %v750_v14 = vpop.f32.mrf.mxu0 }
  0xc3   : > { %v933_v13 = vpop.f32.mrf.mxu3  ;;  %v814_v15 = vpop.f32.mrf.mxu1  ;;  %v874_v18 = vadd.f32 %v869_v11, %v817_v16  ;;  %v754_v19 = vadd.f32 %v750_v14, %v694_v17 }
  0xc5   : > { %v938_v21 = vadd.f32 %v933_v13, %v874_v18  ;;  %v818_v24 = vadd.f32 %v814_v15, %v754_v19 }
  0xca   : > { %v871_v20 = vpop.f32.mrf.mxu2  ;;  %v1009_v23 = vpop.f32.mrf.mxu0 }
  0xcb   : > { %v935_v22 = vpop.f32.mrf.mxu3  ;;  %v1014_v25 = vadd.f32 %v1009_v23, %v938_v21  ;;  %v1062_v26 = vpop.f32.mrf.mxu1  ;;  %v875_v27 = vadd.f32 %v871_v20, %v818_v24 }
  0xcd   : > { %v1067_v28 = vadd.f32 %v1062_v26, %v1014_v25  ;;  %v939_v30 = vadd.f32 %v935_v22, %v875_v27 }
  0xd2   : > { %v1125_v29 = vpop.f32.mrf.mxu2  ;;  %v1011_v34 = vpop.f32.mrf.mxu0 }
  0xd3   : > { %v1130_v31 = vadd.f32 %v1125_v29, %v1067_v28  ;;  %v1182_v32 = vpop.f32.mrf.mxu3  ;;  %v1015_v36 = vadd.f32 %v1011_v34, %v939_v30  ;;  %v1064_v38 = vpop.f32.mrf.mxu1 }
  0xd5   : > { %v1187_v35 = vadd.f32 %v1182_v32, %v1130_v31  ;;  %v1068_v39 = vadd.f32 %v1064_v38, %v1015_v36 }
  0xd7   : > { %v1192_v37 = vadd.f32 %v1730_v33, %v1187_v35 }
  0xd9   : > { %1195 = vst.msk [vmem:[%s199_s28] sm:$0xff] %vm1194_vm2, %v1192_v37 }
  0xda   : > { %v1127_v40 = vpop.f32.mrf.mxu2 }
  0xdb   : > { %v1131_v41 = vadd.f32 %v1127_v40, %v1068_v39  ;;  %v1184_v42 = vpop.f32.mrf.mxu3 }
  0xdd   : > { %v1188_v43 = vadd.f32 %v1184_v42, %v1131_v41 }
  0xdf   : > { %v1193_v44 = vadd.f32 %v1730_v33, %v1188_v43 }
  0xe1   : > { %1197 = vst.msk [vmem:[%s199_s28 + $0x8] sm:$0x3] %vm1196_vm3, %v1193_v44 }
  0xe2 PF: > { %s16_s17 = sadd.s32 1, %s1737_s17  }
  0xe3   : > { %p13_p4 = scmp.ge.s32.totalorder %s16_s17, 4  }
  0xe5   :  { %15 = sbr.rel (!%p13_p4) target bundleno = 3 (0x3), region = 81 }

</bundles_post_ra>
